<compile_context>
chip_gen: v7x
topology: tpu7x:2x2x1
jax: 0.10.0
libtpu: 0.0.40
codegen_flags: <defaults>
</compile_context>

<pallas_src>
import functools
import math

import jax
import jax.numpy as jnp
from jax.experimental import pallas as pl
from jax.experimental.pallas import tpu as pltpu


# ---------------------------------------------------------------------------
# Pallas kernel: whole forward for a block of Bt samples per grid step.
# ---------------------------------------------------------------------------
def _classifier_kernel(x_ref, misc_ref, w_ref, b_ref, out_ref, *, num_heads):
    Bt, N, D = x_ref.shape
    H = num_heads
    ds = D // H
    S = misc_ref.shape[0] - 2            # number of PMA seeds
    CP = out_ref.shape[-1]               # num_classes padded to a lane-dense width
    # NOTE: the original Set-Transformer code scales logits by 1/sqrt(dim_V),
    # NOT 1/sqrt(dim_V / num_heads). Keep it that way (do not "fix" silently).
    scale = 1.0 / math.sqrt(D)

    # Static column offsets into the packed weight / bias tensors.
    c_kv1 = (0, 2 * D)                   # [Wk1 | Wv1]   (fused K|V for PMA)
    c_q1 = (2 * D, 3 * D)                # Wq1
    c_o1 = (3 * D, 4 * D)                # Wo1
    c_qkv2 = (4 * D, 7 * D)              # [Wq2 | Wk2 | Wv2] (fused Q|K|V for SAB)
    c_o2 = (7 * D, 8 * D)                # Wo2
    c_w1 = (8 * D, 9 * D)                # classifier hidden Linear
    c_w2 = (9 * D, 9 * D + CP)           # classifier output Linear (zero-padded to CP)

    def proj(x2d, lo_hi):
        lo, hi = lo_hi
        return (jnp.dot(x2d, w_ref[:, lo:hi], preferred_element_type=jnp.float32)
                + b_ref[:, lo:hi])

    seed = misc_ref[0:S, :]              # (S, D)
    gamma = misc_ref[S:S + 1, :]         # (1, D)
    beta = misc_ref[S + 1:S + 2, :]      # (1, D)

    # ---- LayerNorm over features, on the flattened (Bt*N, D) slab ----
    x = x_ref[...].reshape(Bt * N, D)
    mean = jnp.mean(x, axis=-1, keepdims=True)
    var = jnp.mean((x - mean) ** 2, axis=-1, keepdims=True)
    xn = (x - mean) * jax.lax.rsqrt(var + 1e-5) * gamma + beta

    # ---- multi-head attention core, batched over the Bt samples ----
    def mha(q_b, k_b, v_b):
        # q_b: (Bt, Sq, D); k_b, v_b: (Bt, Sk, D)
        outs = []
        for h in range(H):               # small static loop; static lane slices
            lo, hi = h * ds, (h + 1) * ds
            qh = q_b[:, :, lo:hi]
            kh = k_b[:, :, lo:hi]
            vh = v_b[:, :, lo:hi]
            logits = jnp.einsum("bsd,bnd->bsn", qh, kh,
                                preferred_element_type=jnp.float32) * scale
            logits = logits - jnp.max(logits, axis=-1, keepdims=True)
            e = jnp.exp(logits)
            # Exact reciprocal keeps tight parity with the jnp reference;
            # approx=True would push this onto the otherwise-idle EUP.
            inv = pl.reciprocal(jnp.sum(e, axis=-1, keepdims=True), approx=False)
            a = e * inv
            outs.append(qh + jnp.einsum("bsn,bnd->bsd", a, vh,
                                        preferred_element_type=jnp.float32))
        return jnp.concatenate(outs, axis=-1)          # (Bt, Sq, D)

    # ---- PMA: seeds attend over the normalized set elements ----
    kv1 = proj(xn, c_kv1)                              # (Bt*N, 2D), fused K|V
    k1 = kv1[:, :D].reshape(Bt, N, D)
    v1 = kv1[:, D:].reshape(Bt, N, D)
    q1 = proj(seed, c_q1)                              # (S, D), shared across the batch
    q1b = jnp.broadcast_to(q1, (Bt, S, D))
    o1 = mha(q1b, k1, v1).reshape(Bt * S, D)
    o1 = o1 + jax.nn.relu(proj(o1, c_o1))

    # ---- SAB: self-attention over the pooled seeds ----
    qkv2 = proj(o1, c_qkv2)                            # (Bt*S, 3D), fused Q|K|V
    q2 = qkv2[:, :D].reshape(Bt, S, D)
    k2 = qkv2[:, D:2 * D].reshape(Bt, S, D)
    v2 = qkv2[:, 2 * D:].reshape(Bt, S, D)
    o2 = mha(q2, k2, v2).reshape(Bt * S, D)
    o2 = o2 + jax.nn.relu(proj(o2, c_o2))

    # ---- max over seeds + classifier head (Dropout = identity at inference) ----
    pooled = jnp.max(o2.reshape(Bt, S, D), axis=1)     # (Bt, D)
    h1 = jax.nn.silu(proj(pooled, c_w1))               # (Bt, D)
    out_ref[...] = proj(h1, c_w2)                      # (Bt, CP) lane-dense store


# ---------------------------------------------------------------------------
# Wrapper: parameter packing + pallas_call
# ---------------------------------------------------------------------------
def classifier_pallas(x, params, *, num_heads, dim, num_classes, block_b=8):
    B, N, D = x.shape
    assert D == dim and dim % num_heads == 0

    (seed, gamma, beta,
     wq1, bq1, wk1, bk1, wv1, bv1, wo1, bo1,
     wq2, bq2, wk2, bk2, wv2, bv2, wo2, bo2,
     w1, b1, w2, b2) = params

    # Pad the class dimension to a lane-dense width (zero weight columns) so the final
    # matmul and the output store are unmasked; sliced back below.
    cp = ((num_classes + 127) // 128) * 128
    w2p = jnp.zeros((dim, cp), jnp.float32).at[:, :num_classes].set(w2)
    b2p = jnp.zeros((1, cp), jnp.float32).at[:, :num_classes].set(b2)

    # Pack the 23 parameter tensors into 3 arrays (fewer DMAs / BlockSpecs and fused,
    # lane-dense K|V and Q|K|V projection matmuls inside the kernel).
    w_pack = jnp.concatenate(
        [wk1, wv1, wq1, wo1, wq2, wk2, wv2, wo2, w1, w2p], axis=1)      # (D, 9D+cp)
    b_pack = jnp.concatenate(
        [bk1, bv1, bq1, bo1, bq2, bk2, bv2, bo2, b1, b2p], axis=1)      # (1, 9D+cp)
    misc_pack = jnp.concatenate([seed, gamma, beta], axis=0)            # (S+2, D)

    # Batch-block the grid: Bt samples per step (pad the batch with zero rows).
    bt = block_b
    b_pad = ((B + bt - 1) // bt) * bt
    x_pad = x if b_pad == B else jnp.pad(x, ((0, b_pad - B), (0, 0), (0, 0)))

    kernel = functools.partial(_classifier_kernel, num_heads=num_heads)

    out = pl.pallas_call(
        kernel,
        out_shape=jax.ShapeDtypeStruct((b_pad, cp), jnp.float32),
        grid_spec=pltpu.PrefetchScalarGridSpec(
            num_scalar_prefetch=0,
            grid=(b_pad // bt,),
            in_specs=[
                pl.BlockSpec((bt, N, D), lambda b: (b, 0, 0)),
                pl.BlockSpec(misc_pack.shape, lambda b: (0, 0)),
                pl.BlockSpec(w_pack.shape, lambda b: (0, 0)),
                pl.BlockSpec(b_pack.shape, lambda b: (0, 0)),
            ],
            out_specs=pl.BlockSpec((bt, cp), lambda b: (b, 0)),
        ),
        compiler_params=pltpu.CompilerParams(
            dimension_semantics=("parallel",),     # batch blocks shard across TCs
            vmem_limit_bytes=32 * 1024 * 1024,
        ),
    )(x_pad, misc_pack, w_pack, b_pack)
    return out[:B, :num_classes]


# ---------------------------------------------------------------------------
# Pure-JAX reference (same math as the PyTorch module, per-sample).
# ---------------------------------------------------------------------------
def _mab_ref(Q_in, K_in, Wq, bq, Wk, bk, Wv, bv, Wo, bo, num_heads, dim):
    Q = jnp.dot(Q_in, Wq) + bq
    K = jnp.dot(K_in, Wk) + bk
    V = jnp.dot(K_in, Wv) + bv
    ds = dim // num_heads
    scale = 1.0 / math.sqrt(dim)   # matches original code: sqrt(dim_V), not sqrt(dim_V/H)
    outs = []
    for h in range(num_heads):
        lo, hi = h * ds, (h + 1) * ds
        Qh, Kh, Vh = Q[:, lo:hi], K[:, lo:hi], V[:, lo:hi]
        logits = jnp.dot(Qh, Kh.T) * scale
        logits = logits - jnp.max(logits, axis=-1, keepdims=True)
        e = jnp.exp(logits)
        A = e / jnp.sum(e, axis=-1, keepdims=True)
        outs.append(Qh + jnp.dot(A, Vh))
    O = jnp.concatenate(outs, axis=-1)
    return O + jax.nn.relu(jnp.dot(O, Wo) + bo)


def _forward_single(xb, params, num_heads, dim):
    (seed, gamma, beta,
     wq1, bq1, wk1, bk1, wv1, bv1, wo1, bo1,
     wq2, bq2, wk2, bk2, wv2, bv2, wo2, bo2,
     w1, b1, w2, b2) = params
    mean = jnp.mean(xb, axis=-1, keepdims=True)
    var = jnp.mean((xb - mean) ** 2, axis=-1, keepdims=True)
    xn = (xb - mean) * jax.lax.rsqrt(var + 1e-5) * gamma + beta
    p = _mab_ref(seed, xn, wq1, bq1, wk1, bk1, wv1, bv1, wo1, bo1, num_heads, dim)
    s = _mab_ref(p, p, wq2, bq2, wk2, bk2, wv2, bv2, wo2, bo2, num_heads, dim)
    pooled = jnp.max(s, axis=0, keepdims=True)
    h = jax.nn.silu(jnp.dot(pooled, w1) + b1)
    return jnp.dot(h, w2) + b2


def classifier_reference(x, params, *, num_heads, dim):
    fn = lambda xb: _forward_single(xb, params, num_heads, dim)
    return jax.vmap(fn)(x).reshape(x.shape[0], -1)


# ---------------------------------------------------------------------------
# Deterministic parameter init
# ---------------------------------------------------------------------------
def init_params(key, dim, num_seeds, num_classes):
    keys = jax.random.split(key, 32)
    it = iter(keys)

    def lin(din, dout):
        w = jax.random.normal(next(it), (din, dout), jnp.float32) / math.sqrt(din)
        b = 0.01 * jax.random.normal(next(it), (1, dout), jnp.float32)
        return w, b

    seed_S = jax.random.normal(next(it), (num_seeds, dim), jnp.float32) * 0.1
    gamma = jnp.ones((1, dim), jnp.float32)
    beta = jnp.zeros((1, dim), jnp.float32)

    wq1, bq1 = lin(dim, dim); wk1, bk1 = lin(dim, dim)
    wv1, bv1 = lin(dim, dim); wo1, bo1 = lin(dim, dim)
    wq2, bq2 = lin(dim, dim); wk2, bk2 = lin(dim, dim)
    wv2, bv2 = lin(dim, dim); wo2, bo2 = lin(dim, dim)
    w1, b1 = lin(dim, dim)
    w2, b2 = lin(dim, num_classes)

    return (seed_S, gamma, beta,
            wq1, bq1, wk1, bk1, wv1, bv1, wo1, bo1,
            wq2, bq2, wk2, bk2, wv2, bv2, wo2, bo2,
            w1, b1, w2, b2)


if __name__ == "__main__":
    # Small shapes consistent with the module: batch=2, set size=8, dim=32,
    # num_heads=4, num_seeds=4, num_classes=3.
    B, N, DIM = 2, 8, 32
    NUM_HEADS, NUM_SEEDS, NUM_CLASSES = 4, 4, 3

    key = jax.random.PRNGKey(0)
    kx, kp, kx2 = jax.random.split(key, 3)
    x = jax.random.normal(kx, (B, N, DIM), jnp.float32)
    params = init_params(kp, DIM, NUM_SEEDS, NUM_CLASSES)

    out = jax.block_until_ready(
        classifier_pallas(x, params, num_heads=NUM_HEADS, dim=DIM,
                          num_classes=NUM_CLASSES))
    ref = jax.block_until_ready(
        classifier_reference(x, params, num_heads=NUM_HEADS, dim=DIM))
    assert out.shape == (B, NUM_CLASSES)
    assert jnp.allclose(out, ref, rtol=1e-3, atol=1e-3), (out, ref)

    # Second check: multiple grid steps + batch padding path (B not a multiple of block_b).
    B2 = 17
    x2 = jax.random.normal(kx2, (B2, N, DIM), jnp.float32)
    out2 = jax.block_until_ready(
        classifier_pallas(x2, params, num_heads=NUM_HEADS, dim=DIM,
                          num_classes=NUM_CLASSES))
    ref2 = classifier_reference(x2, params, num_heads=NUM_HEADS, dim=DIM)
    assert out2.shape == (B2, NUM_CLASSES)
    assert jnp.allclose(out2, ref2, rtol=1e-3, atol=1e-3), (out2, ref2)

    # TODO(synk): Dropout layers are treated as identity (inference semantics);
    # training-mode stochastic dropout is not implemented in the kernel.
    print("KERNEL_OK")
</pallas_src>

<mosaic_0001>
module attributes {stable_mosaic.version = 11 : i64} {
  func.func @_classifier_kernel(%arg0: i32, %arg1: memref<8x8x32xf32, #tpu.memory_space<vmem>>, %arg2: memref<6x32xf32, #tpu.memory_space<vmem>>, %arg3: memref<32x416xf32, #tpu.memory_space<vmem>>, %arg4: memref<1x416xf32, #tpu.memory_space<vmem>>, %arg5: memref<8x128xf32, #tpu.memory_space<vmem>>) attributes {dimension_semantics = [#tpu.dimension_semantics<parallel>], iteration_bounds = array<i64: 1>, scalar_prefetch = 0 : i64, scratch_operands = 0 : i64, tpu.core_type = #tpu.core_type<tc>, window_params = [{transform_indices = @transform_0, window_bounds = array<i64: 8, 8, 32>}, {pipeline_mode = #tpu.pipeline_mode<synchronous>, transform_indices = @transform_1, window_bounds = array<i64: 6, 32>}, {pipeline_mode = #tpu.pipeline_mode<synchronous>, transform_indices = @transform_2, window_bounds = array<i64: 32, 416>}, {pipeline_mode = #tpu.pipeline_mode<synchronous>, transform_indices = @transform_3, window_bounds = array<i64: 1, 416>}, {transform_indices = @transform_4, window_bounds = array<i64: 8, 128>}]} {
    %c0 = arith.constant 0 : index
    %c0_0 = arith.constant 0 : index
    %0 = vector.load %arg2[%c0, %c0_0] : memref<6x32xf32, #tpu.memory_space<vmem>>, vector<4x32xf32>
    %c4 = arith.constant 4 : index
    %c0_1 = arith.constant 0 : index
    %1 = vector.load %arg2[%c4, %c0_1] : memref<6x32xf32, #tpu.memory_space<vmem>>, vector<1x32xf32>
    %c5 = arith.constant 5 : index
    %c0_2 = arith.constant 0 : index
    %2 = vector.load %arg2[%c5, %c0_2] : memref<6x32xf32, #tpu.memory_space<vmem>>, vector<1x32xf32>
    %c0_3 = arith.constant 0 : index
    %c0_4 = arith.constant 0 : index
    %c0_5 = arith.constant 0 : index
    %3 = vector.load %arg1[%c0_3, %c0_4, %c0_5] : memref<8x8x32xf32, #tpu.memory_space<vmem>>, vector<8x8x32xf32>
    %4 = vector.shape_cast %3 : vector<8x8x32xf32> to vector<64x32xf32>
    %cst = arith.constant dense<0.000000e+00> : vector<64xf32>
    %5 = vector.multi_reduction <add>, %4, %cst [1] : vector<64x32xf32> to vector<64xf32>
    %6 = vector.shape_cast %5 : vector<64xf32> to vector<64x1xf32>
    %cst_6 = arith.constant 3.200000e+01 : f32
    %7 = vector.broadcast %cst_6 : f32 to vector<64x1xf32>
    %8 = arith.divf %6, %7 : vector<64x1xf32>
    %9 = vector.broadcast %8 : vector<64x1xf32> to vector<64x32xf32>
    %10 = arith.subf %4, %9 : vector<64x32xf32>
    %11 = arith.mulf %10, %10 : vector<64x32xf32>
    %cst_7 = arith.constant dense<0.000000e+00> : vector<64xf32>
    %12 = vector.multi_reduction <add>, %11, %cst_7 [1] : vector<64x32xf32> to vector<64xf32>
    %13 = vector.shape_cast %12 : vector<64xf32> to vector<64x1xf32>
    %cst_8 = arith.constant 3.200000e+01 : f32
    %14 = vector.broadcast %cst_8 : f32 to vector<64x1xf32>
    %15 = arith.divf %13, %14 : vector<64x1xf32>
    %16 = vector.broadcast %8 : vector<64x1xf32> to vector<64x32xf32>
    %17 = arith.subf %4, %16 : vector<64x32xf32>
    %cst_9 = arith.constant 9.99999974E-6 : f32
    %18 = vector.broadcast %cst_9 : f32 to vector<64x1xf32>
    %19 = arith.addf %15, %18 : vector<64x1xf32>
    %20 = math.rsqrt %19 : vector<64x1xf32>
    %21 = vector.broadcast %20 : vector<64x1xf32> to vector<64x32xf32>
    %22 = arith.mulf %17, %21 : vector<64x32xf32>
    %23 = vector.broadcast %1 : vector<1x32xf32> to vector<64x32xf32>
    %24 = arith.mulf %22, %23 : vector<64x32xf32>
    %25 = vector.broadcast %2 : vector<1x32xf32> to vector<64x32xf32>
    %26 = arith.addf %24, %25 : vector<64x32xf32>
    %c0_10 = arith.constant 0 : index
    %c0_11 = arith.constant 0 : index
    %27 = vector.load %arg3[%c0_10, %c0_11] : memref<32x416xf32, #tpu.memory_space<vmem>>, vector<32x64xf32>
    %cst_12 = arith.constant dense<0.000000e+00> : vector<64x64xf32>
    %28 = tpu.matmul %26, %27, %cst_12 {dimension_numbers = #tpu.dot_dimension_numbers<[1], [0], [0], [1], [0, 0, 1, 1], [], []>} : vector<64x32xf32>, vector<32x64xf32>, vector<64x64xf32> -> vector<64x64xf32>
    %c0_13 = arith.constant 0 : index
    %c0_14 = arith.constant 0 : index
    %29 = vector.load %arg4[%c0_13, %c0_14] : memref<1x416xf32, #tpu.memory_space<vmem>>, vector<1x64xf32>
    %30 = vector.broadcast %29 : vector<1x64xf32> to vector<64x64xf32>
    %31 = arith.addf %28, %30 : vector<64x64xf32>
    %32 = vector.extract_strided_slice %31 {offsets = [0, 0], sizes = [64, 32], strides = [1, 1]} : vector<64x64xf32> to vector<64x32xf32>
    %33 = vector.shape_cast %32 : vector<64x32xf32> to vector<8x8x32xf32>
    %34 = vector.extract_strided_slice %31 {offsets = [0, 32], sizes = [64, 32], strides = [1, 1]} : vector<64x64xf32> to vector<64x32xf32>
    %35 = vector.shape_cast %34 : vector<64x32xf32> to vector<8x8x32xf32>
    %c0_15 = arith.constant 0 : index
    %c64 = arith.constant 64 : index
    %36 = vector.load %arg3[%c0_15, %c64] : memref<32x416xf32, #tpu.memory_space<vmem>>, vector<32x32xf32>
    %cst_16 = arith.constant dense<0.000000e+00> : vector<4x32xf32>
    %37 = tpu.matmul %0, %36, %cst_16 {dimension_numbers = #tpu.dot_dimension_numbers<[1], [0], [0], [1], [0, 0, 1, 1], [], []>} : vector<4x32xf32>, vector<32x32xf32>, vector<4x32xf32> -> vector<4x32xf32>
    %c0_17 = arith.constant 0 : index
    %c64_18 = arith.constant 64 : index
    %38 = vector.load %arg4[%c0_17, %c64_18] : memref<1x416xf32, #tpu.memory_space<vmem>>, vector<1x32xf32>
    %39 = vector.broadcast %38 : vector<1x32xf32> to vector<4x32xf32>
    %40 = arith.addf %37, %39 : vector<4x32xf32>
    %41 = vector.shape_cast %40 : vector<4x32xf32> to vector<1x4x32xf32>
    %42 = vector.broadcast %41 : vector<1x4x32xf32> to vector<8x4x32xf32>
    %43 = vector.extract_strided_slice %42 {offsets = [0, 0, 0], sizes = [8, 4, 8], strides = [1, 1, 1]} : vector<8x4x32xf32> to vector<8x4x8xf32>
    %44 = vector.extract_strided_slice %33 {offsets = [0, 0, 0], sizes = [8, 8, 8], strides = [1, 1, 1]} : vector<8x8x32xf32> to vector<8x8x8xf32>
    %45 = vector.extract_strided_slice %35 {offsets = [0, 0, 0], sizes = [8, 8, 8], strides = [1, 1, 1]} : vector<8x8x32xf32> to vector<8x8x8xf32>
    "tpu.trace_start"() <{level = 10 : i32, message = "bsd,bnd->bsn"}> : () -> ()
    %cst_19 = arith.constant dense<0.000000e+00> : vector<8x4x8xf32>
    %46 = tpu.matmul %43, %44, %cst_19 {dimension_numbers = #tpu.dot_dimension_numbers<[2], [2], [1], [1], [0, 0, 0, 1, 1, 1], [0], [0]>} : vector<8x4x8xf32>, vector<8x8x8xf32>, vector<8x4x8xf32> -> vector<8x4x8xf32>
    "tpu.trace_stop"() : () -> ()
    %cst_20 = arith.constant 0.176776692 : f32
    %47 = vector.broadcast %cst_20 : f32 to vector<8x4x8xf32>
    %48 = arith.mulf %46, %47 : vector<8x4x8xf32>
    %cst_21 = arith.constant dense<0xFF800000> : vector<8x4xf32>
    %49 = vector.multi_reduction <maximumf>, %48, %cst_21 [2] : vector<8x4x8xf32> to vector<8x4xf32>
    %50 = vector.shape_cast %49 : vector<8x4xf32> to vector<8x4x1xf32>
    %51 = vector.broadcast %50 : vector<8x4x1xf32> to vector<8x4x8xf32>
    %52 = arith.subf %48, %51 : vector<8x4x8xf32>
    %53 = math.exp %52 : vector<8x4x8xf32>
    %cst_22 = arith.constant dense<0.000000e+00> : vector<8x4xf32>
    %54 = vector.multi_reduction <add>, %53, %cst_22 [2] : vector<8x4x8xf32> to vector<8x4xf32>
    %55 = vector.shape_cast %54 : vector<8x4xf32> to vector<8x4x1xf32>
    %56 = tpu.reciprocal %55 : vector<8x4x1xf32> -> vector<8x4x1xf32>
    %57 = vector.broadcast %56 : vector<8x4x1xf32> to vector<8x4x8xf32>
    %58 = arith.mulf %53, %57 : vector<8x4x8xf32>
    "tpu.trace_start"() <{level = 10 : i32, message = "bsn,bnd->bsd"}> : () -> ()
    %cst_23 = arith.constant dense<0.000000e+00> : vector<8x4x8xf32>
    %59 = tpu.matmul %58, %45, %cst_23 {dimension_numbers = #tpu.dot_dimension_numbers<[2], [1], [1], [2], [0, 0, 0, 1, 1, 2], [0], [0]>} : vector<8x4x8xf32>, vector<8x8x8xf32>, vector<8x4x8xf32> -> vector<8x4x8xf32>
    "tpu.trace_stop"() : () -> ()
    %60 = arith.addf %43, %59 : vector<8x4x8xf32>
    %61 = vector.extract_strided_slice %42 {offsets = [0, 0, 8], sizes = [8, 4, 8], strides = [1, 1, 1]} : vector<8x4x32xf32> to vector<8x4x8xf32>
    %62 = vector.extract_strided_slice %33 {offsets = [0, 0, 8], sizes = [8, 8, 8], strides = [1, 1, 1]} : vector<8x8x32xf32> to vector<8x8x8xf32>
    %63 = vector.extract_strided_slice %35 {offsets = [0, 0, 8], sizes = [8, 8, 8], strides = [1, 1, 1]} : vector<8x8x32xf32> to vector<8x8x8xf32>
    "tpu.trace_start"() <{level = 10 : i32, message = "bsd,bnd->bsn"}> : () -> ()
    %cst_24 = arith.constant dense<0.000000e+00> : vector<8x4x8xf32>
    %64 = tpu.matmul %61, %62, %cst_24 {dimension_numbers = #tpu.dot_dimension_numbers<[2], [2], [1], [1], [0, 0, 0, 1, 1, 1], [0], [0]>} : vector<8x4x8xf32>, vector<8x8x8xf32>, vector<8x4x8xf32> -> vector<8x4x8xf32>
    "tpu.trace_stop"() : () -> ()
    %cst_25 = arith.constant 0.176776692 : f32
    %65 = vector.broadcast %cst_25 : f32 to vector<8x4x8xf32>
    %66 = arith.mulf %64, %65 : vector<8x4x8xf32>
    %cst_26 = arith.constant dense<0xFF800000> : vector<8x4xf32>
    %67 = vector.multi_reduction <maximumf>, %66, %cst_26 [2] : vector<8x4x8xf32> to vector<8x4xf32>
    %68 = vector.shape_cast %67 : vector<8x4xf32> to vector<8x4x1xf32>
    %69 = vector.broadcast %68 : vector<8x4x1xf32> to vector<8x4x8xf32>
    %70 = arith.subf %66, %69 : vector<8x4x8xf32>
    %71 = math.exp %70 : vector<8x4x8xf32>
    %cst_27 = arith.constant dense<0.000000e+00> : vector<8x4xf32>
    %72 = vector.multi_reduction <add>, %71, %cst_27 [2] : vector<8x4x8xf32> to vector<8x4xf32>
    %73 = vector.shape_cast %72 : vector<8x4xf32> to vector<8x4x1xf32>
    %74 = tpu.reciprocal %73 : vector<8x4x1xf32> -> vector<8x4x1xf32>
    %75 = vector.broadcast %74 : vector<8x4x1xf32> to vector<8x4x8xf32>
    %76 = arith.mulf %71, %75 : vector<8x4x8xf32>
    "tpu.trace_start"() <{level = 10 : i32, message = "bsn,bnd->bsd"}> : () -> ()
    %cst_28 = arith.constant dense<0.000000e+00> : vector<8x4x8xf32>
    %77 = tpu.matmul %76, %63, %cst_28 {dimension_numbers = #tpu.dot_dimension_numbers<[2], [1], [1], [2], [0, 0, 0, 1, 1, 2], [0], [0]>} : vector<8x4x8xf32>, vector<8x8x8xf32>, vector<8x4x8xf32> -> vector<8x4x8xf32>
    "tpu.trace_stop"() : () -> ()
    %78 = arith.addf %61, %77 : vector<8x4x8xf32>
    %79 = vector.extract_strided_slice %42 {offsets = [0, 0, 16], sizes = [8, 4, 8], strides = [1, 1, 1]} : vector<8x4x32xf32> to vector<8x4x8xf32>
    %80 = vector.extract_strided_slice %33 {offsets = [0, 0, 16], sizes = [8, 8, 8], strides = [1, 1, 1]} : vector<8x8x32xf32> to vector<8x8x8xf32>
    %81 = vector.extract_strided_slice %35 {offsets = [0, 0, 16], sizes = [8, 8, 8], strides = [1, 1, 1]} : vector<8x8x32xf32> to vector<8x8x8xf32>
    "tpu.trace_start"() <{level = 10 : i32, message = "bsd,bnd->bsn"}> : () -> ()
    %cst_29 = arith.constant dense<0.000000e+00> : vector<8x4x8xf32>
    %82 = tpu.matmul %79, %80, %cst_29 {dimension_numbers = #tpu.dot_dimension_numbers<[2], [2], [1], [1], [0, 0, 0, 1, 1, 1], [0], [0]>} : vector<8x4x8xf32>, vector<8x8x8xf32>, vector<8x4x8xf32> -> vector<8x4x8xf32>
    "tpu.trace_stop"() : () -> ()
    %cst_30 = arith.constant 0.176776692 : f32
    %83 = vector.broadcast %cst_30 : f32 to vector<8x4x8xf32>
    %84 = arith.mulf %82, %83 : vector<8x4x8xf32>
    %cst_31 = arith.constant dense<0xFF800000> : vector<8x4xf32>
    %85 = vector.multi_reduction <maximumf>, %84, %cst_31 [2] : vector<8x4x8xf32> to vector<8x4xf32>
    %86 = vector.shape_cast %85 : vector<8x4xf32> to vector<8x4x1xf32>
    %87 = vector.broadcast %86 : vector<8x4x1xf32> to vector<8x4x8xf32>
    %88 = arith.subf %84, %87 : vector<8x4x8xf32>
    %89 = math.exp %88 : vector<8x4x8xf32>
    %cst_32 = arith.constant dense<0.000000e+00> : vector<8x4xf32>
    %90 = vector.multi_reduction <add>, %89, %cst_32 [2] : vector<8x4x8xf32> to vector<8x4xf32>
    %91 = vector.shape_cast %90 : vector<8x4xf32> to vector<8x4x1xf32>
    %92 = tpu.reciprocal %91 : vector<8x4x1xf32> -> vector<8x4x1xf32>
    %93 = vector.broadcast %92 : vector<8x4x1xf32> to vector<8x4x8xf32>
    %94 = arith.mulf %89, %93 : vector<8x4x8xf32>
    "tpu.trace_start"() <{level = 10 : i32, message = "bsn,bnd->bsd"}> : () -> ()
    %cst_33 = arith.constant dense<0.000000e+00> : vector<8x4x8xf32>
    %95 = tpu.matmul %94, %81, %cst_33 {dimension_numbers = #tpu.dot_dimension_numbers<[2], [1], [1], [2], [0, 0, 0, 1, 1, 2], [0], [0]>} : vector<8x4x8xf32>, vector<8x8x8xf32>, vector<8x4x8xf32> -> vector<8x4x8xf32>
    "tpu.trace_stop"() : () -> ()
    %96 = arith.addf %79, %95 : vector<8x4x8xf32>
    %97 = vector.extract_strided_slice %42 {offsets = [0, 0, 24], sizes = [8, 4, 8], strides = [1, 1, 1]} : vector<8x4x32xf32> to vector<8x4x8xf32>
    %98 = vector.extract_strided_slice %33 {offsets = [0, 0, 24], sizes = [8, 8, 8], strides = [1, 1, 1]} : vector<8x8x32xf32> to vector<8x8x8xf32>
    %99 = vector.extract_strided_slice %35 {offsets = [0, 0, 24], sizes = [8, 8, 8], strides = [1, 1, 1]} : vector<8x8x32xf32> to vector<8x8x8xf32>
    "tpu.trace_start"() <{level = 10 : i32, message = "bsd,bnd->bsn"}> : () -> ()
    %cst_34 = arith.constant dense<0.000000e+00> : vector<8x4x8xf32>
    %100 = tpu.matmul %97, %98, %cst_34 {dimension_numbers = #tpu.dot_dimension_numbers<[2], [2], [1], [1], [0, 0, 0, 1, 1, 1], [0], [0]>} : vector<8x4x8xf32>, vector<8x8x8xf32>, vector<8x4x8xf32> -> vector<8x4x8xf32>
    "tpu.trace_stop"() : () -> ()
    %cst_35 = arith.constant 0.176776692 : f32
    %101 = vector.broadcast %cst_35 : f32 to vector<8x4x8xf32>
    %102 = arith.mulf %100, %101 : vector<8x4x8xf32>
    %cst_36 = arith.constant dense<0xFF800000> : vector<8x4xf32>
    %103 = vector.multi_reduction <maximumf>, %102, %cst_36 [2] : vector<8x4x8xf32> to vector<8x4xf32>
    %104 = vector.shape_cast %103 : vector<8x4xf32> to vector<8x4x1xf32>
    %105 = vector.broadcast %104 : vector<8x4x1xf32> to vector<8x4x8xf32>
    %106 = arith.subf %102, %105 : vector<8x4x8xf32>
    %107 = math.exp %106 : vector<8x4x8xf32>
    %cst_37 = arith.constant dense<0.000000e+00> : vector<8x4xf32>
    %108 = vector.multi_reduction <add>, %107, %cst_37 [2] : vector<8x4x8xf32> to vector<8x4xf32>
    %109 = vector.shape_cast %108 : vector<8x4xf32> to vector<8x4x1xf32>
    %110 = tpu.reciprocal %109 : vector<8x4x1xf32> -> vector<8x4x1xf32>
    %111 = vector.broadcast %110 : vector<8x4x1xf32> to vector<8x4x8xf32>
    %112 = arith.mulf %107, %111 : vector<8x4x8xf32>
    "tpu.trace_start"() <{level = 10 : i32, message = "bsn,bnd->bsd"}> : () -> ()
    %cst_38 = arith.constant dense<0.000000e+00> : vector<8x4x8xf32>
    %113 = tpu.matmul %112, %99, %cst_38 {dimension_numbers = #tpu.dot_dimension_numbers<[2], [1], [1], [2], [0, 0, 0, 1, 1, 2], [0], [0]>} : vector<8x4x8xf32>, vector<8x8x8xf32>, vector<8x4x8xf32> -> vector<8x4x8xf32>
    "tpu.trace_stop"() : () -> ()
    %114 = arith.addf %97, %113 : vector<8x4x8xf32>
    %115 = tpu.concatenate %60, %78, %96, %114 in 2 : vector<8x4x8xf32>, vector<8x4x8xf32>, vector<8x4x8xf32>, vector<8x4x8xf32> -> vector<8x4x32xf32>
    %116 = vector.shape_cast %115 : vector<8x4x32xf32> to vector<32x32xf32>
    %c0_39 = arith.constant 0 : index
    %c96 = arith.constant 96 : index
    %117 = vector.load %arg3[%c0_39, %c96] : memref<32x416xf32, #tpu.memory_space<vmem>>, vector<32x32xf32>
    %cst_40 = arith.constant dense<0.000000e+00> : vector<32x32xf32>
    %118 = tpu.matmul %116, %117, %cst_40 {dimension_numbers = #tpu.dot_dimension_numbers<[1], [0], [0], [1], [0, 0, 1, 1], [], []>} : vector<32x32xf32>, vector<32x32xf32>, vector<32x32xf32> -> vector<32x32xf32>
    %c0_41 = arith.constant 0 : index
    %c96_42 = arith.constant 96 : index
    %119 = vector.load %arg4[%c0_41, %c96_42] : memref<1x416xf32, #tpu.memory_space<vmem>>, vector<1x32xf32>
    %120 = vector.broadcast %119 : vector<1x32xf32> to vector<32x32xf32>
    %121 = arith.addf %118, %120 : vector<32x32xf32>
    %cst_43 = arith.constant 0.000000e+00 : f32
    %122 = vector.broadcast %cst_43 : f32 to vector<32x32xf32>
    %123 = arith.maximumf %121, %122 : vector<32x32xf32>
    %124 = arith.addf %116, %123 : vector<32x32xf32>
    %c0_44 = arith.constant 0 : index
    %c128 = arith.constant 128 : index
    %125 = vector.load %arg3[%c0_44, %c128] : memref<32x416xf32, #tpu.memory_space<vmem>>, vector<32x96xf32>
    %cst_45 = arith.constant dense<0.000000e+00> : vector<32x96xf32>
    %126 = tpu.matmul %124, %125, %cst_45 {dimension_numbers = #tpu.dot_dimension_numbers<[1], [0], [0], [1], [0, 0, 1, 1], [], []>} : vector<32x32xf32>, vector<32x96xf32>, vector<32x96xf32> -> vector<32x96xf32>
    %c0_46 = arith.constant 0 : index
    %c128_47 = arith.constant 128 : index
    %127 = vector.load %arg4[%c0_46, %c128_47] : memref<1x416xf32, #tpu.memory_space<vmem>>, vector<1x96xf32>
    %128 = vector.broadcast %127 : vector<1x96xf32> to vector<32x96xf32>
    %129 = arith.addf %126, %128 : vector<32x96xf32>
    %130 = vector.extract_strided_slice %129 {offsets = [0, 0], sizes = [32, 32], strides = [1, 1]} : vector<32x96xf32> to vector<32x32xf32>
    %131 = vector.shape_cast %130 : vector<32x32xf32> to vector<8x4x32xf32>
    %132 = vector.extract_strided_slice %129 {offsets = [0, 32], sizes = [32, 32], strides = [1, 1]} : vector<32x96xf32> to vector<32x32xf32>
    %133 = vector.shape_cast %132 : vector<32x32xf32> to vector<8x4x32xf32>
    %134 = vector.extract_strided_slice %129 {offsets = [0, 64], sizes = [32, 32], strides = [1, 1]} : vector<32x96xf32> to vector<32x32xf32>
    %135 = vector.shape_cast %134 : vector<32x32xf32> to vector<8x4x32xf32>
    %136 = vector.extract_strided_slice %131 {offsets = [0, 0, 0], sizes = [8, 4, 8], strides = [1, 1, 1]} : vector<8x4x32xf32> to vector<8x4x8xf32>
    %137 = vector.extract_strided_slice %133 {offsets = [0, 0, 0], sizes = [8, 4, 8], strides = [1, 1, 1]} : vector<8x4x32xf32> to vector<8x4x8xf32>
    %138 = vector.extract_strided_slice %135 {offsets = [0, 0, 0], sizes = [8, 4, 8], strides = [1, 1, 1]} : vector<8x4x32xf32> to vector<8x4x8xf32>
    "tpu.trace_start"() <{level = 10 : i32, message = "bsd,bnd->bsn"}> : () -> ()
    %cst_48 = arith.constant dense<0.000000e+00> : vector<8x4x4xf32>
    %139 = tpu.matmul %136, %137, %cst_48 {dimension_numbers = #tpu.dot_dimension_numbers<[2], [2], [1], [1], [0, 0, 0, 1, 1, 1], [0], [0]>} : vector<8x4x8xf32>, vector<8x4x8xf32>, vector<8x4x4xf32> -> vector<8x4x4xf32>
    "tpu.trace_stop"() : () -> ()
    %cst_49 = arith.constant 0.176776692 : f32
    %140 = vector.broadcast %cst_49 : f32 to vector<8x4x4xf32>
    %141 = arith.mulf %139, %140 : vector<8x4x4xf32>
    %cst_50 = arith.constant dense<0xFF800000> : vector<8x4xf32>
    %142 = vector.multi_reduction <maximumf>, %141, %cst_50 [2] : vector<8x4x4xf32> to vector<8x4xf32>
    %143 = vector.shape_cast %142 : vector<8x4xf32> to vector<8x4x1xf32>
    %144 = vector.broadcast %143 : vector<8x4x1xf32> to vector<8x4x4xf32>
    %145 = arith.subf %141, %144 : vector<8x4x4xf32>
    %146 = math.exp %145 : vector<8x4x4xf32>
    %cst_51 = arith.constant dense<0.000000e+00> : vector<8x4xf32>
    %147 = vector.multi_reduction <add>, %146, %cst_51 [2] : vector<8x4x4xf32> to vector<8x4xf32>
    %148 = vector.shape_cast %147 : vector<8x4xf32> to vector<8x4x1xf32>
    %149 = tpu.reciprocal %148 : vector<8x4x1xf32> -> vector<8x4x1xf32>
    %150 = vector.broadcast %149 : vector<8x4x1xf32> to vector<8x4x4xf32>
    %151 = arith.mulf %146, %150 : vector<8x4x4xf32>
    "tpu.trace_start"() <{level = 10 : i32, message = "bsn,bnd->bsd"}> : () -> ()
    %cst_52 = arith.constant dense<0.000000e+00> : vector<8x4x8xf32>
    %152 = tpu.matmul %151, %138, %cst_52 {dimension_numbers = #tpu.dot_dimension_numbers<[2], [1], [1], [2], [0, 0, 0, 1, 1, 2], [0], [0]>} : vector<8x4x4xf32>, vector<8x4x8xf32>, vector<8x4x8xf32> -> vector<8x4x8xf32>
    "tpu.trace_stop"() : () -> ()
    %153 = arith.addf %136, %152 : vector<8x4x8xf32>
    %154 = vector.extract_strided_slice %131 {offsets = [0, 0, 8], sizes = [8, 4, 8], strides = [1, 1, 1]} : vector<8x4x32xf32> to vector<8x4x8xf32>
    %155 = vector.extract_strided_slice %133 {offsets = [0, 0, 8], sizes = [8, 4, 8], strides = [1, 1, 1]} : vector<8x4x32xf32> to vector<8x4x8xf32>
    %156 = vector.extract_strided_slice %135 {offsets = [0, 0, 8], sizes = [8, 4, 8], strides = [1, 1, 1]} : vector<8x4x32xf32> to vector<8x4x8xf32>
    "tpu.trace_start"() <{level = 10 : i32, message = "bsd,bnd->bsn"}> : () -> ()
    %cst_53 = arith.constant dense<0.000000e+00> : vector<8x4x4xf32>
    %157 = tpu.matmul %154, %155, %cst_53 {dimension_numbers = #tpu.dot_dimension_numbers<[2], [2], [1], [1], [0, 0, 0, 1, 1, 1], [0], [0]>} : vector<8x4x8xf32>, vector<8x4x8xf32>, vector<8x4x4xf32> -> vector<8x4x4xf32>
    "tpu.trace_stop"() : () -> ()
    %cst_54 = arith.constant 0.176776692 : f32
    %158 = vector.broadcast %cst_54 : f32 to vector<8x4x4xf32>
    %159 = arith.mulf %157, %158 : vector<8x4x4xf32>
    %cst_55 = arith.constant dense<0xFF800000> : vector<8x4xf32>
    %160 = vector.multi_reduction <maximumf>, %159, %cst_55 [2] : vector<8x4x4xf32> to vector<8x4xf32>
    %161 = vector.shape_cast %160 : vector<8x4xf32> to vector<8x4x1xf32>
    %162 = vector.broadcast %161 : vector<8x4x1xf32> to vector<8x4x4xf32>
    %163 = arith.subf %159, %162 : vector<8x4x4xf32>
    %164 = math.exp %163 : vector<8x4x4xf32>
    %cst_56 = arith.constant dense<0.000000e+00> : vector<8x4xf32>
    %165 = vector.multi_reduction <add>, %164, %cst_56 [2] : vector<8x4x4xf32> to vector<8x4xf32>
    %166 = vector.shape_cast %165 : vector<8x4xf32> to vector<8x4x1xf32>
    %167 = tpu.reciprocal %166 : vector<8x4x1xf32> -> vector<8x4x1xf32>
    %168 = vector.broadcast %167 : vector<8x4x1xf32> to vector<8x4x4xf32>
    %169 = arith.mulf %164, %168 : vector<8x4x4xf32>
    "tpu.trace_start"() <{level = 10 : i32, message = "bsn,bnd->bsd"}> : () -> ()
    %cst_57 = arith.constant dense<0.000000e+00> : vector<8x4x8xf32>
    %170 = tpu.matmul %169, %156, %cst_57 {dimension_numbers = #tpu.dot_dimension_numbers<[2], [1], [1], [2], [0, 0, 0, 1, 1, 2], [0], [0]>} : vector<8x4x4xf32>, vector<8x4x8xf32>, vector<8x4x8xf32> -> vector<8x4x8xf32>
    "tpu.trace_stop"() : () -> ()
    %171 = arith.addf %154, %170 : vector<8x4x8xf32>
    %172 = vector.extract_strided_slice %131 {offsets = [0, 0, 16], sizes = [8, 4, 8], strides = [1, 1, 1]} : vector<8x4x32xf32> to vector<8x4x8xf32>
    %173 = vector.extract_strided_slice %133 {offsets = [0, 0, 16], sizes = [8, 4, 8], strides = [1, 1, 1]} : vector<8x4x32xf32> to vector<8x4x8xf32>
    %174 = vector.extract_strided_slice %135 {offsets = [0, 0, 16], sizes = [8, 4, 8], strides = [1, 1, 1]} : vector<8x4x32xf32> to vector<8x4x8xf32>
    "tpu.trace_start"() <{level = 10 : i32, message = "bsd,bnd->bsn"}> : () -> ()
    %cst_58 = arith.constant dense<0.000000e+00> : vector<8x4x4xf32>
    %175 = tpu.matmul %172, %173, %cst_58 {dimension_numbers = #tpu.dot_dimension_numbers<[2], [2], [1], [1], [0, 0, 0, 1, 1, 1], [0], [0]>} : vector<8x4x8xf32>, vector<8x4x8xf32>, vector<8x4x4xf32> -> vector<8x4x4xf32>
    "tpu.trace_stop"() : () -> ()
    %cst_59 = arith.constant 0.176776692 : f32
    %176 = vector.broadcast %cst_59 : f32 to vector<8x4x4xf32>
    %177 = arith.mulf %175, %176 : vector<8x4x4xf32>
    %cst_60 = arith.constant dense<0xFF800000> : vector<8x4xf32>
    %178 = vector.multi_reduction <maximumf>, %177, %cst_60 [2] : vector<8x4x4xf32> to vector<8x4xf32>
    %179 = vector.shape_cast %178 : vector<8x4xf32> to vector<8x4x1xf32>
    %180 = vector.broadcast %179 : vector<8x4x1xf32> to vector<8x4x4xf32>
    %181 = arith.subf %177, %180 : vector<8x4x4xf32>
    %182 = math.exp %181 : vector<8x4x4xf32>
    %cst_61 = arith.constant dense<0.000000e+00> : vector<8x4xf32>
    %183 = vector.multi_reduction <add>, %182, %cst_61 [2] : vector<8x4x4xf32> to vector<8x4xf32>
    %184 = vector.shape_cast %183 : vector<8x4xf32> to vector<8x4x1xf32>
    %185 = tpu.reciprocal %184 : vector<8x4x1xf32> -> vector<8x4x1xf32>
    %186 = vector.broadcast %185 : vector<8x4x1xf32> to vector<8x4x4xf32>
    %187 = arith.mulf %182, %186 : vector<8x4x4xf32>
    "tpu.trace_start"() <{level = 10 : i32, message = "bsn,bnd->bsd"}> : () -> ()
    %cst_62 = arith.constant dense<0.000000e+00> : vector<8x4x8xf32>
    %188 = tpu.matmul %187, %174, %cst_62 {dimension_numbers = #tpu.dot_dimension_numbers<[2], [1], [1], [2], [0, 0, 0, 1, 1, 2], [0], [0]>} : vector<8x4x4xf32>, vector<8x4x8xf32>, vector<8x4x8xf32> -> vector<8x4x8xf32>
    "tpu.trace_stop"() : () -> ()
    %189 = arith.addf %172, %188 : vector<8x4x8xf32>
    %190 = vector.extract_strided_slice %131 {offsets = [0, 0, 24], sizes = [8, 4, 8], strides = [1, 1, 1]} : vector<8x4x32xf32> to vector<8x4x8xf32>
    %191 = vector.extract_strided_slice %133 {offsets = [0, 0, 24], sizes = [8, 4, 8], strides = [1, 1, 1]} : vector<8x4x32xf32> to vector<8x4x8xf32>
    %192 = vector.extract_strided_slice %135 {offsets = [0, 0, 24], sizes = [8, 4, 8], strides = [1, 1, 1]} : vector<8x4x32xf32> to vector<8x4x8xf32>
    "tpu.trace_start"() <{level = 10 : i32, message = "bsd,bnd->bsn"}> : () -> ()
    %cst_63 = arith.constant dense<0.000000e+00> : vector<8x4x4xf32>
    %193 = tpu.matmul %190, %191, %cst_63 {dimension_numbers = #tpu.dot_dimension_numbers<[2], [2], [1], [1], [0, 0, 0, 1, 1, 1], [0], [0]>} : vector<8x4x8xf32>, vector<8x4x8xf32>, vector<8x4x4xf32> -> vector<8x4x4xf32>
    "tpu.trace_stop"() : () -> ()
    %cst_64 = arith.constant 0.176776692 : f32
    %194 = vector.broadcast %cst_64 : f32 to vector<8x4x4xf32>
    %195 = arith.mulf %193, %194 : vector<8x4x4xf32>
    %cst_65 = arith.constant dense<0xFF800000> : vector<8x4xf32>
    %196 = vector.multi_reduction <maximumf>, %195, %cst_65 [2] : vector<8x4x4xf32> to vector<8x4xf32>
    %197 = vector.shape_cast %196 : vector<8x4xf32> to vector<8x4x1xf32>
    %198 = vector.broadcast %197 : vector<8x4x1xf32> to vector<8x4x4xf32>
    %199 = arith.subf %195, %198 : vector<8x4x4xf32>
    %200 = math.exp %199 : vector<8x4x4xf32>
    %cst_66 = arith.constant dense<0.000000e+00> : vector<8x4xf32>
    %201 = vector.multi_reduction <add>, %200, %cst_66 [2] : vector<8x4x4xf32> to vector<8x4xf32>
    %202 = vector.shape_cast %201 : vector<8x4xf32> to vector<8x4x1xf32>
    %203 = tpu.reciprocal %202 : vector<8x4x1xf32> -> vector<8x4x1xf32>
    %204 = vector.broadcast %203 : vector<8x4x1xf32> to vector<8x4x4xf32>
    %205 = arith.mulf %200, %204 : vector<8x4x4xf32>
    "tpu.trace_start"() <{level = 10 : i32, message = "bsn,bnd->bsd"}> : () -> ()
    %cst_67 = arith.constant dense<0.000000e+00> : vector<8x4x8xf32>
    %206 = tpu.matmul %205, %192, %cst_67 {dimension_numbers = #tpu.dot_dimension_numbers<[2], [1], [1], [2], [0, 0, 0, 1, 1, 2], [0], [0]>} : vector<8x4x4xf32>, vector<8x4x8xf32>, vector<8x4x8xf32> -> vector<8x4x8xf32>
    "tpu.trace_stop"() : () -> ()
    %207 = arith.addf %190, %206 : vector<8x4x8xf32>
    %208 = tpu.concatenate %153, %171, %189, %207 in 2 : vector<8x4x8xf32>, vector<8x4x8xf32>, vector<8x4x8xf32>, vector<8x4x8xf32> -> vector<8x4x32xf32>
    %209 = vector.shape_cast %208 : vector<8x4x32xf32> to vector<32x32xf32>
    %c0_68 = arith.constant 0 : index
    %c224 = arith.constant 224 : index
    %210 = vector.load %arg3[%c0_68, %c224] : memref<32x416xf32, #tpu.memory_space<vmem>>, vector<32x32xf32>
    %cst_69 = arith.constant dense<0.000000e+00> : vector<32x32xf32>
    %211 = tpu.matmul %209, %210, %cst_69 {dimension_numbers = #tpu.dot_dimension_numbers<[1], [0], [0], [1], [0, 0, 1, 1], [], []>} : vector<32x32xf32>, vector<32x32xf32>, vector<32x32xf32> -> vector<32x32xf32>
    %c0_70 = arith.constant 0 : index
    %c224_71 = arith.constant 224 : index
    %212 = vector.load %arg4[%c0_70, %c224_71] : memref<1x416xf32, #tpu.memory_space<vmem>>, vector<1x32xf32>
    %213 = vector.broadcast %212 : vector<1x32xf32> to vector<32x32xf32>
    %214 = arith.addf %211, %213 : vector<32x32xf32>
    %cst_72 = arith.constant 0.000000e+00 : f32
    %215 = vector.broadcast %cst_72 : f32 to vector<32x32xf32>
    %216 = arith.maximumf %214, %215 : vector<32x32xf32>
    %217 = arith.addf %209, %216 : vector<32x32xf32>
    %218 = vector.shape_cast %217 : vector<32x32xf32> to vector<8x4x32xf32>
    %cst_73 = arith.constant dense<0xFF800000> : vector<8x32xf32>
    %219 = vector.multi_reduction <maximumf>, %218, %cst_73 [1] : vector<8x4x32xf32> to vector<8x32xf32>
    %c0_74 = arith.constant 0 : index
    %c256 = arith.constant 256 : index
    %220 = vector.load %arg3[%c0_74, %c256] : memref<32x416xf32, #tpu.memory_space<vmem>>, vector<32x32xf32>
    %cst_75 = arith.constant dense<0.000000e+00> : vector<8x32xf32>
    %221 = tpu.matmul %219, %220, %cst_75 {dimension_numbers = #tpu.dot_dimension_numbers<[1], [0], [0], [1], [0, 0, 1, 1], [], []>} : vector<8x32xf32>, vector<32x32xf32>, vector<8x32xf32> -> vector<8x32xf32>
    %c0_76 = arith.constant 0 : index
    %c256_77 = arith.constant 256 : index
    %222 = vector.load %arg4[%c0_76, %c256_77] : memref<1x416xf32, #tpu.memory_space<vmem>>, vector<1x32xf32>
    %223 = vector.broadcast %222 : vector<1x32xf32> to vector<8x32xf32>
    %224 = arith.addf %221, %223 : vector<8x32xf32>
    %225 = arith.negf %224 : vector<8x32xf32>
    %226 = math.exp %225 : vector<8x32xf32>
    %cst_78 = arith.constant 1.000000e+00 : f32
    %227 = vector.broadcast %cst_78 : f32 to vector<8x32xf32>
    %228 = arith.addf %227, %226 : vector<8x32xf32>
    %229 = arith.divf %227, %228 : vector<8x32xf32>
    %230 = arith.mulf %224, %229 : vector<8x32xf32>
    %c0_79 = arith.constant 0 : index
    %c288 = arith.constant 288 : index
    %231 = vector.load %arg3[%c0_79, %c288] : memref<32x416xf32, #tpu.memory_space<vmem>>, vector<32x128xf32>
    %cst_80 = arith.constant dense<0.000000e+00> : vector<8x128xf32>
    %232 = tpu.matmul %230, %231, %cst_80 {dimension_numbers = #tpu.dot_dimension_numbers<[1], [0], [0], [1], [0, 0, 1, 1], [], []>} : vector<8x32xf32>, vector<32x128xf32>, vector<8x128xf32> -> vector<8x128xf32>
    %c0_81 = arith.constant 0 : index
    %c288_82 = arith.constant 288 : index
    %233 = vector.load %arg4[%c0_81, %c288_82] : memref<1x416xf32, #tpu.memory_space<vmem>>, vector<1x128xf32>
    %234 = vector.broadcast %233 : vector<1x128xf32> to vector<8x128xf32>
    %235 = arith.addf %232, %234 : vector<8x128xf32>
    %c0_83 = arith.constant 0 : index
    %c0_84 = arith.constant 0 : index
    %236 = vector.load %arg5[%c0_83, %c0_84] : memref<8x128xf32, #tpu.memory_space<vmem>>, vector<8x128xf32>
    tpu.vector_store %arg5[%c0_83, %c0_84], %235 {strides = array<i32>} : memref<8x128xf32, #tpu.memory_space<vmem>>, vector<8x128xf32>,
    return
  }
  func.func @transform_0(%arg0: i32) -> (i32, i32, i32) {
    %c0_i32 = arith.constant 0 : i32
    %c0_i32_0 = arith.constant 0 : i32
    %c0_i32_1 = arith.constant 0 : i32
    return %arg0, %c0_i32, %c0_i32_0 : i32, i32, i32
  }
  func.func @transform_1(%arg0: i32) -> (i32, i32) {
    %c0_i32 = arith.constant 0 : i32
    %c0_i32_0 = arith.constant 0 : i32
    %c0_i32_1 = arith.constant 0 : i32
    return %c0_i32, %c0_i32_0 : i32, i32
  }
  func.func @transform_2(%arg0: i32) -> (i32, i32) {
    %c0_i32 = arith.constant 0 : i32
    %c0_i32_0 = arith.constant 0 : i32
    %c0_i32_1 = arith.constant 0 : i32
    return %c0_i32, %c0_i32_0 : i32, i32
  }
  func.func @transform_3(%arg0: i32) -> (i32, i32) {
    %c0_i32 = arith.constant 0 : i32
    %c0_i32_0 = arith.constant 0 : i32
    %c0_i32_1 = arith.constant 0 : i32
    return %c0_i32, %c0_i32_0 : i32, i32
  }
  func.func @transform_4(%arg0: i32) -> (i32, i32) {
    %c0_i32 = arith.constant 0 : i32
    %c0_i32_0 = arith.constant 0 : i32
    return %arg0, %c0_i32 : i32, i32
  }
}

</mosaic_0001>

<bundles_post_ra>
// kernel: tpu_custom_call.1
= control target key start
LH: loop header
LB: loop body
LE: loop exit
PB: predicated region body
PF: predicated region fallthrough
CT: control target
= control target key end

     0   :  { %9 = vsyncpa [#allocation3], 0  ;;  %s15866_s0 = inlined_call_operand.hbm [shape: f32[8,8,32], index: 0, kind: input, shape index: {}]   ;;  %s15867_s1 = inlined_call_operand.hbm [shape: f32[6,32], index: 1, kind: input, shape index: {}]   ;;  %s15868_s2 = inlined_call_operand.hbm [shape: f32[32,416], index: 2, kind: input, shape index: {}]   ;;  %s15869_s3 = inlined_call_operand.vmem [shape: f32[1,416], index: 3, kind: input, shape index: {}]   ;;  %s15870_s4 = inlined_call_operand.hbm [shape: f32[8,128], index: 4, kind: output, shape index: {}]  }
   0x1   :  { %10 = vsyncpa [#allocation6], 0 }
   0x2   :  { %11 = vsyncpa [#allocation4], 0  ;;  %s13811_s15 = smov [#allocation5]   ;;  %s13812_s17 = smov [#allocation2]  }
   0x3   :  { %s30_s16 = sshll.u32 %s13811_s15, 4  ;;  %s17_s18 = sshll.u32 %s13812_s17, 4  ;;  %s31_s16 = int_to_ptr.vmem [resolvable:$true] %s30_s16  ;;  %s13860_s18 = int_to_ptr.vmem [resolvable:$true] %s17_s18 }
   0x4   :  { %s13717_s21 = scalar_lea.hbm %s15867_s1, 128 }
   0x5   :  { %p13718_p0 = scmp.ne.s32.totalorder %s15867_s1, %s13717_s21  ;;  %p13721_p1 = scmp.lt.u32.totalorder %s13717_s21, %s15867_s1 }
   0x7   :  { %p13723_p2 = pnand %p13721_p1, %p13718_p0 }
   0x9   :  { %13726 = shalt.err (!%p13723_p2)
}
   0xa   :  { %s13727_s26 = scalar_lea.vmem %s31_s16, 128  ;;  %p13732_p4 = scmp.lt.s32.totalorder %s31_s16, %s31_s16 }
   0xb   :  { %p13728_p3 = scmp.ne.s32.totalorder %s31_s16, %s13727_s26  ;;  %p13733_p5 = scmp.lt.s32.totalorder %s13727_s26, %s13727_s26 }
   0xd   :  { %p13734_p6 = por %p13733_p5, %p13732_p4 }
   0xf   :  { %p13735_p7 = pnand %p13734_p6, %p13728_p3 }
  0x11   :  { %13738 = shalt.err (!%p13735_p7)
}
  0x12   :  { %33 = dma.hbm_to_vmem [thread:$0]  %s15867_s1, 128, %s31_s16, [#allocation6]  }
  0x13   :  { %s13739_s5 = scalar_lea.hbm %s15866_s0, 1024 }
  0x14   :  { %p13740_p8 = scmp.ne.s32.totalorder %s15866_s0, %s13739_s5  ;;  %p13743_p9 = scmp.lt.u32.totalorder %s13739_s5, %s15866_s0 }
  0x16   :  { %p13745_p10 = pnand %p13743_p9, %p13740_p8 }
  0x18   :  { %13748 = shalt.err (!%p13745_p10)
}
  0x19   :  { %s13749_s10 = scalar_lea.vmem %s13860_s18, 1024  ;;  %p13754_p12 = scmp.lt.s32.totalorder %s13860_s18, %s13860_s18 }
  0x1a   :  { %p13750_p11 = scmp.ne.s32.totalorder %s13860_s18, %s13749_s10  ;;  %p13755_p13 = scmp.lt.s32.totalorder %s13749_s10, %s13749_s10 }
  0x1c   :  { %p13756_p0 = por %p13755_p13, %p13754_p12 }
  0x1e   :  { %p13757_p1 = pnand %p13756_p0, %p13750_p11 }
  0x20   :  { %13760 = shalt.err (!%p13757_p1)
}
  0x21   :  { %s13813_s1 = smov 128   ;;  %s13814_s11 = smov 8  }
  0x22   :  { %23 = dma.hbm_to_vmem [thread:$0]  %s15866_s0, 1024, %s13860_s18, [#allocation3], %s13813_s1, %s13813_s1, %s13814_s11  }
  0x23   :  { %s13815_s14 = smov [#allocation7]   ;;  %s13761_s19 = scalar_lea.hbm %s15868_s2, 2048 }
  0x24   :  { %s39_s15 = sshll.u32 %s13815_s14, 4  ;;  %p13762_p2 = scmp.ne.s32.totalorder %s15868_s2, %s13761_s19  ;;  %s40_s15 = int_to_ptr.vmem [resolvable:$true] %s39_s15 }
  0x25   :  { %p13765_p3 = scmp.lt.u32.totalorder %s13761_s19, %s15868_s2 }
  0x27   :  { %p13767_p4 = pnand %p13765_p3, %p13762_p2 }
  0x29   :  { %13770 = shalt.err (!%p13767_p4)
}
  0x2a   :  { %s13771_s24 = scalar_lea.vmem %s40_s15, 2048  ;;  %p13776_p6 = scmp.lt.s32.totalorder %s40_s15, %s40_s15 }
  0x2b   :  { %p13772_p5 = scmp.ne.s32.totalorder %s40_s15, %s13771_s24  ;;  %p13777_p7 = scmp.lt.s32.totalorder %s13771_s24, %s13771_s24 }
  0x2d   :  { %p13778_p8 = por %p13777_p7, %p13776_p6 }
  0x2f   :  { %p13779_p9 = pnand %p13778_p8, %p13772_p5 }
  0x31   :  { %13782 = shalt.err (!%p13779_p9)
}
  0x32   :  { %s13816_s0 = smov 512   ;;  %s13817_s18 = smov 32  }
  0x33   :  { %45 = dma.hbm_to_vmem [thread:$0]  %s15868_s2, 2048, %s40_s15, [#allocation6], %s13816_s0, %s13816_s0, %s13817_s18  }
  0x34   :  { %13805 = dma.done.wait [#allocation3], 1024  }
  0x35   :  { %13806 = vsyncadd [#allocation3], 4294966272 }
  0x36   :  { %13807 = dma.done.wait [#allocation6], 2176  }
  0x37   :  { %13808 = vsyncadd [#allocation6], 4294965120  ;;  %vm68_vm0 = vcmask 261120   ;;  %v60_v0 = vld [vmem:[#allocation2] sm:$0xff]  ;;  %v62_v1 = vld [vmem:[#allocation2 + $0x10] sm:$0xff]  ;;  %s13818_s2 = smov 64  }
  0x38   :  { %v61_v2 = vld [vmem:[#allocation2 + $0x8] sm:$0xff]  ;;  %v69_v3 = vsel %vm68_vm0, %v60_v0, 0.0  ;;  %v75_v4 = vsel %vm68_vm0, %v62_v1, 0.0  ;;  %v63_v5 = vld [vmem:[#allocation2 + $0x18] sm:$0xff]  ;;  %v64_v8 = vld [vmem:[#allocation2 + $0x20] sm:$0xff]  ;;  %vm13820_vm1 = vmmov 0  }
  0x39   :  { %70 = vadd.xlane.f32.xlu0 %v69_v3  ;;  %76 = vadd.xlane.f32.xlu1 %v75_v4  ;;  %v72_v6 = vsel %vm68_vm0, %v61_v2, 0.0  ;;  %v78_v7 = vsel %vm68_vm0, %v63_v5, 0.0  ;;  %v65_v9 = vld [vmem:[#allocation2 + $0x28] sm:$0xff]  ;;  %v81_v10 = vsel %vm68_vm0, %v64_v8, 0.0  ;;  %v66_v12 = vld [vmem:[#allocation2 + $0x30] sm:$0xff]  ;;  %v67_v13 = vld [vmem:[#allocation2 + $0x38] sm:$0xff] }
  0x3a   :  { %v84_v11 = vsel %vm68_vm0, %v65_v9, 0.0  ;;  %v87_v14 = vsel %vm68_vm0, %v66_v12, 0.0  ;;  %v90_v15 = vsel %vm68_vm0, %v67_v13, 0.0  ;;  %v200_v56 = vld [vmem:[#allocation7 + $0x40] sm:$0xff]  ;;  %vm430_vm2 = vcmask 64512   ;;  %s13822_s29 = smov 96  }
  0x3b   :  { %v201_v57 = vld [vmem:[#allocation7 + $0x60] sm:$0xff]  ;;  %vm1026_vm3 = vcmask 60416   ;;  %s13823_s30 = smov 120   ;;  %s13824_s5 = smov 88   ;;  %vm5759_vm4 = vcmask 130048   ;;  %vm5768_vm5 = vcmask 195584  }
  0x3c   :  { %v198_v58 = vld [vmem:[#allocation7] sm:$0xff]  ;;  %v13396_v60 = vpack.i.bf16 %v201_v57, %v200_v56  ;;  %v13321_v63 = vpack.c.bf16 %v201_v57, %v200_v56  ;;  %s13825_s6 = smov 112   ;;  %s13826_s7 = smov 80   ;;  %vm6679_vm6 = vcmask 27648   ;;  %vm6774_vm7 = vcmask 1043456  }
  0x3d   :  { %73 = vadd.xlane.f32.xlu0 %v72_v6  ;;  %79 = vadd.xlane.f32.xlu1 %v78_v7  ;;  %v199_v59 = vld [vmem:[#allocation7 + $0x20] sm:$0xff]  ;;  %s13827_s8 = smov 104   ;;  %s13828_s9 = smov 72   ;;  %vm6770_vm8 = vcmask 31744   ;;  %vm11704_vm9 = vcmask 257024   ;;  %vm11780_vm10 = vcmask 1041409  }
  0x3e   :  { %v13391_v61 = vpack.i.bf16 %v199_v59, %v198_v58  ;;  %v13317_v62 = vpack.c.bf16 %v199_v59, %v198_v58  ;;  %v57_v58 = vld [vmem:[#allocation5] sm:$0xf]  ;;  %s13829_s10 = smov 16   ;;  %s13830_s1 = smov 24   ;;  %vm11782_vm11 = vcmask 1042434   ;;  %vm11784_vm12 = vcmask 1043459  }
  0x3f   :  { %s13831_s16 = smov 56   ;;  %s13832_s17 = smov 48   ;;  %vm11786_vm13 = vcmask 1044484   ;;  %vm11788_vm14 = vcmask 1045509   ;;  %vm11790_vm15 = vcmask 1046534  }
  0x40   :  { %13318 = vmatprep.subr.bf16.mxu0 %v13317_v62  ;;  %s13833_s19 = smov 40   ;;  %s13834_s0 = smov [#allocation8]  }
  0x41   :  { %82 = vadd.xlane.f32.xlu0 %v81_v10  ;;  %85 = vadd.xlane.f32.xlu1 %v84_v11 }
  0x42   :  { %13320 = vmatpush3.bf16.msra.mxu0 %v13317_v62 }
  0x43   :  { %13322 = vmatprep.subr.bf16.mxu0 %v13321_v63 }
  0x45   :  { %88 = vadd.xlane.f32.xlu0 %v87_v14  ;;  %91 = vadd.xlane.f32.xlu1 %v90_v15 }
  0x46   :  { %13324 = vmatpush3.bf16.msra.mxu0 %v13321_v63 }
  0xc6   :  { %v71_v16 = vpop.xlane.xlu0 %70  ;;  %v77_v17 = vpop.xlane.xlu1 %76 }
  0xc7   :  { %v94_v18 = vmul.f32 0.03125, %v71_v16  ;;  %v96_v19 = vmul.f32 0.03125, %v77_v17 }
  0xc9   :  { %v13913_v20 = vsub.f32 %v60_v0, %v94_v18  ;;  %v13915_v21 = vsub.f32 %v62_v1, %v96_v19  ;;  %v13819_v0 = vmov 0.0|0.0   ;;  %v13821_v1 = vmov 0.0  }
  0xca   :  { %v74_v22 = vpop.xlane.xlu0 %73  ;;  %v80_v23 = vpop.xlane.xlu1 %79  ;;  %13325 = vmatprep.subr.bf16.mxu1 %v13819_v0  ;;  %12610 = vmatprep.mubr.msk.f32.mxu1 %vm13820_vm1, %v13821_v1 }
  0xcb   :  { %v95_v24 = vmul.f32 0.03125, %v74_v22  ;;  %v97_v25 = vmul.f32 0.03125, %v80_v23  ;;  %v110_v26 = vmul.f32 %v13913_v20, %v13913_v20  ;;  %v112_v27 = vmul.f32 %v13915_v21, %v13915_v21  ;;  %12628 = vmatprep.subr.mxu0 %v13821_v1 }
  0xcd   :  { %v13921_v28 = vsub.f32 %v61_v2, %v95_v24  ;;  %v13923_v29 = vsub.f32 %v63_v5, %v97_v25  ;;  %v118_v30 = vsel %vm68_vm0, %v110_v26, 0.0  ;;  %v124_v33 = vsel %vm68_vm0, %v112_v27, 0.0  ;;  %v13962_v2 = vld [vmem:[%s15869_s3] ss:$0 sm:$0xff]  ;;  %v12020_v27 = vld [vmem:[#allocation5 + $0x4] ss:$0 sm:$0xff] }
  0xce   :  { %119 = vadd.xlane.f32.xlu0 %v118_v30  ;;  %v83_v31 = vpop.xlane.xlu0 %82  ;;  %v86_v32 = vpop.xlane.xlu1 %85 }
  0xcf   :  { %v98_v34 = vmul.f32 0.03125, %v83_v31  ;;  %v99_v35 = vmul.f32 0.03125, %v86_v32  ;;  %v111_v36 = vmul.f32 %v13921_v28, %v13921_v28  ;;  %v113_v37 = vmul.f32 %v13923_v29, %v13923_v29 }
  0xd1   :  { %v13931_v38 = vsub.f32 %v64_v8, %v98_v34  ;;  %v13933_v39 = vsub.f32 %v65_v9, %v99_v35  ;;  %v121_v40 = vsel %vm68_vm0, %v111_v36, 0.0  ;;  %v127_v43 = vsel %vm68_vm0, %v113_v37, 0.0  ;;  %v12021_v34 = vld [vmem:[#allocation5 + $0x5] ss:$0 sm:$0xff] }
  0xd2   :  { %125 = vadd.xlane.f32.xlu0 %v124_v33  ;;  %122 = vadd.xlane.f32.xlu1 %v121_v40  ;;  %v89_v41 = vpop.xlane.xlu0 %88  ;;  %v92_v42 = vpop.xlane.xlu1 %91 }
  0xd3   :  { %v100_v44 = vmul.f32 0.03125, %v89_v41  ;;  %v101_v45 = vmul.f32 0.03125, %v92_v42  ;;  %v114_v46 = vmul.f32 %v13931_v38, %v13931_v38  ;;  %v115_v47 = vmul.f32 %v13933_v39, %v13933_v39 }
  0xd5   :  { %v13941_v48 = vsub.f32 %v66_v12, %v100_v44  ;;  %v13943_v49 = vsub.f32 %v67_v13, %v101_v45  ;;  %v130_v50 = vsel %vm68_vm0, %v114_v46, 0.0  ;;  %v133_v51 = vsel %vm68_vm0, %v115_v47, 0.0 }
  0xd6   :  { %128 = vadd.xlane.f32.xlu1 %v127_v43  ;;  %131 = vadd.xlane.f32.xlu0 %v130_v50 }
  0xd7   :  { %v116_v52 = vmul.f32 %v13941_v48, %v13941_v48  ;;  %v117_v53 = vmul.f32 %v13943_v49, %v13943_v49 }
  0xd9   :  { %v136_v54 = vsel %vm68_vm0, %v116_v52, 0.0  ;;  %v139_v55 = vsel %vm68_vm0, %v117_v53, 0.0 }
  0xda   :  { %134 = vadd.xlane.f32.xlu1 %v133_v51  ;;  %137 = vadd.xlane.f32.xlu0 %v136_v54 }
  0xde   :  { %140 = vadd.xlane.f32.xlu1 %v139_v55 }
  0xef   :  { %13397 = vrot.lane.b32.xlu1 %v13396_v60, %s13818_s2 }
  0xf0   :  { %13392 = vrot.lane.b32.xlu0 %v13391_v61, %s13818_s2 }
  0xf3   :  { %354 = vrot.lane.b32.xlu1 %v13962_v2, %s13818_s2 }
 0x15b   :  { %v120_v3 = vpop.xlane.xlu0 %119 }
 0x15c   :  { %v142_v4 = vmul.f32 0.03125, %v120_v3 }
 0x15e   :  { %v150_v5 = vadd.f32 1e-05, %v142_v4 }
 0x15f   :  { %v123_v6 = vpop.xlane.xlu1 %122  ;;  %v126_v7 = vpop.xlane.xlu0 %125 }
 0x160   :  { %13441 = vrsqrt.f32 %v150_v5  ;;  %v143_v8 = vmul.f32 0.03125, %v123_v6  ;;  %v144_v9 = vmul.f32 0.03125, %v126_v7 }
 0x162   :  { %v151_v10 = vadd.f32 1e-05, %v143_v8  ;;  %v152_v11 = vadd.f32 1e-05, %v144_v9 }
 0x163   :  { %v129_v12 = vpop.xlane.xlu1 %128  ;;  %v132_v13 = vpop.xlane.xlu0 %131 }
 0x164   :  { %13443 = vrsqrt.f32 %v151_v10  ;;  %v145_v14 = vmul.f32 0.03125, %v129_v12  ;;  %v146_v15 = vmul.f32 0.03125, %v132_v13 }
 0x165   :  { %13445 = vrsqrt.f32 %v152_v11 }
 0x166   :  { %v153_v16 = vadd.f32 1e-05, %v145_v14  ;;  %v154_v17 = vadd.f32 1e-05, %v146_v15 }
 0x167   :  { %v135_v18 = vpop.xlane.xlu1 %134  ;;  %v138_v19 = vpop.xlane.xlu0 %137 }
 0x168   :  { %13447 = vrsqrt.f32 %v153_v16  ;;  %v147_v22 = vmul.f32 0.03125, %v135_v18  ;;  %v148_v23 = vmul.f32 0.03125, %v138_v19 }
 0x169   :  { %13449 = vrsqrt.f32 %v154_v17 }
 0x16a   :  { %v13442_v24 = vpop.eup %13441  ;;  %v155_v25 = vadd.f32 1e-05, %v147_v22  ;;  %v156_v26 = vadd.f32 1e-05, %v148_v23 }
 0x16b   :  { %v141_v30 = vpop.xlane.xlu1 %140  ;;  %v13393_v31 = vpop.permute.xlu0 %13392  ;;  %v166_v32 = vmul.f32 %v13442_v24, %v13913_v20 }
 0x16c   :  { %13451 = vrsqrt.f32 %v155_v25  ;;  %v149_v33 = vmul.f32 0.03125, %v141_v30  ;;  %v13395_v35 = vunpack.i.h.bf16 %v13393_v31  ;;  %v13394_v36 = vunpack.i.l.bf16 %v13393_v31 }
 0x16d   :  { %13453 = vrsqrt.f32 %v156_v26  ;;  %v178_v37 = vmul.f32 %v12020_v27, %v166_v32 }
 0x16e   :  { %v13444_v40 = vpop.eup %13443  ;;  %v157_v41 = vadd.f32 1e-05, %v149_v33  ;;  %v13326_v42 = vpack.c.bf16 %v13395_v35, %v13394_v36 }
 0x16f   :  { %v13446_v43 = vpop.eup %13445  ;;  %v13398_v44 = vpop.permute.xlu1 %13397  ;;  %v190_v45 = vadd.f32 %v12021_v34, %v178_v37  ;;  %v167_v46 = vmul.f32 %v13444_v40, %v13921_v28 }
 0x170   :  { %13455 = vrsqrt.f32 %v157_v41  ;;  %v13400_v47 = vunpack.i.h.bf16 %v13398_v44  ;;  %v13399_v50 = vunpack.i.l.bf16 %v13398_v44  ;;  %13327 = vmatpush3.bf16.msra.mxu1 %v13326_v42  ;;  %v168_v20 = vmul.f32 %v13446_v43, %v13915_v21 }
 0x171   :  { %12590 = vmatprep.mubr.msk.f32.mxu0 %vm68_vm0, %v190_v45  ;;  %13328 = vmatprep.subr.bf16.mxu1 %v13819_v0  ;;  %v179_v51 = vmul.f32 %v12020_v27, %v167_v46 }
 0x172   :  { %v13448_v52 = vpop.eup %13447  ;;  %v13329_v53 = vpack.c.bf16 %v13400_v47, %v13399_v50  ;;  %v180_v54 = vmul.f32 %v12020_v27, %v168_v20 }
 0x173   :  { %v13450_v55 = vpop.eup %13449  ;;  %v191_v56 = vadd.f32 %v12021_v34, %v179_v51  ;;  %v169_v57 = vmul.f32 %v13448_v52, %v13923_v29  ;;  %v355_v11 = vpop.permute.xlu1 %354 }
 0x174   :  { %13330 = vmatpush3.bf16.msra.mxu1 %v13329_v53  ;;  %v192_v28 = vadd.f32 %v12021_v34, %v180_v54  ;;  %v170_v59 = vmul.f32 %v13450_v55, %v13931_v38 }
 0x175   :  { %12591 = vmatmul.mubr.msk.f32.vlgmr.msra.gmra.mrb[0].mxu0 %vm68_vm0, %v191_v56  ;;  %v181_v21 = vmul.f32 %v12020_v27, %v169_v57  ;;  %12613 = vmatprep.subr.mxu1 %v13821_v1 }
 0x176   :  { %v13452_v60 = vpop.eup %13451  ;;  %12593 = vmatprep.mubr.msk.f32.mxu0 %vm68_vm0, %v192_v28  ;;  %v182_v61 = vmul.f32 %v12020_v27, %v170_v59 }
 0x177   :  { %v13454_v62 = vpop.eup %13453  ;;  %12611 = vmatmul.mubr.msk.f32.vlgmr.msra.gmra.mrb[0].mxu1 %vm68_vm0, %v57_v58  ;;  %v193_v63 = vadd.f32 %v12021_v34, %v181_v21  ;;  %v171_v29 = vmul.f32 %v13452_v60, %v13933_v39 }
 0x178   :  { %v194_v3 = vadd.f32 %v12021_v34, %v182_v61  ;;  %v172_v4 = vmul.f32 %v13454_v62, %v13941_v48  ;;  %12615 = vmatprep.mubr.msk.f32.mxu1 %vm13820_vm1, %v13821_v1 }
 0x179   :  { %12594 = vmatmul.mubr.msk.f32.gmra.mrb[2].mxu0 %vm68_vm0, %v193_v63  ;;  %v183_v38 = vmul.f32 %v12020_v27, %v171_v29 }
 0x17a   :  { %v13456_v5 = vpop.eup %13455  ;;  %12596 = vmatprep.mubr.msk.f32.mxu0 %vm68_vm0, %v194_v3  ;;  %v184_v6 = vmul.f32 %v12020_v27, %v172_v4 }
 0x17b   :  { %v195_v7 = vadd.f32 %v12021_v34, %v183_v38  ;;  %v173_v8 = vmul.f32 %v13456_v5, %v13943_v49 }
 0x17c   :  { %v196_v9 = vadd.f32 %v12021_v34, %v184_v6 }
 0x17d   :  { %12597 = vmatmul.mubr.msk.f32.gmra.mrb[4].mxu0 %vm68_vm0, %v195_v7  ;;  %v185_v39 = vmul.f32 %v12020_v27, %v173_v8 }
 0x17e   :  { %12599 = vmatprep.mubr.msk.f32.mxu0 %vm68_vm0, %v196_v9 }
 0x17f   :  { %v197_v48 = vadd.f32 %v12021_v34, %v185_v39 }
 0x181   :  { %12600 = vmatmul.mubr.msk.f32.gmra.mrb[6].mxu0 %vm68_vm0, %v197_v48 }
 0x182   :  { %12630 = vmatprep.mubr.msk.f32.mxu0 %vm13820_vm1, %v13821_v1 }
 0x248   :  { %v12592_v10 = vpop.f32.mrb[0].mxu0 }
 0x249   :  { %v13990_v12 = vadd.f32 %v12592_v10, %v13962_v2  ;;  %v299_v13 = vpop.f32.mrb[1].mxu0 }
 0x24a   :  { %v13993_v49 = vadd.f32 %v13962_v2, %v299_v13  ;;  %v426_v14 = vpop.f32.mrb[0].mxu1 }
 0x24b   :  { %1191 = vrot.lane.b32.xlu0 %v13990_v12, %s13822_s29  ;;  %v13997_v15 = vadd.f32 %v426_v14, %v355_v11  ;;  %v12612_v16 = vpop.f32.mrb[1].mxu1 }
 0x24c   :  { %v12595_v17 = vpop.f32.mrb[2].mxu0  ;;  %1115 = vrot.lane.b32.xlu1 %v13993_v49, %s13822_s29  ;;  %12614 = vmatpush3.xpose.msk.msra.mxu1 %vm430_vm2, %v13993_v49 }
 0x24d   :  { %v14004_v18 = vadd.f32 %v12595_v17, %v13962_v2  ;;  %v309_v19 = vpop.f32.mrb[3].mxu0  ;;  %12618 = vmatprep.subr.mxu1 %v13821_v1 }
 0x24e   :  { %v14022_v25 = vadd.f32 %v13962_v2, %v309_v19 }
 0x24f   :  { %12616 = vmatmul.mubr.msk.f32.vlgmr.msra.gmra.mrb[2].mxu1 %vm430_vm2, %v13997_v15  ;;  %12629 = vmatpush3.xpose.msk.msra.mxu0 %vm430_vm2, %v14004_v18 }
 0x250   :  { %v12598_v22 = vpop.f32.mrb[4].mxu0  ;;  %1343 = vrot.lane.b32.xlu1 %v14004_v18, %s13822_s29  ;;  %12619 = vmatpush3.xpose.msk.msra.mxu1 %vm430_vm2, %v13990_v12 }
 0x251   :  { %v14016_v23 = vadd.f32 %v12598_v22, %v13962_v2  ;;  %v319_v24 = vpop.f32.mrb[5].mxu0  ;;  %12620 = vmatprep.mubr.msk.f32.mxu1 %vm13820_vm1, %v13821_v1  ;;  %12638 = vmatprep.subr.mxu0 %v13821_v1 }
 0x252   :  { %12631 = vmatmul.mubr.msk.f32.vlgmr.msra.gmra.mrb[8].mxu0 %vm430_vm2, %v13997_v15  ;;  %12623 = vmatprep.subr.mxu1 %v13821_v1  ;;  %v14043_v31 = vadd.f32 %v13962_v2, %v319_v24 }
 0x253   :  { %12621 = vmatmul.mubr.msk.f32.vlgmr.msra.gmra.mrb[4].mxu1 %vm430_vm2, %v13997_v15  ;;  %12639 = vmatpush3.xpose.msk.msra.mxu0 %vm430_vm2, %v14016_v23 }
 0x254   :  { %v12601_v26 = vpop.f32.mrb[6].mxu0  ;;  %1267 = vrot.lane.b32.xlu1 %v14022_v25, %s13822_s29  ;;  %12624 = vmatpush3.xpose.msk.msra.mxu1 %vm430_vm2, %v14022_v25 }
 0x255   :  { %v14036_v27 = vadd.f32 %v12601_v26, %v13962_v2  ;;  %v329_v30 = vpop.f32.mrb[7].mxu0  ;;  %12640 = vmatprep.mubr.msk.f32.mxu0 %vm13820_vm1, %v13821_v1  ;;  %12625 = vmatprep.mubr.msk.f32.mxu1 %vm13820_vm1, %v13821_v1 }
 0x256   :  { %12641 = vmatmul.mubr.msk.f32.vlgmr.msra.gmra.mrb[10].mxu0 %vm430_vm2, %v13997_v15  ;;  %12648 = vmatprep.subr.mxu0 %v13821_v1  ;;  %v14063_v32 = vadd.f32 %v13962_v2, %v329_v30 }
 0x257   :  { %12626 = vmatmul.mubr.msk.f32.vlgmr.msra.gmra.mrb[6].mxu1 %vm430_vm2, %v13997_v15  ;;  %12633 = vmatprep.subr.mxu1 %v13821_v1 }
 0x258   :  { %12649 = vmatpush3.xpose.msk.msra.mxu0 %vm430_vm2, %v14036_v27  ;;  %1419 = vrot.lane.b32.xlu1 %v14043_v31, %s13822_s29 }
 0x259   :  { %12634 = vmatpush3.xpose.msk.msra.mxu1 %vm430_vm2, %v14043_v31  ;;  %12650 = vmatprep.mubr.msk.f32.mxu0 %vm13820_vm1, %v13821_v1 }
 0x25a   :  { %12635 = vmatprep.mubr.msk.f32.mxu1 %vm13820_vm1, %v13821_v1  ;;  %12643 = vmatprep.subr.mxu1 %v13821_v1 }
 0x25b   :  { %12651 = vmatmul.mubr.msk.f32.vlgmr.msra.gmra.mrb[12].mxu0 %vm430_vm2, %v13997_v15  ;;  %12658 = vmatprep.subr.mxu0 %v13821_v1 }
 0x25c   :  { %12636 = vmatmul.mubr.msk.f32.vlgmr.msra.gmra.mrb[8].mxu1 %vm430_vm2, %v13997_v15  ;;  %12660 = vmatprep.mubr.msk.f32.mxu0 %vm13820_vm1, %v13821_v1 }
 0x25d   :  { %12644 = vmatpush3.xpose.msk.msra.mxu1 %vm430_vm2, %v14063_v32  ;;  %12645 = vmatprep.mubr.msk.f32.mxu1 %vm13820_vm1, %v13821_v1 }
 0x25e   :  { %12653 = vmatprep.subr.mxu1 %v13821_v1 }
 0x260   :  { %12646 = vmatmul.mubr.msk.f32.vlgmr.msra.gmra.mrb[10].mxu1 %vm430_vm2, %v13997_v15 }
 0x261   :  { %12655 = vmatprep.mubr.msk.f32.mxu1 %vm13820_vm1, %v13821_v1 }
 0x2bd   :  { %v1192_v2 = vpop.permute.xlu0 %1191 }
 0x2be   :  { %v1116_v33 = vpop.permute.xlu1 %1115  ;;  %12659 = vmatpush3.msra.mxu0 %v1192_v2 }
 0x2bf   :  { %12654 = vmatpush3.msra.mxu1 %v1116_v33  ;;  %12668 = vmatprep.subr.mxu0 %v13821_v1 }
 0x2c0   :  { %12663 = vmatprep.subr.mxu1 %v13821_v1 }
 0x2c2   :  { %v14098_v38 = vpop.permute.xlu1 %1343 }
 0x2c6   :  { %v14100_v5 = vpop.permute.xlu1 %1267 }
 0x2ca   :  { %v14102_v6 = vpop.permute.xlu1 %1419 }
 0x322   :  { %v503_v34 = vpop.f32.mrb[2].mxu1 }
 0x323   :  { %v1018_v35 = vmul.f32 0.17677669, %v503_v34  ;;  %v12617_v36 = vpop.f32.mrb[3].mxu1 }
 0x325   :  { %v722_v37 = vpop.f32.mrb[8].mxu0  ;;  %v1027_v40 = vsel %vm1026_vm3, %v1018_v35, -inf }
 0x326   :  { %v1021_v41 = vmul.f32 0.17677669, %v722_v37  ;;  %v12632_v42 = vpop.f32.mrb[9].mxu0  ;;  %1028 = vmax.xlane.f32.xlu1 %v1027_v40  ;;  %v576_v43 = vpop.f32.mrb[4].mxu1 }
 0x327   :  { %v12622_v44 = vpop.f32.mrb[5].mxu1  ;;  %v1019_v45 = vmul.f32 0.17677669, %v576_v43 }
 0x328   :  { %v1036_v46 = vsel %vm1026_vm3, %v1021_v41, -inf }
 0x329   :  { %1037 = vmax.xlane.f32.xlu0 %v1036_v46  ;;  %v868_v47 = vpop.f32.mrb[10].mxu0  ;;  %v1030_v53 = vsel %vm1026_vm3, %v1019_v45, -inf }
 0x32a   :  { %v649_v50 = vpop.f32.mrb[6].mxu1  ;;  %v12642_v20 = vpop.f32.mrb[11].mxu0  ;;  %v1023_v52 = vmul.f32 0.17677669, %v868_v47 }
 0x32b   :  { %v12627_v51 = vpop.f32.mrb[7].mxu1  ;;  %v1020_v57 = vmul.f32 0.17677669, %v649_v50 }
 0x32c   :  { %v1042_v58 = vsel %vm1026_vm3, %v1023_v52, -inf }
 0x32d   :  { %1031 = vmax.xlane.f32.xlu0 %v1030_v53  ;;  %v1033_v61 = vsel %vm1026_vm3, %v1020_v57, -inf }
 0x32e   :  { %v1014_v54 = vpop.f32.mrb[12].mxu0 }
 0x32f   :  { %v795_v55 = vpop.f32.mrb[8].mxu1  ;;  %v12652_v56 = vpop.f32.mrb[13].mxu0  ;;  %v1025_v21 = vmul.f32 0.17677669, %v1014_v54 }
 0x330   :  { %v12637_v28 = vpop.f32.mrb[9].mxu1  ;;  %v1022_v63 = vmul.f32 0.17677669, %v795_v55 }
 0x331   :  { %1043 = vmax.xlane.f32.xlu0 %v1042_v58  ;;  %v1048_v62 = vsel %vm1026_vm3, %v1025_v21, -inf }
 0x332   :  { %v1039_v3 = vsel %vm1026_vm3, %v1022_v63, -inf }
 0x333   :  { %v941_v59 = vpop.f32.mrb[10].mxu1 }
 0x334   :  { %v12647_v60 = vpop.f32.mrb[11].mxu1  ;;  %v14093_v29 = vmul.f32 0.17677669, %v941_v59 }
 0x335   :  { %1034 = vmax.xlane.f32.xlu0 %v1033_v61 }
 0x336   :  { %v1045_v4 = vsel %vm1026_vm3, %v14093_v29, -inf }
 0x337   :  { %1571 = vrot.lane.b32.xlu1 %v14063_v32, %s13822_s29 }
 0x339   :  { %1049 = vmax.xlane.f32.xlu0 %v1048_v62 }
 0x34f   :  { %1495 = vrot.lane.b32.xlu0 %v14016_v23, %s13822_s29 }
 0x35b   :  { %1040 = vmax.xlane.f32.xlu1 %v1039_v3 }
 0x35f   :  { %1046 = vmax.xlane.f32.xlu1 %v1045_v4 }
 0x3b3   :  { %v1029_v7 = vpop.xlane.xlu1 %1028 }
 0x3b4   :  { %v1051_v8 = vsub.f32 %v1018_v35, %v1029_v7 }
 0x3b6   :  { %v1059_v9 = vmul.f32 1.442695, %v1051_v8  ;;  %v1038_v39 = vpop.xlane.xlu0 %1037 }
 0x3b7   :  { %v1054_v48 = vsub.f32 %v1021_v41, %v1038_v39  ;;  %v14128_v50 = vpop.permute.xlu1 %1571 }
 0x3b8   :  { %13457 = vpow2.f32 %v1059_v9 }
 0x3b9   :  { %v1065_v10 = vmul.f32 1.442695, %v1054_v48 }
 0x3ba   :  { %v1032_v11 = vpop.xlane.xlu0 %1031 }
 0x3bb   :  { %13459 = vpow2.f32 %v1065_v10  ;;  %v1052_v13 = vsub.f32 %v1019_v45, %v1032_v11 }
 0x3bd   :  { %v1061_v14 = vmul.f32 1.442695, %v1052_v13 }
 0x3be   :  { %v1044_v30 = vpop.xlane.xlu0 %1043 }
 0x3bf   :  { %13461 = vpow2.f32 %v1061_v14  ;;  %v1056_v35 = vsub.f32 %v1023_v52, %v1044_v30 }
 0x3c1   :  { %v1069_v37 = vmul.f32 1.442695, %v1056_v35 }
 0x3c2   :  { %v13458_v16 = vpop.eup %13457  ;;  %v1035_v2 = vpop.xlane.xlu0 %1034 }
 0x3c3   :  { %v1075_v17 = vsel %vm1026_vm3, %v13458_v16, 0.0  ;;  %v1053_v33 = vsub.f32 %v1020_v57, %v1035_v2 }
 0x3c4   :  { %1076 = vadd.xlane.f32.xlu1 %v1075_v17 }
 0x3c5   :  { %v14105_v19 = vpop.eup %13459  ;;  %v1063_v34 = vmul.f32 1.442695, %v1053_v33 }
 0x3c6   :  { %v1084_v22 = vsel %vm1026_vm3, %v14105_v19, 0.0  ;;  %v1050_v36 = vpop.xlane.xlu0 %1049 }
 0x3c7   :  { %1085 = vadd.xlane.f32.xlu0 %v1084_v22  ;;  %13463 = vpow2.f32 %v1063_v34  ;;  %v1058_v40 = vsub.f32 %v1025_v21, %v1050_v36 }
 0x3c8   :  { %13465 = vpow2.f32 %v1069_v37 }
 0x3c9   :  { %v13462_v24 = vpop.eup %13461  ;;  %v1073_v41 = vmul.f32 1.442695, %v1058_v40 }
 0x3ca   :  { %v1078_v26 = vsel %vm1026_vm3, %v13462_v24, 0.0  ;;  %v1496_v57 = vpop.permute.xlu0 %1495 }
 0x3cb   :  { %1079 = vadd.xlane.f32.xlu0 %v1078_v26  ;;  %13467 = vpow2.f32 %v1073_v41 }
 0x3d1   :  { %v14114_v42 = vpop.eup %13463 }
 0x3d2   :  { %v1081_v43 = vsel %vm1026_vm3, %v14114_v42, 0.0  ;;  %v14118_v44 = vpop.eup %13465 }
 0x3d3   :  { %v1090_v45 = vsel %vm1026_vm3, %v14118_v44, 0.0 }
 0x3d5   :  { %1733 = vrot.lane.b32.xlu1 %v13993_v49, %s13823_s30  ;;  %v14122_v46 = vpop.eup %13467 }
 0x3d6   :  { %v1096_v47 = vsel %vm1026_vm3, %v14122_v46, 0.0 }
 0x3e1   :  { %1647 = vrot.lane.b32.xlu0 %v14036_v27, %s13822_s29 }
 0x3e8   :  { %v1041_v20 = vpop.xlane.xlu1 %1040 }
 0x3e9   :  { %v1055_v51 = vsub.f32 %v1022_v63, %v1041_v20 }
 0x3eb   :  { %v1067_v52 = vmul.f32 1.442695, %v1055_v51 }
 0x3ec   :  { %v1047_v55 = vpop.xlane.xlu1 %1046 }
 0x3ed   :  { %13469 = vpow2.f32 %v1067_v52  ;;  %v1057_v56 = vsub.f32 %v14093_v29, %v1047_v55 }
 0x3ef   :  { %v1071_v28 = vmul.f32 1.442695, %v1057_v56 }
 0x3f7   :  { %v14138_v53 = vpop.eup %13469 }
 0x3f8   :  { %v1087_v54 = vsel %vm1026_vm3, %v14138_v53, 0.0 }
 0x3f9   :  { %1082 = vadd.xlane.f32.xlu1 %v1081_v43 }
 0x400   :  { %1091 = vadd.xlane.f32.xlu0 %v1090_v45 }
 0x404   :  { %1097 = vadd.xlane.f32.xlu0 %v1096_v47 }
 0x40a   :  { %1731 = vrot.lane.b32.xlu1 %v13997_v15, %s13823_s30 }
 0x41a   :  { %1809 = vrot.lane.b32.xlu0 %v13990_v12, %s13823_s30 }
 0x41e   :  { %1883 = vrot.lane.b32.xlu0 %v14022_v25, %s13823_s30 }
 0x422   :  { %2031 = vrot.lane.b32.xlu0 %v14043_v31, %s13823_s30 }
 0x426   :  { %2179 = vrot.lane.b32.xlu0 %v14063_v32, %s13823_s30 }
 0x42e   :  { %1088 = vadd.xlane.f32.xlu1 %v1087_v54 }
 0x43f   :  { %1957 = vrot.lane.b32.xlu1 %v14004_v18, %s13823_s30 }
 0x451   :  { %v1077_v58 = vpop.xlane.xlu1 %1076 }
 0x452   :  { %13471 = vrcp.f32 %v1077_v58 }
 0x453   :  { %13473 = vpow2.f32 %v1071_v28 }
 0x454   :  { %v1086_v59 = vpop.xlane.xlu0 %1085 }
 0x458   :  { %v1080_v21 = vpop.xlane.xlu0 %1079 }
 0x459   :  { %13475 = vrcp.f32 %v1080_v21 }
 0x45a   :  { %13477 = vrcp.f32 %v1086_v59 }
 0x45c   :  { %v13472_v60 = vpop.eup %13471  ;;  %v1648_v8 = vpop.permute.xlu0 %1647 }
 0x45d   :  { %v1107_v61 = vmul.f32 %v13472_v60, %v13458_v16  ;;  %v14145_v62 = vpop.eup %13473 }
 0x45e   :  { %v1093_v63 = vsel %vm1026_vm3, %v14145_v62, 0.0 }
 0x45f   :  { %12656 = vmatmul.mubr.msk.f32.vlgmr.msra.gmra.mrb[12].mxu1 %vm430_vm2, %v1107_v61 }
 0x460   :  { %12664 = vmatpush3.msra.mxu1 %v14100_v5  ;;  %12665 = vmatprep.mubr.msk.f32.mxu1 %vm13820_vm1, %v13821_v1 }
 0x461   :  { %12673 = vmatprep.subr.mxu1 %v13821_v1 }
 0x463   :  { %v13476_v29 = vpop.eup %13475  ;;  %1094 = vadd.xlane.f32.xlu1 %v1093_v63 }
 0x464   :  { %v1108_v3 = vmul.f32 %v13476_v29, %v13462_v24  ;;  %v13478_v4 = vpop.eup %13477 }
 0x465   :  { %v1110_v5 = vmul.f32 %v13478_v4, %v14105_v19 }
 0x466   :  { %12661 = vmatmul.mubr.msk.f32.vlgmr.msra.gmra.mrb[14].mxu0 %vm430_vm2, %v1108_v3 }
 0x467   :  { %12669 = vmatpush3.msra.mxu0 %v14098_v38  ;;  %12670 = vmatprep.mubr.msk.f32.mxu0 %vm13820_vm1, %v13821_v1  ;;  %v1734_v38 = vpop.permute.xlu1 %1733 }
 0x468   :  { %12678 = vmatprep.subr.mxu0 %v13821_v1 }
 0x46a   :  { %12671 = vmatmul.mubr.msk.f32.vlgmr.msra.gmra.mrb[16].mxu0 %vm430_vm2, %v1110_v5 }
 0x46b   :  { %12679 = vmatpush3.msra.mxu0 %v1496_v57  ;;  %12680 = vmatprep.mubr.msk.f32.mxu0 %vm13820_vm1, %v13821_v1 }
 0x46c   :  { %12688 = vmatprep.subr.mxu0 %v13821_v1 }
 0x474   :  { %2105 = vrot.lane.b32.xlu1 %v14016_v23, %s13823_s30 }
 0x478   :  { %2253 = vrot.lane.b32.xlu1 %v14036_v27, %s13823_s30 }
 0x486   :  { %v1083_v7 = vpop.xlane.xlu1 %1082 }
 0x487   :  { %13479 = vrcp.f32 %v1083_v7 }
 0x48a   :  { %v1732_v17 = vpop.permute.xlu1 %1731 }
 0x48d   :  { %v1092_v9 = vpop.xlane.xlu0 %1091 }
 0x48e   :  { %13481 = vrcp.f32 %v1092_v9 }
 0x491   :  { %v13480_v39 = vpop.eup %13479  ;;  %v1098_v48 = vpop.xlane.xlu0 %1097 }
 0x492   :  { %13483 = vrcp.f32 %v1098_v48  ;;  %v1109_v10 = vmul.f32 %v13480_v39, %v14114_v42 }
 0x494   :  { %12666 = vmatmul.mubr.msk.f32.vlgmr.msra.gmra.mrb[14].mxu1 %vm430_vm2, %v1109_v10 }
 0x495   :  { %12674 = vmatpush3.msra.mxu1 %v14102_v6  ;;  %12675 = vmatprep.mubr.msk.f32.mxu1 %vm13820_vm1, %v13821_v1  ;;  %v1810_v6 = vpop.permute.xlu0 %1809 }
 0x496   :  { %12683 = vmatprep.subr.mxu1 %v13821_v1 }
 0x498   :  { %v13482_v11 = vpop.eup %13481 }
 0x499   :  { %v1112_v13 = vmul.f32 %v13482_v11, %v14118_v44  ;;  %v1884_v36 = vpop.permute.xlu0 %1883 }
 0x49b   :  { %12681 = vmatmul.mubr.msk.f32.vlgmr.msra.gmra.mrb[18].mxu0 %vm430_vm2, %v1112_v13 }
 0x49c   :  { %v13484_v14 = vpop.eup %13483  ;;  %12689 = vmatpush3.msra.mxu0 %v1648_v8  ;;  %12690 = vmatprep.mubr.msk.f32.mxu0 %vm13820_vm1, %v13821_v1 }
 0x49d   :  { %v1114_v16 = vmul.f32 %v13484_v14, %v14122_v46  ;;  %12698 = vmatprep.subr.mxu0 %v13821_v1  ;;  %v2032_v37 = vpop.permute.xlu0 %2031 }
 0x49f   :  { %12691 = vmatmul.mubr.msk.f32.vlgmr.msra.gmra.mrb[20].mxu0 %vm430_vm2, %v1114_v16 }
 0x4a0   :  { %12700 = vmatprep.mubr.msk.f32.mxu0 %vm13820_vm1, %v13821_v1 }
 0x4a1   :  { %v2180_v40 = vpop.permute.xlu0 %2179 }
 0x4a3   :  { %12699 = vmatpush3.xpose.msk.msra.mxu0 %vm430_vm2, %v1810_v6 }
 0x4a4   :  { %12708 = vmatprep.subr.mxu0 %v13821_v1 }
 0x4a6   :  { %12701 = vmatmul.mubr.msk.f32.vlgmr.msra.gmra.mrb[22].mxu0 %vm430_vm2, %v1732_v17 }
 0x4a7   :  { %12710 = vmatprep.mubr.msk.f32.mxu0 %vm13820_vm1, %v13821_v1 }
 0x4bb   :  { %v1089_v19 = vpop.xlane.xlu1 %1088 }
 0x4bc   :  { %13485 = vrcp.f32 %v1089_v19 }
 0x4bf   :  { %v1958_v22 = vpop.permute.xlu1 %1957 }
 0x4c0   :  { %12709 = vmatpush3.xpose.msk.msra.mxu0 %vm430_vm2, %v1958_v22 }
 0x4c1   :  { %12718 = vmatprep.subr.mxu0 %v13821_v1 }
 0x4c3   :  { %12711 = vmatmul.mubr.msk.f32.vlgmr.msra.gmra.mrb[24].mxu0 %vm430_vm2, %v1732_v17 }
 0x4c4   :  { %12720 = vmatprep.mubr.msk.f32.mxu0 %vm13820_vm1, %v13821_v1 }
 0x4c6   :  { %v13486_v24 = vpop.eup %13485 }
 0x4c7   :  { %v1111_v26 = vmul.f32 %v13486_v24, %v14138_v53 }
 0x4c9   :  { %12676 = vmatmul.mubr.msk.f32.vlgmr.msra.gmra.mrb[16].mxu1 %vm430_vm2, %v1111_v26 }
 0x4ca   :  { %12684 = vmatpush3.msra.mxu1 %v14128_v50  ;;  %12685 = vmatprep.mubr.msk.f32.mxu1 %vm13820_vm1, %v13821_v1 }
 0x4cb   :  { %12693 = vmatprep.subr.mxu1 %v13821_v1 }
 0x4f0   :  { %v1095_v30 = vpop.xlane.xlu1 %1094 }
 0x4f1   :  { %13487 = vrcp.f32 %v1095_v30 }
 0x4f4   :  { %v2106_v2 = vpop.permute.xlu1 %2105 }
 0x4f5   :  { %12719 = vmatpush3.xpose.msk.msra.mxu0 %vm430_vm2, %v2106_v2 }
 0x4f6   :  { %12728 = vmatprep.subr.mxu0 %v13821_v1 }
 0x4f8   :  { %12721 = vmatmul.mubr.msk.f32.vlgmr.msra.gmra.mrb[26].mxu0 %vm430_vm2, %v1732_v17  ;;  %v2254_v33 = vpop.permute.xlu1 %2253 }
 0x4f9   :  { %12729 = vmatpush3.xpose.msk.msra.mxu0 %vm430_vm2, %v2254_v33  ;;  %12730 = vmatprep.mubr.msk.f32.mxu0 %vm13820_vm1, %v13821_v1 }
 0x4fa   :  { %12738 = vmatprep.subr.mxu0 %v13821_v1 }
 0x4fb   :  { %v13488_v34 = vpop.eup %13487 }
 0x4fc   :  { %12731 = vmatmul.mubr.msk.f32.vlgmr.msra.gmra.mrb[28].mxu0 %vm430_vm2, %v1732_v17  ;;  %v1113_v35 = vmul.f32 %v13488_v34, %v14145_v62 }
 0x4fd   :  { %12740 = vmatprep.mubr.msk.f32.mxu0 %vm13820_vm1, %v13821_v1 }
 0x4fe   :  { %12686 = vmatmul.mubr.msk.f32.vlgmr.msra.gmra.mrb[18].mxu1 %vm430_vm2, %v1113_v35 }
 0x4ff   :  { %12694 = vmatpush3.xpose.msk.msra.mxu1 %vm430_vm2, %v1734_v38  ;;  %12695 = vmatprep.mubr.msk.f32.mxu1 %vm13820_vm1, %v13821_v1 }
 0x500   :  { %12703 = vmatprep.subr.mxu1 %v13821_v1 }
 0x502   :  { %12696 = vmatmul.mubr.msk.f32.vlgmr.msra.gmra.mrb[20].mxu1 %vm430_vm2, %v1732_v17 }
 0x503   :  { %12704 = vmatpush3.xpose.msk.msra.mxu1 %vm430_vm2, %v1884_v36  ;;  %12705 = vmatprep.mubr.msk.f32.mxu1 %vm13820_vm1, %v13821_v1 }
 0x504   :  { %12713 = vmatprep.subr.mxu1 %v13821_v1 }
 0x506   :  { %12706 = vmatmul.mubr.msk.f32.vlgmr.msra.gmra.mrb[22].mxu1 %vm430_vm2, %v1732_v17 }
 0x507   :  { %12714 = vmatpush3.xpose.msk.msra.mxu1 %vm430_vm2, %v2032_v37  ;;  %12715 = vmatprep.mubr.msk.f32.mxu1 %vm13820_vm1, %v13821_v1 }
 0x508   :  { %12723 = vmatprep.subr.mxu1 %v13821_v1 }
 0x50a   :  { %12716 = vmatmul.mubr.msk.f32.vlgmr.msra.gmra.mrb[24].mxu1 %vm430_vm2, %v1732_v17 }
 0x50b   :  { %12724 = vmatpush3.xpose.msk.msra.mxu1 %vm430_vm2, %v2180_v40  ;;  %12725 = vmatprep.mubr.msk.f32.mxu1 %vm13820_vm1, %v13821_v1 }
 0x50c   :  { %12733 = vmatprep.subr.mxu1 %v13821_v1 }
 0x50e   :  { %12726 = vmatmul.mubr.msk.f32.vlgmr.msra.gmra.mrb[26].mxu1 %vm430_vm2, %v1732_v17 }
 0x50f   :  { %12735 = vmatprep.mubr.msk.f32.mxu1 %vm13820_vm1, %v13821_v1 }
 0x532   :  { %v14233_v41 = vpop.f32.mrb[12].mxu1 }
 0x533   :  { %v12657_v42 = vpop.f32.mrb[13].mxu1 }
 0x539   :  { %v14235_v43 = vpop.f32.mrb[14].mxu0 }
 0x53a   :  { %v12662_v44 = vpop.f32.mrb[15].mxu0 }
 0x53d   :  { %v14237_v45 = vpop.f32.mrb[16].mxu0 }
 0x53e   :  { %v12672_v46 = vpop.f32.mrb[17].mxu0 }
 0x567   :  { %v14239_v47 = vpop.f32.mrb[14].mxu1 }
 0x568   :  { %v12667_v50 = vpop.f32.mrb[15].mxu1 }
 0x56e   :  { %v14241_v20 = vpop.f32.mrb[18].mxu0 }
 0x56f   :  { %v12682_v51 = vpop.f32.mrb[19].mxu0 }
 0x572   :  { %v14243_v52 = vpop.f32.mrb[20].mxu0 }
 0x573   :  { %v12692_v53 = vpop.f32.mrb[21].mxu0 }
 0x579   :  { %v1879_v54 = vpop.f32.mrb[22].mxu0 }
 0x57a   :  { %v2328_v55 = vmul.f32 0.17677669, %v1879_v54  ;;  %v12702_v56 = vpop.f32.mrb[23].mxu0 }
 0x57c   :  { %v2338_v57 = vsel %vm1026_vm3, %v2328_v55, -inf }
 0x57d   :  { %2339 = vmax.xlane.f32.xlu1 %v2338_v57 }
 0x596   :  { %v2027_v28 = vpop.f32.mrb[24].mxu0 }
 0x597   :  { %v12712_v58 = vpop.f32.mrb[25].mxu0  ;;  %v2330_v11 = vmul.f32 0.17677669, %v2027_v28 }
 0x599   :  { %v2344_v17 = vsel %vm1026_vm3, %v2330_v11, -inf }
 0x59c   :  { %v14246_v59 = vpop.f32.mrb[16].mxu1 }
 0x59d   :  { %v12677_v21 = vpop.f32.mrb[17].mxu1 }
 0x5cb   :  { %v2175_v60 = vpop.f32.mrb[26].mxu0 }
 0x5cc   :  { %v14248_v61 = vmul.f32 0.17677669, %v2175_v60  ;;  %v12722_v62 = vpop.f32.mrb[27].mxu0 }
 0x5ce   :  { %v2350_v63 = vsel %vm1026_vm3, %v14248_v61, -inf }
 0x5cf   :  { %2351 = vmax.xlane.f32.xlu1 %v2350_v63  ;;  %v2323_v29 = vpop.f32.mrb[28].mxu0 }
 0x5d0   :  { %v12732_v3 = vpop.f32.mrb[29].mxu0  ;;  %v14277_v2 = vmul.f32 0.17677669, %v2323_v29 }
 0x5d1   :  { %v14252_v4 = vpop.f32.mrb[18].mxu1 }
 0x5d2   :  { %v12687_v5 = vpop.f32.mrb[19].mxu1  ;;  %v2356_v33 = vsel %vm1026_vm3, %v14277_v2, -inf }
 0x5d5   :  { %v1805_v38 = vpop.f32.mrb[20].mxu1 }
 0x5d6   :  { %v2327_v7 = vmul.f32 0.17677669, %v1805_v38  ;;  %v12697_v8 = vpop.f32.mrb[21].mxu1 }
 0x5d8   :  { %v2335_v9 = vsel %vm1026_vm3, %v2327_v7, -inf }
 0x5d9   :  { %2336 = vmax.xlane.f32.xlu0 %v2335_v9  ;;  %v1953_v39 = vpop.f32.mrb[22].mxu1 }
 0x5da   :  { %v2329_v48 = vmul.f32 0.17677669, %v1953_v39  ;;  %v12707_v10 = vpop.f32.mrb[23].mxu1 }
 0x5dc   :  { %v2341_v13 = vsel %vm1026_vm3, %v2329_v48, -inf }
 0x5dd   :  { %2342 = vmax.xlane.f32.xlu0 %v2341_v13  ;;  %v2101_v14 = vpop.f32.mrb[24].mxu1 }
 0x5de   :  { %v12717_v16 = vpop.f32.mrb[25].mxu1  ;;  %v2331_v6 = vmul.f32 0.17677669, %v2101_v14 }
 0x5e0   :  { %2499 = vrot.lane.b32.xlu1 %v13990_v12, %s13824_s5  ;;  %v2347_v26 = vsel %vm1026_vm3, %v2331_v6, -inf }
 0x5e1   :  { %2345 = vmax.xlane.f32.xlu0 %v2344_v17  ;;  %v2249_v19 = vpop.f32.mrb[26].mxu1 }
 0x5e2   :  { %v12727_v22 = vpop.f32.mrb[27].mxu1  ;;  %v2333_v24 = vmul.f32 0.17677669, %v2249_v19 }
 0x5e4   :  { %2575 = vrot.lane.b32.xlu1 %v14022_v25, %s13824_s5  ;;  %v2353_v30 = vsel %vm1026_vm3, %v2333_v24, -inf }
 0x5e5   :  { %2348 = vmax.xlane.f32.xlu0 %v2347_v26 }
 0x5e8   :  { %2651 = vrot.lane.b32.xlu1 %v14004_v18, %s13824_s5 }
 0x5e9   :  { %2354 = vmax.xlane.f32.xlu0 %v2353_v30 }
 0x5ec   :  { %2803 = vrot.lane.b32.xlu1 %v14016_v23, %s13824_s5 }
 0x5f0   :  { %2955 = vrot.lane.b32.xlu1 %v14036_v27, %s13824_s5 }
 0x5ff   :  { %2423 = vrot.lane.b32.xlu0 %v13993_v49, %s13824_s5 }
 0x603   :  { %2727 = vrot.lane.b32.xlu0 %v14043_v31, %s13824_s5 }
 0x607   :  { %2879 = vrot.lane.b32.xlu0 %v14063_v32, %s13824_s5 }
 0x60a   :  { %v2340_v34 = vpop.xlane.xlu1 %2339 }
 0x60b   :  { %3073 = vrot.lane.b32.xlu0 %v13993_v49, %s13825_s6  ;;  %v2360_v35 = vsub.f32 %v2328_v55, %v2340_v34 }
 0x60d   :  { %v2369_v36 = vmul.f32 1.442695, %v2360_v35 }
 0x60f   :  { %13489 = vpow2.f32 %v2369_v36 }
 0x614   :  { %2357 = vmax.xlane.f32.xlu1 %v2356_v33 }
 0x619   :  { %v14283_v37 = vpop.eup %13489 }
 0x61a   :  { %v2386_v40 = vsel %vm1026_vm3, %v14283_v37, 0.0 }
 0x625   :  { %3149 = vrot.lane.b32.xlu1 %v13990_v12, %s13825_s6 }
 0x649   :  { %2387 = vadd.xlane.f32.xlu1 %v2386_v40 }
 0x65c   :  { %v2352_v42 = vpop.xlane.xlu1 %2351 }
 0x65d   :  { %v2364_v55 = vsub.f32 %v14248_v61, %v2352_v42 }
 0x65f   :  { %v2377_v58 = vmul.f32 1.442695, %v2364_v55 }
 0x660   :  { %v2500_v44 = vpop.permute.xlu1 %2499 }
 0x661   :  { %12739 = vmatpush3.msra.mxu0 %v2500_v44 }
 0x662   :  { %12748 = vmatprep.subr.mxu0 %v13821_v1 }
 0x664   :  { %v2576_v17 = vpop.permute.xlu1 %2575 }
 0x666   :  { %v2337_v46 = vpop.xlane.xlu0 %2336 }
 0x667   :  { %v2359_v50 = vsub.f32 %v2327_v7, %v2337_v46 }
 0x668   :  { %v2652_v19 = vpop.permute.xlu1 %2651 }
 0x669   :  { %v2367_v51 = vmul.f32 1.442695, %v2359_v50 }
 0x66a   :  { %v2343_v53 = vpop.xlane.xlu0 %2342 }
 0x66b   :  { %13491 = vpow2.f32 %v2367_v51  ;;  %v2361_v54 = vsub.f32 %v2329_v48, %v2343_v53 }
 0x66c   :  { %v2804_v22 = vpop.permute.xlu1 %2803 }
 0x66d   :  { %v2371_v56 = vmul.f32 1.442695, %v2361_v54 }
 0x66e   :  { %v2346_v57 = vpop.xlane.xlu0 %2345 }
 0x66f   :  { %13493 = vpow2.f32 %v2371_v56  ;;  %v2362_v28 = vsub.f32 %v2330_v11, %v2346_v57 }
 0x671   :  { %v2373_v21 = vmul.f32 1.442695, %v2362_v28 }
 0x672   :  { %v2349_v60 = vpop.xlane.xlu0 %2348 }
 0x673   :  { %13495 = vpow2.f32 %v2373_v21  ;;  %v2363_v62 = vsub.f32 %v2331_v6, %v2349_v60 }
 0x674   :  { %13497 = vpow2.f32 %v2377_v58 }
 0x675   :  { %v14289_v63 = vpop.eup %13491  ;;  %v2375_v29 = vmul.f32 1.442695, %v2363_v62 }
 0x676   :  { %v2355_v3 = vpop.xlane.xlu0 %2354  ;;  %v2383_v5 = vsel %vm1026_vm3, %v14289_v63, 0.0 }
 0x677   :  { %13499 = vpow2.f32 %v2375_v29  ;;  %v2365_v38 = vsub.f32 %v2333_v24, %v2355_v3  ;;  %2384 = vadd.xlane.f32.xlu0 %v2383_v5  ;;  %v14316_v24 = vpop.permute.xlu1 %2955 }
 0x679   :  { %v14293_v61 = vpop.eup %13493  ;;  %v2379_v7 = vmul.f32 1.442695, %v2365_v38 }
 0x67a   :  { %v2424_v8 = vpop.permute.xlu0 %2423  ;;  %v2389_v9 = vsel %vm1026_vm3, %v14293_v61, 0.0 }
 0x67b   :  { %13501 = vpow2.f32 %v2379_v7  ;;  %2390 = vadd.xlane.f32.xlu0 %v2389_v9  ;;  %12734 = vmatpush3.msra.mxu1 %v2424_v8 }
 0x67c   :  { %12743 = vmatprep.subr.mxu1 %v13821_v1 }
 0x67d   :  { %v14298_v39 = vpop.eup %13495 }
 0x67e   :  { %v2392_v48 = vsel %vm1026_vm3, %v14298_v39, 0.0  ;;  %v14302_v10 = vpop.eup %13497  ;;  %v2728_v44 = vpop.permute.xlu0 %2727 }
 0x67f   :  { %2393 = vadd.xlane.f32.xlu1 %v2392_v48  ;;  %v2398_v13 = vsel %vm1026_vm3, %v14302_v10, 0.0 }
 0x681   :  { %v14304_v11 = vpop.eup %13499 }
 0x682   :  { %v2395_v14 = vsel %vm1026_vm3, %v14304_v11, 0.0  ;;  %v2880_v46 = vpop.permute.xlu0 %2879 }
 0x683   :  { %2399 = vadd.xlane.f32.xlu1 %v2398_v13  ;;  %2396 = vadd.xlane.f32.xlu0 %v2395_v14 }
 0x685   :  { %v14310_v16 = vpop.eup %13501 }
 0x686   :  { %v2401_v6 = vsel %vm1026_vm3, %v14310_v16, 0.0  ;;  %v3074_v50 = vpop.permute.xlu0 %3073 }
 0x687   :  { %2402 = vadd.xlane.f32.xlu0 %v2401_v6 }
 0x694   :  { %3223 = vrot.lane.b32.xlu1 %v14022_v25, %s13825_s6 }
 0x69d   :  { %3071 = vrot.lane.b32.xlu0 %v13997_v15, %s13825_s6 }
 0x6a1   :  { %v2358_v26 = vpop.xlane.xlu1 %2357  ;;  %3297 = vrot.lane.b32.xlu0 %v14004_v18, %s13825_s6 }
 0x6a2   :  { %v2366_v30 = vsub.f32 %v14277_v2, %v2358_v26 }
 0x6a4   :  { %v2381_v33 = vmul.f32 1.442695, %v2366_v30 }
 0x6a5   :  { %3445 = vrot.lane.b32.xlu0 %v14016_v23, %s13825_s6  ;;  %v14335_v2 = vpop.permute.xlu1 %3149 }
 0x6a6   :  { %13503 = vpow2.f32 %v2381_v33 }
 0x6a9   :  { %3593 = vrot.lane.b32.xlu0 %v14036_v27, %s13825_s6 }
 0x6b0   :  { %v14327_v34 = vpop.eup %13503 }
 0x6b1   :  { %v2404_v35 = vsel %vm1026_vm3, %v14327_v34, 0.0 }
 0x6b8   :  { %2405 = vadd.xlane.f32.xlu1 %v2404_v35 }
 0x6c9   :  { %3371 = vrot.lane.b32.xlu1 %v14043_v31, %s13825_s6 }
 0x6cd   :  { %3519 = vrot.lane.b32.xlu1 %v14063_v32, %s13825_s6 }
 0x6d6   :  { %v2388_v36 = vpop.xlane.xlu1 %2387 }
 0x6d7   :  { %13505 = vrcp.f32 %v2388_v36 }
 0x6e1   :  { %v13506_v40 = vpop.eup %13505 }
 0x6e2   :  { %v2416_v42 = vmul.f32 %v13506_v40, %v14283_v37 }
 0x6e4   :  { %12741 = vmatmul.mubr.msk.f32.vlgmr.msra.gmra.mrb[30].mxu0 %vm430_vm2, %v2416_v42 }
 0x6e5   :  { %12749 = vmatpush3.msra.mxu0 %v2652_v19  ;;  %12750 = vmatprep.mubr.msk.f32.mxu0 %vm13820_vm1, %v13821_v1 }
 0x6e6   :  { %12758 = vmatprep.subr.mxu0 %v13821_v1 }
 0x704   :  { %v2385_v51 = vpop.xlane.xlu0 %2384 }
 0x705   :  { %13507 = vrcp.f32 %v2385_v51 }
 0x708   :  { %v2391_v53 = vpop.xlane.xlu0 %2390 }
 0x709   :  { %13509 = vrcp.f32 %v2391_v53 }
 0x70c   :  { %v2394_v54 = vpop.xlane.xlu1 %2393 }
 0x70d   :  { %13511 = vrcp.f32 %v2394_v54 }
 0x70f   :  { %v13508_v55 = vpop.eup %13507 }
 0x710   :  { %v2400_v56 = vpop.xlane.xlu1 %2399  ;;  %v2397_v37 = vpop.xlane.xlu0 %2396  ;;  %v2415_v57 = vmul.f32 %v13508_v55, %v14289_v63 }
 0x711   :  { %13513 = vrcp.f32 %v2400_v56 }
 0x712   :  { %13515 = vrcp.f32 %v2397_v37  ;;  %12736 = vmatmul.mubr.msk.f32.vlgmr.msra.gmra.mrb[28].mxu1 %vm430_vm2, %v2415_v57 }
 0x713   :  { %v13510_v28 = vpop.eup %13509  ;;  %12744 = vmatpush3.msra.mxu1 %v2576_v17  ;;  %12745 = vmatprep.mubr.msk.f32.mxu1 %vm13820_vm1, %v13821_v1 }
 0x714   :  { %v2403_v58 = vpop.xlane.xlu0 %2402  ;;  %12753 = vmatprep.subr.mxu1 %v13821_v1  ;;  %v2417_v21 = vmul.f32 %v13510_v28, %v14293_v61  ;;  %v3224_v8 = vpop.permute.xlu1 %3223 }
 0x715   :  { %13517 = vrcp.f32 %v2403_v58 }
 0x716   :  { %12746 = vmatmul.mubr.msk.f32.vlgmr.msra.gmra.mrb[30].mxu1 %vm430_vm2, %v2417_v21 }
 0x717   :  { %v13512_v60 = vpop.eup %13511  ;;  %12754 = vmatpush3.msra.mxu1 %v2728_v44  ;;  %12755 = vmatprep.mubr.msk.f32.mxu1 %vm13820_vm1, %v13821_v1 }
 0x718   :  { %v2418_v62 = vmul.f32 %v13512_v60, %v14298_v39  ;;  %12763 = vmatprep.subr.mxu1 %v13821_v1  ;;  %v3072_v7 = vpop.permute.xlu0 %3071 }
 0x71a   :  { %12751 = vmatmul.mubr.msk.f32.vlgmr.msra.gmra.mrb[32].mxu0 %vm430_vm2, %v2418_v62 }
 0x71b   :  { %v13514_v63 = vpop.eup %13513  ;;  %12759 = vmatpush3.msra.mxu0 %v2804_v22  ;;  %12760 = vmatprep.mubr.msk.f32.mxu0 %vm13820_vm1, %v13821_v1 }
 0x71c   :  { %v13516_v29 = vpop.eup %13515  ;;  %12768 = vmatprep.subr.mxu0 %v13821_v1  ;;  %v2420_v3 = vmul.f32 %v13514_v63, %v14302_v10  ;;  %v3298_v13 = vpop.permute.xlu0 %3297 }
 0x71d   :  { %v2419_v5 = vmul.f32 %v13516_v29, %v14304_v11 }
 0x71e   :  { %12761 = vmatmul.mubr.msk.f32.vlgmr.msra.gmra.mrb[34].mxu0 %vm430_vm2, %v2420_v3 }
 0x71f   :  { %v13518_v38 = vpop.eup %13517  ;;  %12756 = vmatmul.mubr.msk.f32.vlgmr.msra.gmra.mrb[32].mxu1 %vm430_vm2, %v2419_v5  ;;  %12769 = vmatpush3.msra.mxu0 %v14316_v24 }
 0x720   :  { %12764 = vmatpush3.msra.mxu1 %v2880_v46  ;;  %12765 = vmatprep.mubr.msk.f32.mxu1 %vm13820_vm1, %v13821_v1  ;;  %v2421_v61 = vmul.f32 %v13518_v38, %v14310_v16  ;;  %v3446_v14 = vpop.permute.xlu0 %3445 }
 0x721   :  { %12773 = vmatprep.subr.mxu1 %v13821_v1  ;;  %12770 = vmatprep.mubr.msk.f32.mxu0 %vm13820_vm1, %v13821_v1 }
 0x722   :  { %12778 = vmatprep.subr.mxu0 %v13821_v1 }
 0x723   :  { %12766 = vmatmul.mubr.msk.f32.vlgmr.msra.gmra.mrb[34].mxu1 %vm430_vm2, %v2421_v61 }
 0x724   :  { %12775 = vmatprep.mubr.msk.f32.mxu1 %vm13820_vm1, %v13821_v1  ;;  %v3594_v16 = vpop.permute.xlu0 %3593 }
 0x727   :  { %12774 = vmatpush3.xpose.msk.msra.mxu1 %vm430_vm2, %v3074_v50 }
 0x728   :  { %12783 = vmatprep.subr.mxu1 %v13821_v1 }
 0x72a   :  { %12776 = vmatmul.mubr.msk.f32.vlgmr.msra.gmra.mrb[36].mxu1 %vm430_vm2, %v3072_v7 }
 0x72b   :  { %12784 = vmatpush3.xpose.msk.msra.mxu1 %vm430_vm2, %v3224_v8  ;;  %12785 = vmatprep.mubr.msk.f32.mxu1 %vm13820_vm1, %v13821_v1 }
 0x72c   :  { %12793 = vmatprep.subr.mxu1 %v13821_v1 }
 0x72e   :  { %12786 = vmatmul.mubr.msk.f32.vlgmr.msra.gmra.mrb[38].mxu1 %vm430_vm2, %v3072_v7 }
 0x72f   :  { %12795 = vmatprep.mubr.msk.f32.mxu1 %vm13820_vm1, %v13821_v1 }
 0x745   :  { %v2406_v9 = vpop.xlane.xlu1 %2405 }
 0x746   :  { %13519 = vrcp.f32 %v2406_v9 }
 0x749   :  { %v3372_v39 = vpop.permute.xlu1 %3371 }
 0x74a   :  { %12794 = vmatpush3.xpose.msk.msra.mxu1 %vm430_vm2, %v3372_v39 }
 0x74b   :  { %12803 = vmatprep.subr.mxu1 %v13821_v1 }
 0x74d   :  { %v3520_v48 = vpop.permute.xlu1 %3519  ;;  %12796 = vmatmul.mubr.msk.f32.vlgmr.msra.gmra.mrb[40].mxu1 %vm430_vm2, %v3072_v7 }
 0x74e   :  { %12804 = vmatpush3.xpose.msk.msra.mxu1 %vm430_vm2, %v3520_v48  ;;  %12805 = vmatprep.mubr.msk.f32.mxu1 %vm13820_vm1, %v13821_v1 }
 0x74f   :  { %12813 = vmatprep.subr.mxu1 %v13821_v1 }
 0x750   :  { %v13520_v10 = vpop.eup %13519 }
 0x751   :  { %12806 = vmatmul.mubr.msk.f32.vlgmr.msra.gmra.mrb[42].mxu1 %vm430_vm2, %v3072_v7  ;;  %v2422_v11 = vmul.f32 %v13520_v10, %v14327_v34 }
 0x752   :  { %12815 = vmatprep.mubr.msk.f32.mxu1 %vm13820_vm1, %v13821_v1 }
 0x753   :  { %12771 = vmatmul.mubr.msk.f32.vlgmr.msra.gmra.mrb[36].mxu0 %vm430_vm2, %v2422_v11 }
 0x754   :  { %12779 = vmatpush3.xpose.msk.msra.mxu0 %vm430_vm2, %v14335_v2  ;;  %12780 = vmatprep.mubr.msk.f32.mxu0 %vm13820_vm1, %v13821_v1 }
 0x755   :  { %12788 = vmatprep.subr.mxu0 %v13821_v1 }
 0x757   :  { %12781 = vmatmul.mubr.msk.f32.vlgmr.msra.gmra.mrb[38].mxu0 %vm430_vm2, %v3072_v7 }
 0x758   :  { %12789 = vmatpush3.xpose.msk.msra.mxu0 %vm430_vm2, %v3298_v13  ;;  %12790 = vmatprep.mubr.msk.f32.mxu0 %vm13820_vm1, %v13821_v1 }
 0x759   :  { %12798 = vmatprep.subr.mxu0 %v13821_v1 }
 0x75b   :  { %12791 = vmatmul.mubr.msk.f32.vlgmr.msra.gmra.mrb[40].mxu0 %vm430_vm2, %v3072_v7 }
 0x75c   :  { %12799 = vmatpush3.xpose.msk.msra.mxu0 %vm430_vm2, %v3446_v14  ;;  %12800 = vmatprep.mubr.msk.f32.mxu0 %vm13820_vm1, %v13821_v1 }
 0x75d   :  { %12808 = vmatprep.subr.mxu0 %v13821_v1 }
 0x75f   :  { %12801 = vmatmul.mubr.msk.f32.vlgmr.msra.gmra.mrb[42].mxu0 %vm430_vm2, %v3072_v7 }
 0x760   :  { %12809 = vmatpush3.xpose.msk.msra.mxu0 %vm430_vm2, %v3594_v16  ;;  %12810 = vmatprep.mubr.msk.f32.mxu0 %vm13820_vm1, %v13821_v1 }
 0x761   :  { %12818 = vmatprep.subr.mxu0 %v13821_v1 }
 0x763   :  { %12811 = vmatmul.mubr.msk.f32.vlgmr.msra.gmra.mrb[44].mxu0 %vm430_vm2, %v3072_v7 }
 0x764   :  { %12820 = vmatprep.mubr.msk.f32.mxu0 %vm13820_vm1, %v13821_v1 }
 0x7b7   :  { %v14417_v6 = vpop.f32.mrb[30].mxu0 }
 0x7b8   :  { %v12742_v17 = vpop.f32.mrb[31].mxu0 }
 0x7e5   :  { %v14419_v19 = vpop.f32.mrb[28].mxu1 }
 0x7e6   :  { %v12737_v22 = vpop.f32.mrb[29].mxu1 }
 0x7e9   :  { %v14421_v24 = vpop.f32.mrb[30].mxu1 }
 0x7ea   :  { %v12747_v26 = vpop.f32.mrb[31].mxu1 }
 0x7ed   :  { %v14423_v30 = vpop.f32.mrb[32].mxu0 }
 0x7ee   :  { %v12752_v33 = vpop.f32.mrb[33].mxu0 }
 0x7f1   :  { %v14425_v34 = vpop.f32.mrb[34].mxu0 }
 0x7f2   :  { %v14427_v35 = vpop.f32.mrb[32].mxu1  ;;  %v12762_v2 = vpop.f32.mrb[35].mxu0 }
 0x7f3   :  { %v12757_v36 = vpop.f32.mrb[33].mxu1 }
 0x7f6   :  { %v14429_v40 = vpop.f32.mrb[34].mxu1 }
 0x7f7   :  { %v12767_v42 = vpop.f32.mrb[35].mxu1 }
 0x7fd   :  { %v3145_v44 = vpop.f32.mrb[36].mxu1 }
 0x7fe   :  { %v3667_v46 = vmul.f32 0.17677669, %v3145_v44  ;;  %v12777_v50 = vpop.f32.mrb[37].mxu1 }
 0x800   :  { %v3675_v51 = vsel %vm1026_vm3, %v3667_v46, -inf }
 0x801   :  { %3676 = vmax.xlane.f32.xlu1 %v3675_v51  ;;  %v3293_v53 = vpop.f32.mrb[38].mxu1 }
 0x802   :  { %v12787_v54 = vpop.f32.mrb[39].mxu1  ;;  %v3669_v38 = vmul.f32 0.17677669, %v3293_v53 }
 0x804   :  { %v3681_v39 = vsel %vm1026_vm3, %v3669_v38, -inf }
 0x820   :  { %v3441_v55 = vpop.f32.mrb[40].mxu1 }
 0x821   :  { %v14432_v56 = vmul.f32 0.17677669, %v3441_v55  ;;  %v12797_v37 = vpop.f32.mrb[41].mxu1 }
 0x823   :  { %v3687_v57 = vsel %vm1026_vm3, %v14432_v56, -inf }
 0x824   :  { %3688 = vmax.xlane.f32.xlu1 %v3687_v57  ;;  %v3589_v28 = vpop.f32.mrb[42].mxu1 }
 0x825   :  { %v14436_v58 = vmul.f32 0.17677669, %v3589_v28  ;;  %v12807_v21 = vpop.f32.mrb[43].mxu1 }
 0x826   :  { %v14438_v60 = vpop.f32.mrb[36].mxu0 }
 0x827   :  { %v12772_v62 = vpop.f32.mrb[37].mxu0  ;;  %v3693_v63 = vsel %vm1026_vm3, %v14436_v58, -inf }
 0x828   :  { %3694 = vmax.xlane.f32.xlu1 %v3693_v63 }
 0x82a   :  { %v3219_v29 = vpop.f32.mrb[38].mxu0 }
 0x82b   :  { %v3668_v3 = vmul.f32 0.17677669, %v3219_v29  ;;  %v12782_v5 = vpop.f32.mrb[39].mxu0 }
 0x82d   :  { %v3678_v61 = vsel %vm1026_vm3, %v3668_v3, -inf }
 0x82e   :  { %3679 = vmax.xlane.f32.xlu0 %v3678_v61  ;;  %v3367_v7 = vpop.f32.mrb[40].mxu0 }
 0x82f   :  { %v12792_v8 = vpop.f32.mrb[41].mxu0  ;;  %v3670_v9 = vmul.f32 0.17677669, %v3367_v7 }
 0x831   :  { %v3684_v13 = vsel %vm1026_vm3, %v3670_v9, -inf }
 0x832   :  { %v3515_v48 = vpop.f32.mrb[42].mxu0  ;;  %3682 = vmax.xlane.f32.xlu0 %v3681_v39 }
 0x833   :  { %v12802_v10 = vpop.f32.mrb[43].mxu0  ;;  %v3672_v11 = vmul.f32 0.17677669, %v3515_v48 }
 0x835   :  { %v3690_v22 = vsel %vm1026_vm3, %v3672_v11, -inf }
 0x836   :  { %v3663_v14 = vpop.f32.mrb[44].mxu0  ;;  %3685 = vmax.xlane.f32.xlu0 %v3684_v13 }
 0x837   :  { %v12812_v16 = vpop.f32.mrb[45].mxu0  ;;  %v3674_v17 = vmul.f32 0.17677669, %v3663_v14 }
 0x839   :  { %3763 = vrot.lane.b32.xlu1 %v13993_v49, %s13826_s7  ;;  %v3696_v26 = vsel %vm1026_vm3, %v3674_v17, -inf }
 0x83a   :  { %3691 = vmax.xlane.f32.xlu0 %v3690_v22 }
 0x83d   :  { %3915 = vrot.lane.b32.xlu1 %v14022_v25, %s13826_s7 }
 0x83e   :  { %3697 = vmax.xlane.f32.xlu0 %v3696_v26 }
 0x841   :  { %3991 = vrot.lane.b32.xlu1 %v14004_v18, %s13826_s7 }
 0x845   :  { %4067 = vrot.lane.b32.xlu1 %v14043_v31, %s13826_s7 }
 0x849   :  { %4219 = vrot.lane.b32.xlu1 %v14063_v32, %s13826_s7 }
 0x84d   :  { %4413 = vrot.lane.b32.xlu1 %v13993_v49, %s13827_s8 }
 0x854   :  { %3839 = vrot.lane.b32.xlu0 %v13990_v12, %s13826_s7 }
 0x858   :  { %4143 = vrot.lane.b32.xlu0 %v14016_v23, %s13826_s7 }
 0x85c   :  { %4295 = vrot.lane.b32.xlu0 %v14036_v27, %s13826_s7 }
 0x88e   :  { %v3677_v33 = vpop.xlane.xlu1 %3676 }
 0x88f   :  { %v3699_v2 = vsub.f32 %v3667_v46, %v3677_v33 }
 0x891   :  { %v3707_v36 = vmul.f32 1.442695, %v3699_v2 }
 0x893   :  { %13521 = vpow2.f32 %v3707_v36 }
 0x89d   :  { %v14465_v42 = vpop.eup %13521 }
 0x89e   :  { %v3723_v44 = vsel %vm1026_vm3, %v14465_v42, 0.0 }
 0x89f   :  { %3724 = vadd.xlane.f32.xlu1 %v3723_v44 }
 0x8b1   :  { %v3689_v50 = vpop.xlane.xlu1 %3688 }
 0x8b2   :  { %v3703_v37 = vsub.f32 %v14432_v56, %v3689_v50 }
 0x8b4   :  { %v3715_v21 = vmul.f32 1.442695, %v3703_v37 }
 0x8b5   :  { %v3695_v51 = vpop.xlane.xlu1 %3694 }
 0x8b6   :  { %v3705_v62 = vsub.f32 %v14436_v58, %v3695_v51 }
 0x8b8   :  { %v3719_v61 = vmul.f32 1.442695, %v3705_v62 }
 0x8b9   :  { %v3764_v53 = vpop.permute.xlu1 %3763 }
 0x8ba   :  { %12814 = vmatpush3.msra.mxu1 %v3764_v53 }
 0x8bb   :  { %v3680_v54 = vpop.xlane.xlu0 %3679  ;;  %12823 = vmatprep.subr.mxu1 %v13821_v1 }
 0x8bc   :  { %v3700_v55 = vsub.f32 %v3668_v3, %v3680_v54 }
 0x8bd   :  { %v3916_v51 = vpop.permute.xlu1 %3915 }
 0x8be   :  { %v3709_v57 = vmul.f32 1.442695, %v3700_v55 }
 0x8bf   :  { %v3683_v46 = vpop.xlane.xlu0 %3682 }
 0x8c0   :  { %13523 = vpow2.f32 %v3709_v57  ;;  %v3701_v28 = vsub.f32 %v3669_v38, %v3683_v46 }
 0x8c1   :  { %v3992_v53 = vpop.permute.xlu1 %3991 }
 0x8c2   :  { %v3711_v63 = vmul.f32 1.442695, %v3701_v28 }
 0x8c3   :  { %v3686_v29 = vpop.xlane.xlu0 %3685 }
 0x8c4   :  { %13525 = vpow2.f32 %v3711_v63  ;;  %v3702_v5 = vsub.f32 %v3670_v9, %v3686_v29 }
 0x8c5   :  { %13527 = vpow2.f32 %v3715_v21  ;;  %v4068_v54 = vpop.permute.xlu1 %4067 }
 0x8c6   :  { %v3713_v7 = vmul.f32 1.442695, %v3702_v5 }
 0x8c7   :  { %v3692_v8 = vpop.xlane.xlu0 %3691 }
 0x8c8   :  { %13529 = vpow2.f32 %v3713_v7  ;;  %v3704_v39 = vsub.f32 %v3672_v11, %v3692_v8 }
 0x8c9   :  { %13531 = vpow2.f32 %v3719_v61  ;;  %v4220_v55 = vpop.permute.xlu1 %4219 }
 0x8ca   :  { %v14472_v3 = vpop.eup %13523  ;;  %v3717_v56 = vmul.f32 1.442695, %v3704_v39 }
 0x8cb   :  { %v3698_v48 = vpop.xlane.xlu0 %3697  ;;  %v3726_v38 = vsel %vm1026_vm3, %v14472_v3, 0.0 }
 0x8cc   :  { %13533 = vpow2.f32 %v3717_v56  ;;  %v3706_v58 = vsub.f32 %v3674_v17, %v3698_v48  ;;  %3727 = vadd.xlane.f32.xlu0 %v3726_v38 }
 0x8cd   :  { %v14517_v37 = vpop.permute.xlu1 %4413 }
 0x8ce   :  { %v14476_v10 = vpop.eup %13525  ;;  %v3721_v9 = vmul.f32 1.442695, %v3706_v58 }
 0x8cf   :  { %v3840_v13 = vpop.permute.xlu0 %3839  ;;  %v3729_v14 = vsel %vm1026_vm3, %v14476_v10, 0.0  ;;  %v14480_v16 = vpop.eup %13527 }
 0x8d0   :  { %13535 = vpow2.f32 %v3721_v9  ;;  %12819 = vmatpush3.msra.mxu0 %v3840_v13  ;;  %3730 = vadd.xlane.f32.xlu1 %v3729_v14  ;;  %v3735_v22 = vsel %vm1026_vm3, %v14480_v16, 0.0 }
 0x8d1   :  { %12828 = vmatprep.subr.mxu0 %v13821_v1 }
 0x8d2   :  { %v14483_v11 = vpop.eup %13529 }
 0x8d3   :  { %v3732_v17 = vsel %vm1026_vm3, %v14483_v11, 0.0  ;;  %v14489_v26 = vpop.eup %13531  ;;  %v4144_v21 = vpop.permute.xlu0 %4143 }
 0x8d4   :  { %3733 = vadd.xlane.f32.xlu0 %v3732_v17  ;;  %3736 = vadd.xlane.f32.xlu1 %v3735_v22  ;;  %v3741_v36 = vsel %vm1026_vm3, %v14489_v26, 0.0 }
 0x8d6   :  { %v14491_v33 = vpop.eup %13533 }
 0x8d7   :  { %v3738_v2 = vsel %vm1026_vm3, %v14491_v33, 0.0  ;;  %v4296_v62 = vpop.permute.xlu0 %4295 }
 0x8d8   :  { %3739 = vadd.xlane.f32.xlu0 %v3738_v2  ;;  %3742 = vadd.xlane.f32.xlu1 %v3741_v36 }
 0x8da   :  { %v14497_v44 = vpop.eup %13535 }
 0x8db   :  { %v3744_v50 = vsel %vm1026_vm3, %v14497_v44, 0.0 }
 0x8dc   :  { %3745 = vadd.xlane.f32.xlu0 %v3744_v50 }
 0x8e9   :  { %4411 = vrot.lane.b32.xlu1 %v13997_v15, %s13827_s8 }
 0x8ed   :  { %4637 = vrot.lane.b32.xlu1 %v14004_v18, %s13827_s8 }
 0x8f1   :  { %4785 = vrot.lane.b32.xlu1 %v14016_v23, %s13827_s8 }
 0x8f2   :  { %4489 = vrot.lane.b32.xlu0 %v13990_v12, %s13827_s8 }
 0x8f5   :  { %4933 = vrot.lane.b32.xlu1 %v14036_v27, %s13827_s8 }
 0x8f6   :  { %4563 = vrot.lane.b32.xlu0 %v14022_v25, %s13827_s8 }
 0x8fa   :  { %4711 = vrot.lane.b32.xlu0 %v14043_v31, %s13827_s8 }
 0x8fe   :  { %4859 = vrot.lane.b32.xlu0 %v14063_v32, %s13827_s8 }
 0x92c   :  { %v3725_v57 = vpop.xlane.xlu1 %3724 }
 0x92d   :  { %13537 = vrcp.f32 %v3725_v57 }
 0x937   :  { %v13538_v46 = vpop.eup %13537 }
 0x938   :  { %v3755_v28 = vmul.f32 %v13538_v46, %v14465_v42 }
 0x93a   :  { %12816 = vmatmul.mubr.msk.f32.vlgmr.msra.gmra.mrb[44].mxu1 %vm430_vm2, %v3755_v28 }
 0x93b   :  { %12824 = vmatpush3.msra.mxu1 %v3916_v51  ;;  %12825 = vmatprep.mubr.msk.f32.mxu1 %vm13820_vm1, %v13821_v1 }
 0x93c   :  { %12833 = vmatprep.subr.mxu1 %v13821_v1 }
 0x959   :  { %v3728_v63 = vpop.xlane.xlu0 %3727 }
 0x95a   :  { %13539 = vrcp.f32 %v3728_v63 }
 0x95d   :  { %v3731_v29 = vpop.xlane.xlu1 %3730 }
 0x95e   :  { %13541 = vrcp.f32 %v3731_v29 }
 0x961   :  { %v3734_v5 = vpop.xlane.xlu0 %3733  ;;  %v3737_v61 = vpop.xlane.xlu1 %3736 }
 0x962   :  { %13543 = vrcp.f32 %v3734_v5 }
 0x963   :  { %13545 = vrcp.f32 %v3737_v61 }
 0x964   :  { %v13540_v7 = vpop.eup %13539 }
 0x965   :  { %v3740_v42 = vpop.xlane.xlu0 %3739  ;;  %v3743_v8 = vpop.xlane.xlu1 %3742  ;;  %v3756_v39 = vmul.f32 %v13540_v7, %v14472_v3 }
 0x966   :  { %13547 = vrcp.f32 %v3740_v42 }
 0x967   :  { %13549 = vrcp.f32 %v3743_v8  ;;  %12821 = vmatmul.mubr.msk.f32.vlgmr.msra.gmra.mrb[46].mxu0 %vm430_vm2, %v3756_v39 }
 0x968   :  { %v13542_v56 = vpop.eup %13541  ;;  %12829 = vmatpush3.msra.mxu0 %v3992_v53  ;;  %12830 = vmatprep.mubr.msk.f32.mxu0 %vm13820_vm1, %v13821_v1 }
 0x969   :  { %v3746_v48 = vpop.xlane.xlu0 %3745  ;;  %v3757_v38 = vmul.f32 %v13542_v56, %v14476_v10  ;;  %12838 = vmatprep.subr.mxu0 %v13821_v1  ;;  %v4412_v2 = vpop.permute.xlu1 %4411 }
 0x96a   :  { %13551 = vrcp.f32 %v3746_v48 }
 0x96b   :  { %12826 = vmatmul.mubr.msk.f32.vlgmr.msra.gmra.mrb[46].mxu1 %vm430_vm2, %v3757_v38 }
 0x96c   :  { %v13544_v58 = vpop.eup %13543  ;;  %12834 = vmatpush3.msra.mxu1 %v4068_v54  ;;  %12835 = vmatprep.mubr.msk.f32.mxu1 %vm13820_vm1, %v13821_v1 }
 0x96d   :  { %v13546_v3 = vpop.eup %13545  ;;  %12843 = vmatprep.subr.mxu1 %v13821_v1  ;;  %v3758_v9 = vmul.f32 %v13544_v58, %v14483_v11  ;;  %v4490_v17 = vpop.permute.xlu0 %4489 }
 0x96e   :  { %v3759_v13 = vmul.f32 %v13546_v3, %v14480_v16  ;;  %v4638_v36 = vpop.permute.xlu1 %4637 }
 0x96f   :  { %12831 = vmatmul.mubr.msk.f32.vlgmr.msra.gmra.mrb[48].mxu0 %vm430_vm2, %v3758_v9 }
 0x970   :  { %v13548_v10 = vpop.eup %13547  ;;  %12836 = vmatmul.mubr.msk.f32.vlgmr.msra.gmra.mrb[48].mxu1 %vm430_vm2, %v3759_v13  ;;  %12839 = vmatpush3.msra.mxu0 %v4144_v21 }
 0x971   :  { %v13550_v14 = vpop.eup %13549  ;;  %12844 = vmatpush3.msra.mxu1 %v4220_v55  ;;  %12840 = vmatprep.mubr.msk.f32.mxu0 %vm13820_vm1, %v13821_v1  ;;  %v3760_v22 = vmul.f32 %v13548_v10, %v14491_v33 }
 0x972   :  { %12845 = vmatprep.mubr.msk.f32.mxu1 %vm13820_vm1, %v13821_v1  ;;  %12848 = vmatprep.subr.mxu0 %v13821_v1  ;;  %v3761_v16 = vmul.f32 %v13550_v14, %v14489_v26  ;;  %v4564_v26 = vpop.permute.xlu0 %4563  ;;  %v4786_v50 = vpop.permute.xlu1 %4785 }
 0x973   :  { %12841 = vmatmul.mubr.msk.f32.vlgmr.msra.gmra.mrb[50].mxu0 %vm430_vm2, %v3760_v22  ;;  %12853 = vmatprep.subr.mxu1 %v13821_v1 }
 0x974   :  { %v13552_v11 = vpop.eup %13551  ;;  %12846 = vmatmul.mubr.msk.f32.vlgmr.msra.gmra.mrb[50].mxu1 %vm430_vm2, %v3761_v16  ;;  %12849 = vmatpush3.msra.mxu0 %v4296_v62 }
 0x975   :  { %12850 = vmatprep.mubr.msk.f32.mxu0 %vm13820_vm1, %v13821_v1  ;;  %v3762_v33 = vmul.f32 %v13552_v11, %v14497_v44  ;;  %12855 = vmatprep.mubr.msk.f32.mxu1 %vm13820_vm1, %v13821_v1 }
 0x976   :  { %12858 = vmatprep.subr.mxu0 %v13821_v1  ;;  %v4712_v44 = vpop.permute.xlu0 %4711  ;;  %v4934_v53 = vpop.permute.xlu1 %4933 }
 0x977   :  { %12851 = vmatmul.mubr.msk.f32.vlgmr.msra.gmra.mrb[52].mxu0 %vm430_vm2, %v3762_v33 }
 0x978   :  { %12854 = vmatpush3.xpose.msk.msra.mxu1 %vm430_vm2, %v14517_v37  ;;  %12860 = vmatprep.mubr.msk.f32.mxu0 %vm13820_vm1, %v13821_v1 }
 0x979   :  { %12863 = vmatprep.subr.mxu1 %v13821_v1 }
 0x97a   :  { %v4860_v51 = vpop.permute.xlu0 %4859 }
 0x97b   :  { %12856 = vmatmul.mubr.msk.f32.vlgmr.msra.gmra.mrb[52].mxu1 %vm430_vm2, %v4412_v2  ;;  %12859 = vmatpush3.xpose.msk.msra.mxu0 %vm430_vm2, %v4490_v17 }
 0x97c   :  { %12864 = vmatpush3.xpose.msk.msra.mxu1 %vm430_vm2, %v4564_v26  ;;  %12865 = vmatprep.mubr.msk.f32.mxu1 %vm13820_vm1, %v13821_v1 }
 0x97d   :  { %12868 = vmatprep.subr.mxu0 %v13821_v1  ;;  %12873 = vmatprep.subr.mxu1 %v13821_v1 }
 0x97e   :  { %12861 = vmatmul.mubr.msk.f32.vlgmr.msra.gmra.mrb[54].mxu0 %vm430_vm2, %v4412_v2 }
 0x97f   :  { %12866 = vmatmul.mubr.msk.f32.vlgmr.msra.gmra.mrb[54].mxu1 %vm430_vm2, %v4412_v2  ;;  %12869 = vmatpush3.xpose.msk.msra.mxu0 %vm430_vm2, %v4638_v36 }
 0x980   :  { %12874 = vmatpush3.xpose.msk.msra.mxu1 %vm430_vm2, %v4712_v44  ;;  %12870 = vmatprep.mubr.msk.f32.mxu0 %vm13820_vm1, %v13821_v1 }
 0x981   :  { %12875 = vmatprep.mubr.msk.f32.mxu1 %vm13820_vm1, %v13821_v1  ;;  %12878 = vmatprep.subr.mxu0 %v13821_v1 }
 0x982   :  { %12871 = vmatmul.mubr.msk.f32.vlgmr.msra.gmra.mrb[56].mxu0 %vm430_vm2, %v4412_v2  ;;  %12883 = vmatprep.subr.mxu1 %v13821_v1 }
 0x983   :  { %12876 = vmatmul.mubr.msk.f32.vlgmr.msra.gmra.mrb[56].mxu1 %vm430_vm2, %v4412_v2  ;;  %12879 = vmatpush3.xpose.msk.msra.mxu0 %vm430_vm2, %v4786_v50 }
 0x984   :  { %12884 = vmatpush3.xpose.msk.msra.mxu1 %vm430_vm2, %v4860_v51  ;;  %12880 = vmatprep.mubr.msk.f32.mxu0 %vm13820_vm1, %v13821_v1 }
 0x985   :  { %12885 = vmatprep.mubr.msk.f32.mxu1 %vm13820_vm1, %v13821_v1  ;;  %12888 = vmatprep.subr.mxu0 %v13821_v1 }
 0x986   :  { %12881 = vmatmul.mubr.msk.f32.vlgmr.msra.gmra.mrb[58].mxu0 %vm430_vm2, %v4412_v2  ;;  %12893 = vmatprep.subr.mxu1 %v13821_v1 }
 0x987   :  { %12886 = vmatmul.mubr.msk.f32.vlgmr.msra.gmra.mrb[58].mxu1 %vm430_vm2, %v4412_v2  ;;  %12889 = vmatpush3.xpose.msk.msra.mxu0 %vm430_vm2, %v4934_v53 }
 0x988   :  { %12890 = vmatprep.mubr.msk.f32.mxu0 %vm13820_vm1, %v13821_v1  ;;  %12898 = vmatprep.subr.mxu0 %v13821_v1 }
 0x989   :  { %12895 = vmatprep.mubr.msk.f32.mxu1 %vm13820_vm1, %v13821_v1 }
 0x98a   :  { %12891 = vmatmul.mubr.msk.f32.vlgmr.msra.gmra.mrb[60].mxu0 %vm430_vm2, %v4412_v2 }
 0x98b   :  { %12900 = vmatprep.mubr.msk.f32.mxu0 %vm13820_vm1, %v13821_v1 }
 0xa0d   :  { %v14598_v54 = vpop.f32.mrb[44].mxu1 }
 0xa0e   :  { %v12817_v55 = vpop.f32.mrb[45].mxu1 }
 0xa3a   :  { %v14600_v37 = vpop.f32.mrb[46].mxu0 }
 0xa3b   :  { %v12822_v57 = vpop.f32.mrb[47].mxu0 }
 0xa3e   :  { %v14602_v46 = vpop.f32.mrb[46].mxu1 }
 0xa3f   :  { %v12827_v28 = vpop.f32.mrb[47].mxu1 }
 0xa42   :  { %v14604_v21 = vpop.f32.mrb[48].mxu0 }
 0xa43   :  { %v14606_v62 = vpop.f32.mrb[48].mxu1  ;;  %v12832_v63 = vpop.f32.mrb[49].mxu0 }
 0xa44   :  { %v12837_v29 = vpop.f32.mrb[49].mxu1 }
 0xa46   :  { %v14608_v5 = vpop.f32.mrb[50].mxu0 }
 0xa47   :  { %v14610_v61 = vpop.f32.mrb[50].mxu1  ;;  %v12842_v7 = vpop.f32.mrb[51].mxu0 }
 0xa48   :  { %v12847_v42 = vpop.f32.mrb[51].mxu1 }
 0xa4a   :  { %v14612_v8 = vpop.f32.mrb[52].mxu0 }
 0xa4b   :  { %v12852_v39 = vpop.f32.mrb[53].mxu0 }
 0xa4e   :  { %v4485_v56 = vpop.f32.mrb[52].mxu1 }
 0xa4f   :  { %v5007_v48 = vmul.f32 0.17677669, %v4485_v56  ;;  %v12857_v38 = vpop.f32.mrb[53].mxu1 }
 0xa51   :  { %v4559_v58 = vpop.f32.mrb[54].mxu0  ;;  %v5015_v3 = vsel %vm1026_vm3, %v5007_v48, -inf }
 0xa52   :  { %v5008_v9 = vmul.f32 0.17677669, %v4559_v58  ;;  %5016 = vmax.xlane.f32.xlu0 %v5015_v3  ;;  %v4633_v13 = vpop.f32.mrb[54].mxu1  ;;  %v12862_v10 = vpop.f32.mrb[55].mxu0 }
 0xa53   :  { %v5009_v14 = vmul.f32 0.17677669, %v4633_v13  ;;  %v12867_v17 = vpop.f32.mrb[55].mxu1 }
 0xa54   :  { %v5018_v22 = vsel %vm1026_vm3, %v5008_v9, -inf }
 0xa55   :  { %5019 = vmax.xlane.f32.xlu1 %v5018_v22  ;;  %v4707_v16 = vpop.f32.mrb[56].mxu0  ;;  %v5021_v11 = vsel %vm1026_vm3, %v5009_v14, -inf }
 0xa56   :  { %v5010_v2 = vmul.f32 0.17677669, %v4707_v16  ;;  %5022 = vmax.xlane.f32.xlu0 %v5021_v11  ;;  %v4781_v33 = vpop.f32.mrb[56].mxu1  ;;  %v12872_v26 = vpop.f32.mrb[57].mxu0 }
 0xa57   :  { %v12877_v36 = vpop.f32.mrb[57].mxu1  ;;  %v5011_v50 = vmul.f32 0.17677669, %v4781_v33 }
 0xa58   :  { %v5024_v44 = vsel %vm1026_vm3, %v5010_v2, -inf }
 0xa59   :  { %v4855_v51 = vpop.f32.mrb[58].mxu0  ;;  %v5027_v42 = vsel %vm1026_vm3, %v5011_v50, -inf }
 0xa5a   :  { %v5012_v53 = vmul.f32 0.17677669, %v4855_v51  ;;  %5025 = vmax.xlane.f32.xlu0 %v5024_v44  ;;  %v4929_v55 = vpop.f32.mrb[58].mxu1  ;;  %v12882_v57 = vpop.f32.mrb[59].mxu0 }
 0xa5b   :  { %v12887_v28 = vpop.f32.mrb[59].mxu1  ;;  %v5013_v29 = vmul.f32 0.17677669, %v4929_v55 }
 0xa5c   :  { %v5030_v63 = vsel %vm1026_vm3, %v5012_v53, -inf }
 0xa5d   :  { %5031 = vmax.xlane.f32.xlu1 %v5030_v63  ;;  %v5003_v7 = vpop.f32.mrb[60].mxu0  ;;  %v5033_v58 = vsel %vm1026_vm3, %v5013_v29, -inf }
 0xa5e   :  { %v5014_v39 = vmul.f32 0.17677669, %v5003_v7  ;;  %5028 = vmax.xlane.f32.xlu0 %v5027_v42  ;;  %v12892_v56 = vpop.f32.mrb[61].mxu0 }
 0xa60   :  { %v5036_v38 = vsel %vm1026_vm3, %v5014_v39, -inf }
 0xa61   :  { %5037 = vmax.xlane.f32.xlu1 %v5036_v38 }
 0xa62   :  { %5034 = vmax.xlane.f32.xlu0 %v5033_v58 }
 0xa72   :  { %5179 = vrot.lane.b32.xlu1 %v13990_v12, %s13828_s9 }
 0xa76   :  { %5255 = vrot.lane.b32.xlu1 %v14022_v25, %s13828_s9 }
 0xa78   :  { %5103 = vrot.lane.b32.xlu0 %v13993_v49, %s13828_s9 }
 0xa7a   :  { %5331 = vrot.lane.b32.xlu1 %v14004_v18, %s13828_s9 }
 0xa7c   :  { %5407 = vrot.lane.b32.xlu0 %v14043_v31, %s13828_s9 }
 0xa7e   :  { %5483 = vrot.lane.b32.xlu1 %v14016_v23, %s13828_s9 }
 0xadf   :  { %v5017_v3 = vpop.xlane.xlu0 %5016 }
 0xae0   :  { %v5039_v13 = vsub.f32 %v5007_v48, %v5017_v3 }
 0xae2   :  { %v5047_v10 = vmul.f32 1.442695, %v5039_v13  ;;  %v5020_v17 = vpop.xlane.xlu1 %5019 }
 0xae3   :  { %v5040_v12 = vsub.f32 %v5008_v9, %v5020_v17  ;;  %v5023_v22 = vpop.xlane.xlu0 %5022 }
 0xae4   :  { %13553 = vpow2.f32 %v5047_v10  ;;  %v5041_v25 = vsub.f32 %v5009_v14, %v5023_v22 }
 0xae5   :  { %v5049_v16 = vmul.f32 1.442695, %v5040_v12 }
 0xae6   :  { %v5051_v11 = vmul.f32 1.442695, %v5041_v25 }
 0xae7   :  { %13555 = vpow2.f32 %v5049_v16  ;;  %v5026_v49 = vpop.xlane.xlu0 %5025  ;;  %v5777_v16 = vld [vmem:[#allocation7] sm:$0xff] }
 0xae8   :  { %13557 = vpow2.f32 %v5051_v11  ;;  %v5042_v18 = vsub.f32 %v5010_v2, %v5026_v49  ;;  %v5778_v11 = vld [vmem:[#allocation7 + $0x20] sm:$0xff] }
 0xae9   :  { %v13401_v49 = vpack.i.bf16 %v5778_v11, %v5777_v16 }
 0xaea   :  { %v5053_v33 = vmul.f32 1.442695, %v5042_v18  ;;  %v5032_v26 = vpop.xlane.xlu1 %5031  ;;  %v5780_v18 = vld [vmem:[#allocation7 + $0x60] sm:$0xff] }
 0xaeb   :  { %v5044_v31 = vsub.f32 %v5012_v53, %v5032_v26  ;;  %v5029_v36 = vpop.xlane.xlu0 %5028 }
 0xaec   :  { %13559 = vpow2.f32 %v5053_v33  ;;  %v5043_v23 = vsub.f32 %v5011_v50, %v5029_v36 }
 0xaed   :  { %v5057_v44 = vmul.f32 1.442695, %v5044_v31 }
 0xaee   :  { %v14634_v48 = vpop.eup %13553  ;;  %v5055_v51 = vmul.f32 1.442695, %v5043_v23  ;;  %v5038_v9 = vpop.xlane.xlu1 %5037 }
 0xaef   :  { %13561 = vpow2.f32 %v5057_v44  ;;  %v5046_v55 = vsub.f32 %v5014_v39, %v5038_v9  ;;  %v5035_v14 = vpop.xlane.xlu0 %5034  ;;  %v5063_v57 = vsel %vm1026_vm3, %v14634_v48, 0.0 }
 0xaf0   :  { %13563 = vpow2.f32 %v5055_v51  ;;  %v5045_v28 = vsub.f32 %v5013_v29, %v5035_v14  ;;  %5064 = vadd.xlane.f32.xlu0 %v5063_v57 }
 0xaf1   :  { %v14638_v2 = vpop.eup %13555  ;;  %v5061_v53 = vmul.f32 1.442695, %v5046_v55 }
 0xaf2   :  { %v14640_v63 = vpop.eup %13557  ;;  %v5059_v50 = vmul.f32 1.442695, %v5045_v28  ;;  %v5180_v7 = vpop.permute.xlu1 %5179  ;;  %v5066_v42 = vsel %vm1026_vm3, %v14638_v2, 0.0 }
 0xaf3   :  { %13565 = vpow2.f32 %v5061_v53  ;;  %v5104_v56 = vpop.permute.xlu0 %5103  ;;  %5067 = vadd.xlane.f32.xlu1 %v5066_v42  ;;  %12899 = vmatpush3.msra.mxu0 %v5180_v7  ;;  %v5069_v39 = vsel %vm1026_vm3, %v14640_v63, 0.0 }
 0xaf4   :  { %13567 = vpow2.f32 %v5059_v50  ;;  %5070 = vadd.xlane.f32.xlu0 %v5069_v39  ;;  %12894 = vmatpush3.msra.mxu1 %v5104_v56 }
 0xaf5   :  { %12903 = vmatprep.subr.mxu1 %v13821_v1  ;;  %12908 = vmatprep.subr.mxu0 %v13821_v1 }
 0xaf6   :  { %v14648_v29 = vpop.eup %13559 }
 0xaf7   :  { %v5072_v38 = vsel %vm1026_vm3, %v14648_v29, 0.0 }
 0xaf8   :  { %5073 = vadd.xlane.f32.xlu1 %v5072_v38 }
 0xaf9   :  { %v14652_v58 = vpop.eup %13561 }
 0xafa   :  { %v14654_v3 = vpop.eup %13563  ;;  %v5078_v13 = vsel %vm1026_vm3, %v14652_v58, 0.0 }
 0xafb   :  { %v5075_v10 = vsel %vm1026_vm3, %v14654_v3, 0.0 }
 0xafc   :  { %5079 = vadd.xlane.f32.xlu1 %v5078_v13  ;;  %5076 = vadd.xlane.f32.xlu0 %v5075_v10 }
 0xafd   :  { %v14660_v17 = vpop.eup %13565 }
 0xafe   :  { %v14662_v12 = vpop.eup %13567  ;;  %v5084_v22 = vsel %vm1026_vm3, %v14660_v17, 0.0 }
 0xaff   :  { %v5081_v25 = vsel %vm1026_vm3, %v14662_v12, 0.0 }
 0xb00   :  { %5085 = vadd.xlane.f32.xlu1 %v5084_v22  ;;  %5082 = vadd.xlane.f32.xlu0 %v5081_v25 }
 0xb11   :  { %5635 = vrot.lane.b32.xlu1 %v14036_v27, %s13828_s9  ;;  %v5779_v27 = vld [vmem:[#allocation7 + $0x40] sm:$0xff] }
 0xb15   :  { %3039 = vrot.lane.b32.xlu1 %v14419_v19, %s13814_s11  ;;  %v13406_v19 = vpack.i.bf16 %v5780_v18, %v5779_v27 }
 0xb16   :  { %5559 = vrot.lane.b32.xlu0 %v14063_v32, %s13828_s9  ;;  %v5256_v32 = vpop.permute.xlu1 %5255 }
 0xb19   :  { %3043 = vrot.lane.b32.xlu1 %v14421_v24, %s13814_s11  ;;  %v5408_v24 = vpop.permute.xlu0 %5407 }
 0xb1a   :  { %13402 = vrot.lane.b32.xlu0 %v13401_v49, %s13817_s18 }
 0xb1d   :  { %4379 = vrot.lane.b32.xlu1 %v14598_v54, %s13829_s10 }
 0xb1e   :  { %3041 = vrot.lane.b32.xlu0 %v14417_v6, %s13814_s11  ;;  %v5332_v6 = vpop.permute.xlu1 %5331 }
 0xb21   :  { %4383 = vrot.lane.b32.xlu1 %v14602_v46, %s13829_s10 }
 0xb22   :  { %3045 = vrot.lane.b32.xlu0 %v14423_v30, %s13814_s11  ;;  %v5484_v30 = vpop.permute.xlu1 %5483 }
 0xb25   :  { %13407 = vrot.lane.b32.xlu1 %v13406_v19, %s13817_s18 }
 0xb26   :  { %4381 = vrot.lane.b32.xlu0 %v14600_v37, %s13829_s10 }
 0xb29   :  { %3049 = vrot.lane.b32.xlu1 %v14425_v34, %s13814_s11 }
 0xb2a   :  { %4385 = vrot.lane.b32.xlu0 %v14604_v21, %s13829_s10 }
 0xb2d   :  { %3053 = vrot.lane.b32.xlu1 %v14438_v60, %s13814_s11 }
 0xb2e   :  { %3047 = vrot.lane.b32.xlu0 %v14427_v35, %s13814_s11 }
 0xb31   :  { %4389 = vrot.lane.b32.xlu1 %v14608_v5, %s13829_s10 }
 0xb32   :  { %3051 = vrot.lane.b32.xlu0 %v14429_v40, %s13814_s11 }
 0xb35   :  { %4393 = vrot.lane.b32.xlu1 %v14612_v8, %s13829_s10 }
 0xb36   :  { %4387 = vrot.lane.b32.xlu0 %v14606_v62, %s13829_s10 }
 0xb3a   :  { %4391 = vrot.lane.b32.xlu0 %v14610_v61, %s13829_s10 }
 0xb7d   :  { %v5065_v34 = vpop.xlane.xlu0 %5064 }
 0xb7e   :  { %13569 = vrcp.f32 %v5065_v34 }
 0xb80   :  { %v5068_v35 = vpop.xlane.xlu1 %5067 }
 0xb81   :  { %13571 = vrcp.f32 %v5068_v35  ;;  %v5071_v60 = vpop.xlane.xlu0 %5070  ;;  %v12128_v35 = vld [vmem:[%s15869_s3] ss:$0 sm:$0xff] }
 0xb82   :  { %13573 = vrcp.f32 %v5071_v60 }
 0xb85   :  { %v5074_v40 = vpop.xlane.xlu1 %5073 }
 0xb86   :  { %13575 = vrcp.f32 %v5074_v40 }
 0xb88   :  { %v13570_v54 = vpop.eup %13569 }
 0xb89   :  { %v5080_v37 = vpop.xlane.xlu1 %5079  ;;  %v5077_v46 = vpop.xlane.xlu0 %5076  ;;  %v5095_v21 = vmul.f32 %v13570_v54, %v14634_v48 }
 0xb8a   :  { %13577 = vrcp.f32 %v5080_v37 }
 0xb8b   :  { %v13572_v62 = vpop.eup %13571  ;;  %13579 = vrcp.f32 %v5077_v46  ;;  %12896 = vmatmul.mubr.msk.f32.vlgmr.msra.gmra.mrb[60].mxu1 %vm430_vm2, %v5095_v21 }
 0xb8c   :  { %v13574_v5 = vpop.eup %13573  ;;  %12904 = vmatpush3.msra.mxu1 %v5256_v32  ;;  %12905 = vmatprep.mubr.msk.f32.mxu1 %vm13820_vm1, %v13821_v1  ;;  %v5096_v61 = vmul.f32 %v13572_v62, %v14638_v2 }
 0xb8d   :  { %v5086_v8 = vpop.xlane.xlu1 %5085  ;;  %v5083_v33 = vpop.xlane.xlu0 %5082  ;;  %12913 = vmatprep.subr.mxu1 %v13821_v1  ;;  %v5097_v26 = vmul.f32 %v13574_v5, %v14640_v63 }
 0xb8e   :  { %13581 = vrcp.f32 %v5086_v8  ;;  %12901 = vmatmul.mubr.msk.f32.vlgmr.msra.gmra.mrb[62].mxu0 %vm430_vm2, %v5096_v61 }
 0xb8f   :  { %13583 = vrcp.f32 %v5083_v33  ;;  %12906 = vmatmul.mubr.msk.f32.vlgmr.msra.gmra.mrb[62].mxu1 %vm430_vm2, %v5097_v26  ;;  %12909 = vmatpush3.msra.mxu0 %v5332_v6 }
 0xb90   :  { %v13576_v31 = vpop.eup %13575  ;;  %12914 = vmatpush3.msra.mxu1 %v5408_v24  ;;  %12910 = vmatprep.mubr.msk.f32.mxu0 %vm13820_vm1, %v13821_v1 }
 0xb91   :  { %12918 = vmatprep.subr.mxu0 %v13821_v1  ;;  %v5098_v36 = vmul.f32 %v13576_v31, %v14648_v29  ;;  %12915 = vmatprep.mubr.msk.f32.mxu1 %vm13820_vm1, %v13821_v1  ;;  %v5636_v9 = vpop.permute.xlu1 %5635  ;;  %v5560_v14 = vpop.permute.xlu0 %5559 }
 0xb92   :  { %12923 = vmatprep.subr.mxu1 %v13821_v1 }
 0xb93   :  { %12911 = vmatmul.mubr.msk.f32.vlgmr.msra.gmra.mrb[64].mxu0 %vm430_vm2, %v5098_v36 }
 0xb94   :  { %v13578_v23 = vpop.eup %13577  ;;  %12919 = vmatpush3.msra.mxu0 %v5484_v30  ;;  %12920 = vmatprep.mubr.msk.f32.mxu0 %vm13820_vm1, %v13821_v1 }
 0xb95   :  { %v13580_v44 = vpop.eup %13579  ;;  %12928 = vmatprep.subr.mxu0 %v13821_v1  ;;  %v5100_v48 = vmul.f32 %v13578_v23, %v14652_v58  ;;  %v3040_v53 = vpop.permute.xlu1 %3039 }
 0xb96   :  { %v5099_v51 = vmul.f32 %v13580_v44, %v14654_v3  ;;  %v13403_v42 = vpop.permute.xlu0 %13402  ;;  %v3063_v26 = vadd.f32 %v3040_v53, %v13997_v15  ;;  %v1723_v44 = vadd.f32 %v14233_v41, %v13997_v15 }
 0xb97   :  { %12921 = vmatmul.mubr.msk.f32.vlgmr.msra.gmra.mrb[66].mxu0 %vm430_vm2, %v5100_v48  ;;  %v13405_v39 = vunpack.i.h.bf16 %v13403_v42  ;;  %v13404_v29 = vunpack.i.l.bf16 %v13403_v42 }
 0xb98   :  { %v13582_v55 = vpop.eup %13581  ;;  %12916 = vmatmul.mubr.msk.f32.vlgmr.msra.gmra.mrb[64].mxu1 %vm430_vm2, %v5099_v51  ;;  %12929 = vmatpush3.msra.mxu0 %v5636_v9  ;;  %v1724_v9 = vadd.f32 %v14235_v43, %v13997_v15 }
 0xb99   :  { %v13584_v57 = vpop.eup %13583  ;;  %12924 = vmatpush3.msra.mxu1 %v5560_v14  ;;  %12925 = vmatprep.mubr.msk.f32.mxu1 %vm13820_vm1, %v13821_v1  ;;  %v5102_v28 = vmul.f32 %v13582_v55, %v14660_v17  ;;  %v14738_v63 = vpop.permute.xlu1 %3043  ;;  %v13331_v3 = vpack.c.bf16 %v13405_v39, %v13404_v29  ;;  %v5751_v14 = vsel %vm430_vm2, %v1723_v44, %v3063_v26 }
 0xb9a   :  { %12930 = vmatprep.mubr.msk.f32.mxu0 %vm13820_vm1, %v13821_v1  ;;  %v5101_v2 = vmul.f32 %v13584_v57, %v14662_v12  ;;  %v3042_v60 = vpop.permute.xlu0 %3041  ;;  %v1725_v39 = vadd.f32 %v14239_v47, %v13997_v15 }
 0xb9b   :  { %12931 = vmatmul.mubr.msk.f32.vlgmr.msra.gmra.mrb[68].mxu0 %vm430_vm2, %v5102_v28  ;;  %13332 = vmatprep.subr.bf16.mxu1 %v13331_v3  ;;  %v3064_v36 = vadd.f32 %v3042_v60, %v13997_v15  ;;  %v3065_v28 = vadd.f32 %v14738_v63, %v13997_v15 }
 0xb9c   :  { %12926 = vmatmul.mubr.msk.f32.vlgmr.msra.gmra.mrb[66].mxu1 %vm430_vm2, %v5101_v2 }
 0xb9d   :  { %v4380_v50 = vpop.permute.xlu1 %4379  ;;  %13334 = vmatpush3.bf16.msra.mxu1 %v13331_v3  ;;  %v5752_v2 = vsel %vm430_vm2, %v1724_v9, %v3064_v36  ;;  %v5753_v3 = vsel %vm430_vm2, %v1725_v39, %v3065_v28  ;;  %v5938_v28 = vld [vmem:[#allocation7 + $0x68] sm:$0xff] }
 0xb9e   :  { %v3046_v40 = vpop.permute.xlu0 %3045  ;;  %v4403_v48 = vadd.f32 %v4380_v50, %v13997_v15  ;;  %v1726_v50 = vadd.f32 %v14237_v45, %v13997_v15 }
 0xb9f   :  { %v3066_v41 = vadd.f32 %v3046_v40, %v13997_v15 }
 0xba0   :  { %v5760_v43 = vsel %vm5759_vm4, %v5751_v14, %v4403_v48  ;;  %v5936_v14 = vld [vmem:[#allocation7 + $0x28] sm:$0xff] }
 0xba1   :  { %v14740_v7 = vpop.permute.xlu1 %4383 }
 0xba2   :  { %v4382_v54 = vpop.permute.xlu0 %4381  ;;  %v4405_v42 = vadd.f32 %v14740_v7, %v13997_v15  ;;  %v5754_v7 = vsel %vm430_vm2, %v1726_v50, %v3066_v41 }
 0xba3   :  { %v4404_v51 = vadd.f32 %v4382_v54, %v13997_v15 }
 0xba4   :  { %v5762_v47 = vsel %vm5759_vm4, %v5753_v3, %v4405_v42 }
 0xba5   :  { %v13408_v56 = vpop.permute.xlu1 %13407 }
 0xba6   :  { %v13410_v38 = vunpack.i.h.bf16 %v13408_v56  ;;  %v13409_v58 = vunpack.i.l.bf16 %v13408_v56  ;;  %v4386_v37 = vpop.permute.xlu0 %4385  ;;  %v5761_v56 = vsel %vm5759_vm4, %v5752_v2, %v4404_v51 }
 0xba7   :  { %v4406_v63 = vadd.f32 %v4386_v37, %v13997_v15  ;;  %v1730_v37 = vadd.f32 %v14243_v52, %v13997_v15 }
 0xba8   :  { %v13335_v13 = vpack.c.bf16 %v13410_v38, %v13409_v58 }
 0xba9   :  { %v3050_v46 = vpop.permute.xlu1 %3049 }
 0xbaa   :  { %13336 = vmatprep.subr.bf16.mxu1 %v13335_v13  ;;  %v3048_v21 = vpop.permute.xlu0 %3047 }
 0xbab   :  { %13338 = vmatpush3.bf16.msra.mxu1 %v13335_v13 }
 0xbac   :  { %12961 = vmatprep.subr.mxu1 %v13821_v1 }
 0xbad   :  { %v3054_v62 = vpop.permute.xlu1 %3053 }
 0xbae   :  { %v3052_v5 = vpop.permute.xlu0 %3051 }
 0xbb1   :  { %v4390_v61 = vpop.permute.xlu1 %4389 }
 0xbb2   :  { %v4388_v8 = vpop.permute.xlu0 %4387 }
 0xbb5   :  { %v4394_v33 = vpop.permute.xlu1 %4393 }
 0xbb6   :  { %v4392_v31 = vpop.permute.xlu0 %4391 }
 0xc5e   :  { %v5175_v10 = vpop.f32.mrb[60].mxu1 }
 0xc5f   :  { %5719 = vrot.lane.b32.xlu1 %v5175_v10, %s13830_s1  ;;  %v12897_v17 = vpop.f32.mrb[61].mxu1 }
 0xc60   :  { %v3068_v17 = vadd.f32 %v3050_v46, %v13997_v15 }
 0xc61   :  { %v5251_v12 = vpop.f32.mrb[62].mxu0 }
 0xc62   :  { %v5327_v22 = vpop.f32.mrb[62].mxu1  ;;  %v12902_v25 = vpop.f32.mrb[63].mxu0  ;;  %5721 = vrot.lane.b32.xlu0 %v5251_v12, %s13830_s1  ;;  %v3067_v12 = vadd.f32 %v3048_v21, %v13997_v15  ;;  %v4409_v21 = vadd.f32 %v4392_v31, %v13997_v15 }
 0xc63   :  { %v12907_v16 = vpop.f32.mrb[63].mxu1  ;;  %v5763_v25 = vsel %vm5759_vm4, %v5754_v7, %v4406_v63 }
 0xc64   :  { %v4408_v16 = vadd.f32 %v4390_v61, %v13997_v15 }
 0xc66   :  { %v5403_v11 = vpop.f32.mrb[64].mxu0  ;;  %5723 = vrot.lane.b32.xlu0 %v5327_v22, %s13830_s1 }
 0xc67   :  { %v12912_v49 = vpop.f32.mrb[65].mxu0  ;;  %5725 = vrot.lane.b32.xlu1 %v5403_v11, %s13830_s1 }
 0xc68   :  { %v1728_v49 = vadd.f32 %v14241_v20, %v13997_v15  ;;  %v3069_v20 = vadd.f32 %v3052_v5, %v13997_v15  ;;  %v1729_v5 = vadd.f32 %v14252_v4, %v13997_v15 }
 0xc6a   :  { %v5555_v27 = vpop.f32.mrb[66].mxu0  ;;  %v5757_v52 = vsel %vm430_vm2, %v1729_v5, %v3069_v20 }
 0xc6b   :  { %v5479_v18 = vpop.f32.mrb[64].mxu1  ;;  %v12922_v19 = vpop.f32.mrb[67].mxu0  ;;  %5729 = vrot.lane.b32.xlu1 %v5555_v27, %s13830_s1  ;;  %v1727_v27 = vadd.f32 %v14246_v59, %v13997_v15  ;;  %v4410_v59 = vadd.f32 %v4394_v33, %v13997_v15  ;;  %v5766_v48 = vsel %vm5759_vm4, %v5757_v52, %v4409_v21 }
 0xc6c   :  { %5727 = vrot.lane.b32.xlu0 %v5479_v18, %s13830_s1  ;;  %v12917_v32 = vpop.f32.mrb[65].mxu1  ;;  %v4407_v18 = vadd.f32 %v4388_v8, %v13997_v15 }
 0xc6e   :  { %v5707_v6 = vpop.f32.mrb[68].mxu0 }
 0xc6f   :  { %v5631_v24 = vpop.f32.mrb[66].mxu1  ;;  %v12932_v30 = vpop.f32.mrb[69].mxu0  ;;  %5733 = vrot.lane.b32.xlu1 %v5707_v6, %s13830_s1 }
 0xc70   :  { %5731 = vrot.lane.b32.xlu0 %v5631_v24, %s13830_s1  ;;  %v12927_v34 = vpop.f32.mrb[67].mxu1  ;;  %v5756_v24 = vsel %vm430_vm2, %v1728_v49, %v3068_v17  ;;  %v5755_v30 = vsel %vm430_vm2, %v1727_v27, %v3067_v12 }
 0xc71   :  { %v3070_v34 = vadd.f32 %v3054_v62, %v13997_v15  ;;  %v5765_v40 = vsel %vm5759_vm4, %v5756_v24, %v4408_v16  ;;  %v5764_v46 = vsel %vm5759_vm4, %v5755_v30, %v4407_v18  ;;  %v12133_v24 = vld [vmem:[%s15869_s3 + $0x1] ss:$0 sm:$0xff] }
 0xc73   :  { %v5758_v33 = vsel %vm430_vm2, %v1730_v37, %v3070_v34 }
 0xc74   :  { %5815 = vrot.lane.b32.xlu0 %v12128_v35, %s13817_s18  ;;  %v5767_v44 = vsel %vm5759_vm4, %v5758_v33, %v4410_v59 }
 0xcd1   :  { %v5720_v23 = vpop.permute.xlu1 %5719 }
 0xcd2   :  { %v5743_v55 = vadd.f32 %v5720_v23, %v13997_v15 }
 0xcd4   :  { %v5722_v57 = vpop.permute.xlu0 %5721  ;;  %v14780_v29 = vsel %vm5768_vm5, %v5760_v43, %v5743_v55  ;;  %v5935_v55 = vld [vmem:[#allocation7 + $0x8] sm:$0xff] }
 0xcd5   :  { %v5744_v53 = vadd.f32 %v5722_v57, %v13997_v15  ;;  %v13339_v57 = vpack.c.bf16 %v5936_v14, %v5935_v55 }
 0xcd7   :  { %v14783_v38 = vsel %vm5768_vm5, %v5761_v56, %v5744_v53  ;;  %13340 = vmatprep.subr.bf16.mxu0 %v13339_v57 }
 0xcd8   :  { %v5795_v45 = vcombine.low %v14780_v29, %v14783_v38  ;;  %v5724_v58 = vpop.permute.xlu0 %5723  ;;  %13342 = vmatpush3.bf16.msra.mxu0 %v13339_v57 }
 0xcd9   :  { %v5726_v13 = vpop.permute.xlu1 %5725  ;;  %v5745_v10 = vadd.f32 %v5724_v58, %v13997_v15 }
 0xcda   :  { %v5746_v22 = vadd.f32 %v5726_v13, %v13997_v15  ;;  %12941 = vmatprep.mubr.msk.f32.mxu1 %vm68_vm0, %v5795_v45 }
 0xcdb   :  { %v5771_v11 = vsel %vm5768_vm5, %v5762_v47, %v5745_v10 }
 0xcdc   :  { %v5772_v19 = vsel %vm5768_vm5, %v5763_v25, %v5746_v22 }
 0xcdd   :  { %v5796_v32 = vcombine.low %v5771_v11, %v5772_v19  ;;  %v5730_v6 = vpop.permute.xlu1 %5729 }
 0xcde   :  { %v5748_v35 = vadd.f32 %v5730_v6, %v13997_v15  ;;  %v5728_v60 = vpop.permute.xlu0 %5727 }
 0xcdf   :  { %v5747_v54 = vadd.f32 %v5728_v60, %v13997_v15  ;;  %12942 = vmatmul.mubr.msk.f32.vlgmr.msra.gmra.mrb[68].mxu1 %vm68_vm0, %v5796_v32 }
 0xce0   :  { %v5774_v62 = vsel %vm5768_vm5, %v5765_v40, %v5748_v35 }
 0xce1   :  { %v5773_v61 = vsel %vm5768_vm5, %v5764_v46, %v5747_v54  ;;  %v5734_v8 = vpop.permute.xlu1 %5733 }
 0xce2   :  { %v5797_v26 = vcombine.low %v5773_v61, %v5774_v62  ;;  %v5750_v36 = vadd.f32 %v5734_v8, %v13997_v15  ;;  %v5732_v23 = vpop.permute.xlu0 %5731 }
 0xce3   :  { %v5749_v31 = vadd.f32 %v5732_v23, %v13997_v15  ;;  %v5937_v15 = vld [vmem:[#allocation7 + $0x48] sm:$0xff] }
 0xce4   :  { %v5776_v51 = vsel %vm5768_vm5, %v5767_v44, %v5750_v36  ;;  %12944 = vmatprep.mubr.msk.f32.mxu1 %vm68_vm0, %v5797_v26  ;;  %v13343_v2 = vpack.c.bf16 %v5938_v28, %v5937_v15 }
 0xce5   :  { %v5775_v4 = vsel %vm5768_vm5, %v5766_v48, %v5749_v31 }
 0xce6   :  { %v5798_v9 = vcombine.low %v5775_v4, %v5776_v51  ;;  %13344 = vmatprep.subr.bf16.mxu0 %v13343_v2  ;;  %v5816_v41 = vpop.permute.xlu0 %5815 }
 0xce7   :  { %13346 = vmatpush3.bf16.msra.mxu0 %v13343_v2 }
 0xce8   :  { %12945 = vmatmul.mubr.msk.f32.gmra.mrb[70].mxu1 %vm68_vm0, %v5798_v9  ;;  %12966 = vmatprep.subr.mxu0 %v13821_v1 }
 0xce9   :  { %12963 = vmatprep.mubr.msk.f32.mxu1 %vm13820_vm1, %v13821_v1 }
 0xdb2   :  { %v12943_v53 = vpop.f32.mrb[68].mxu1 }
 0xdb3   :  { %v5898_v50 = vadd.f32 %v12943_v53, %v5816_v41  ;;  %v5892_v43 = vpop.f32.mrb[69].mxu1 }
 0xdb4   :  { %v5893_v42 = vadd.f32 %v5892_v43, %v5816_v41 }
 0xdb5   :  { %v5912_v56 = vmax.f32 %v5898_v50, 0.0 }
 0xdb6   :  { %v5911_v39 = vmax.f32 %v5893_v42, 0.0 }
 0xdb7   :  { %v5920_v63 = vcombine.high %v5912_v56, %v5912_v56  ;;  %v5929_v13 = vadd.f32 %v5912_v56, %v5771_v11 }
 0xdb8   :  { %v5919_v45 = vcombine.high %v5911_v39, %v5911_v39  ;;  %v5927_v3 = vadd.f32 %v5911_v39, %v14780_v29 }
 0xdb9   :  { %v5930_v58 = vadd.f32 %v5920_v63, %v5772_v19 }
 0xdba   :  { %v5928_v7 = vadd.f32 %v5919_v45, %v14783_v38 }
 0xdbb   :  { %v12946_v10 = vpop.f32.mrb[70].mxu1  ;;  %v5955_v22 = vcombine.low %v5929_v13, %v5930_v58 }
 0xdbc   :  { %v5954_v47 = vcombine.low %v5927_v3, %v5928_v7  ;;  %v5908_v17 = vadd.f32 %v12946_v10, %v5816_v41  ;;  %v5902_v12 = vpop.f32.mrb[71].mxu1 }
 0xdbd   :  { %v5903_v25 = vadd.f32 %v5902_v12, %v5816_v41 }
 0xdbe   :  { %v5914_v16 = vmax.f32 %v5908_v17, 0.0  ;;  %12955 = vmatprep.mubr.msk.f32.mxu0 %vm68_vm0, %v5954_v47 }
 0xdbf   :  { %v5913_v49 = vmax.f32 %v5903_v25, 0.0  ;;  %12956 = vmatmul.mubr.msk.f32.vlgmr.msra.gmra.mrb[70].mxu0 %vm68_vm0, %v5955_v22 }
 0xdc0   :  { %v5922_v27 = vcombine.high %v5914_v16, %v5914_v16  ;;  %v5933_v6 = vadd.f32 %v5914_v16, %v5775_v4 }
 0xdc1   :  { %v5921_v18 = vcombine.high %v5913_v49, %v5913_v49  ;;  %v5931_v32 = vadd.f32 %v5913_v49, %v5773_v61 }
 0xdc2   :  { %v5934_v19 = vadd.f32 %v5922_v27, %v5776_v51 }
 0xdc3   :  { %v5932_v29 = vadd.f32 %v5921_v18, %v5774_v62 }
 0xdc4   :  { %v5957_v11 = vcombine.low %v5933_v6, %v5934_v19 }
 0xdc5   :  { %v5956_v38 = vcombine.low %v5931_v32, %v5932_v29 }
 0xdc7   :  { %12958 = vmatprep.mubr.msk.f32.mxu0 %vm68_vm0, %v5956_v38 }
 0xdc8   :  { %12959 = vmatmul.mubr.msk.f32.gmra.mrb[72].mxu0 %vm68_vm0, %v5957_v11 }
 0xdc9   :  { %12968 = vmatprep.mubr.msk.f32.mxu0 %vm13820_vm1, %v13821_v1 }
 0xe92   :  { %v12957_v30 = vpop.f32.mrb[70].mxu0 }
 0xe93   :  { %v6032_v34 = vpop.f32.mrb[71].mxu0  ;;  %v14847_v60 = vadd.f32 %v12957_v30, %v12133_v24 }
 0xe94   :  { %v14845_v35 = vadd.f32 %v12133_v24, %v6032_v34 }
 0xe95   :  { %v14861_v40 = vcombine.high %v14847_v60, %v14847_v60 }
 0xe96   :  { %6063 = vrot.lane.b32.xlu1 %v14845_v35, %s13822_s29  ;;  %v14853_v20 = vcombine.high %v14845_v35, %v14845_v35 }
 0xe98   :  { %6139 = vrot.lane.b32.xlu0 %v14853_v20, %s13822_s29 }
 0xe9a   :  { %6215 = vrot.lane.b32.xlu1 %v14847_v60, %s13822_s29 }
 0xe9b   :  { %v12960_v59 = vpop.f32.mrb[72].mxu0 }
 0xe9c   :  { %v6042_v54 = vpop.f32.mrb[73].mxu0  ;;  %6291 = vrot.lane.b32.xlu0 %v14861_v40, %s13822_s29  ;;  %v14867_v46 = vadd.f32 %v12960_v59, %v12133_v24 }
 0xe9d   :  { %v14865_v37 = vadd.f32 %v12133_v24, %v6042_v54 }
 0xe9e   :  { %v14881_v62 = vcombine.high %v14867_v46, %v14867_v46 }
 0xe9f   :  { %6367 = vrot.lane.b32.xlu1 %v14865_v37, %s13822_s29  ;;  %v14873_v21 = vcombine.high %v14865_v37, %v14865_v37 }
 0xea1   :  { %6443 = vrot.lane.b32.xlu0 %v14873_v21, %s13822_s29 }
 0xea3   :  { %6519 = vrot.lane.b32.xlu1 %v14867_v46, %s13822_s29 }
 0xea5   :  { %6595 = vrot.lane.b32.xlu0 %v14881_v62, %s13822_s29 }
 0xf08   :  { %v6064_v5 = vpop.permute.xlu1 %6063 }
 0xf09   :  { %12962 = vmatpush3.xpose.msk.msra.mxu1 %vm430_vm2, %v6064_v5 }
 0xf0a   :  { %v6140_v61 = vpop.permute.xlu0 %6139  ;;  %12971 = vmatprep.subr.mxu1 %v13821_v1 }
 0xf0b   :  { %12967 = vmatpush3.xpose.msk.msra.mxu0 %vm430_vm2, %v6140_v61 }
 0xf0c   :  { %12964 = vmatmul.mubr.msk.f32.vlgmr.msra.gmra.mrb[72].mxu1 %vm430_vm2, %v14845_v35  ;;  %v6216_v8 = vpop.permute.xlu1 %6215  ;;  %12976 = vmatprep.subr.mxu0 %v13821_v1 }
 0xf0d   :  { %12972 = vmatpush3.xpose.msk.msra.mxu1 %vm430_vm2, %v6216_v8  ;;  %12973 = vmatprep.mubr.msk.f32.mxu1 %vm13820_vm1, %v13821_v1 }
 0xf0e   :  { %12969 = vmatmul.mubr.msk.f32.vlgmr.msra.gmra.mrb[74].mxu0 %vm430_vm2, %v14853_v20  ;;  %v6292_v33 = vpop.permute.xlu0 %6291  ;;  %12981 = vmatprep.subr.mxu1 %v13821_v1 }
 0xf0f   :  { %12977 = vmatpush3.xpose.msk.msra.mxu0 %vm430_vm2, %v6292_v33  ;;  %12978 = vmatprep.mubr.msk.f32.mxu0 %vm13820_vm1, %v13821_v1 }
 0xf10   :  { %12974 = vmatmul.mubr.msk.f32.vlgmr.msra.gmra.mrb[74].mxu1 %vm430_vm2, %v14847_v60  ;;  %12986 = vmatprep.subr.mxu0 %v13821_v1 }
 0xf11   :  { %v6368_v26 = vpop.permute.xlu1 %6367  ;;  %12983 = vmatprep.mubr.msk.f32.mxu1 %vm13820_vm1, %v13821_v1 }
 0xf12   :  { %12982 = vmatpush3.xpose.msk.msra.mxu1 %vm430_vm2, %v6368_v26  ;;  %12979 = vmatmul.mubr.msk.f32.vlgmr.msra.gmra.mrb[76].mxu0 %vm430_vm2, %v14861_v40 }
 0xf13   :  { %v6444_v36 = vpop.permute.xlu0 %6443  ;;  %12991 = vmatprep.subr.mxu1 %v13821_v1  ;;  %12988 = vmatprep.mubr.msk.f32.mxu0 %vm13820_vm1, %v13821_v1 }
 0xf14   :  { %12987 = vmatpush3.xpose.msk.msra.mxu0 %vm430_vm2, %v6444_v36 }
 0xf15   :  { %12984 = vmatmul.mubr.msk.f32.vlgmr.msra.gmra.mrb[76].mxu1 %vm430_vm2, %v14865_v37  ;;  %v6520_v23 = vpop.permute.xlu1 %6519  ;;  %12996 = vmatprep.subr.mxu0 %v13821_v1 }
 0xf16   :  { %12992 = vmatpush3.xpose.msk.msra.mxu1 %vm430_vm2, %v6520_v23  ;;  %12993 = vmatprep.mubr.msk.f32.mxu1 %vm13820_vm1, %v13821_v1 }
 0xf17   :  { %12989 = vmatmul.mubr.msk.f32.vlgmr.msra.gmra.mrb[78].mxu0 %vm430_vm2, %v14873_v21  ;;  %v6596_v52 = vpop.permute.xlu0 %6595  ;;  %13001 = vmatprep.subr.mxu1 %v13821_v1 }
 0xf18   :  { %12997 = vmatpush3.xpose.msk.msra.mxu0 %vm430_vm2, %v6596_v52  ;;  %12998 = vmatprep.mubr.msk.f32.mxu0 %vm13820_vm1, %v13821_v1 }
 0xf19   :  { %12994 = vmatmul.mubr.msk.f32.vlgmr.msra.gmra.mrb[78].mxu1 %vm430_vm2, %v14867_v46  ;;  %13006 = vmatprep.subr.mxu0 %v13821_v1 }
 0xf1a   :  { %13003 = vmatprep.mubr.msk.f32.mxu1 %vm13820_vm1, %v13821_v1 }
 0xf1b   :  { %12999 = vmatmul.mubr.msk.f32.vlgmr.msra.gmra.mrb[80].mxu0 %vm430_vm2, %v14881_v62 }
 0xf1c   :  { %13008 = vmatprep.mubr.msk.f32.mxu0 %vm13820_vm1, %v13821_v1 }
 0xfdf   :  { %v6135_v44 = vpop.f32.mrb[72].mxu1 }
 0xfe0   :  { %v6671_v31 = vmul.f32 0.17677669, %v6135_v44  ;;  %v12965_v48 = vpop.f32.mrb[73].mxu1 }
 0xfe1   :  { %v6211_v51 = vpop.f32.mrb[74].mxu0 }
 0xfe2   :  { %v6672_v4 = vmul.f32 0.17677669, %v6211_v51  ;;  %v12970_v9 = vpop.f32.mrb[75].mxu0  ;;  %v6680_v55 = vsel %vm6679_vm6, %v6671_v31, -inf }
 0xfe3   :  { %6681 = vmax.xlane.f32.xlu1 %v6680_v55  ;;  %v6287_v14 = vpop.f32.mrb[74].mxu1 }
 0xfe4   :  { %v6673_v57 = vmul.f32 0.17677669, %v6287_v14  ;;  %v12975_v15 = vpop.f32.mrb[75].mxu1  ;;  %v6683_v28 = vsel %vm6679_vm6, %v6672_v4, -inf }
 0xfe5   :  { %6684 = vmax.xlane.f32.xlu0 %v6683_v28  ;;  %v6363_v2 = vpop.f32.mrb[76].mxu0 }
 0xfe6   :  { %v12980_v41 = vpop.f32.mrb[77].mxu0  ;;  %v6674_v53 = vmul.f32 0.17677669, %v6363_v2  ;;  %v6686_v43 = vsel %vm6679_vm6, %v6673_v57, -inf }
 0xfe8   :  { %v6439_v50 = vpop.f32.mrb[76].mxu1  ;;  %v6689_v7 = vsel %vm6679_vm6, %v6674_v53, -inf }
 0xfe9   :  { %v6675_v42 = vmul.f32 0.17677669, %v6439_v50  ;;  %v12985_v56 = vpop.f32.mrb[77].mxu1  ;;  %6687 = vmax.xlane.f32.xlu0 %v6686_v43 }
 0xfea   :  { %v6515_v39 = vpop.f32.mrb[78].mxu0 }
 0xfeb   :  { %v12990_v63 = vpop.f32.mrb[79].mxu0  ;;  %v6692_v45 = vsel %vm6679_vm6, %v6675_v42, -inf  ;;  %v6676_v58 = vmul.f32 0.17677669, %v6515_v39 }
 0xfec   :  { %6693 = vmax.xlane.f32.xlu1 %v6692_v45  ;;  %v6591_v3 = vpop.f32.mrb[78].mxu1 }
 0xfed   :  { %v6677_v13 = vmul.f32 0.17677669, %v6591_v3  ;;  %v12995_v10 = vpop.f32.mrb[79].mxu1  ;;  %6690 = vmax.xlane.f32.xlu0 %v6689_v7  ;;  %v6695_v25 = vsel %vm6679_vm6, %v6676_v58, -inf }
 0xfee   :  { %v6667_v47 = vpop.f32.mrb[80].mxu0 }
 0xfef   :  { %v13000_v17 = vpop.f32.mrb[81].mxu0  ;;  %v6698_v12 = vsel %vm6679_vm6, %v6677_v13, -inf  ;;  %v6678_v22 = vmul.f32 0.17677669, %v6667_v47 }
 0xff0   :  { %6699 = vmax.xlane.f32.xlu1 %v6698_v12 }
 0xff1   :  { %6696 = vmax.xlane.f32.xlu0 %v6695_v25  ;;  %v6701_v16 = vsel %vm6679_vm6, %v6678_v22, -inf }
 0xff5   :  { %6702 = vmax.xlane.f32.xlu0 %v6701_v16 }
0x1001   :  { %6768 = vrot.lane.b32.xlu1 %v14845_v35, %s13818_s2 }
0x1005   :  { %6924 = vrot.lane.b32.xlu1 %v14847_v60, %s13818_s2 }
0x1009   :  { %7001 = vrot.lane.b32.xlu1 %v14861_v40, %s13818_s2 }
0x100b   :  { %6847 = vrot.lane.b32.xlu0 %v14853_v20, %s13818_s2 }
0x100d   :  { %7078 = vrot.lane.b32.xlu1 %v14865_v37, %s13818_s2 }
0x100f   :  { %7155 = vrot.lane.b32.xlu0 %v14873_v21, %s13818_s2 }
0x1011   :  { %7232 = vrot.lane.b32.xlu1 %v14867_v46, %s13818_s2 }
0x1013   :  { %7309 = vrot.lane.b32.xlu0 %v14881_v62, %s13818_s2 }
0x1015   :  { %7396 = vrot.lane.b32.xlu1 %v14845_v35, %s13824_s5 }
0x1017   :  { %7474 = vrot.lane.b32.xlu0 %v14853_v20, %s13824_s5 }
0x1019   :  { %7394 = vrot.lane.b32.xlu1 %v14845_v35, %s13823_s30 }
0x101b   :  { %7472 = vrot.lane.b32.xlu0 %v14853_v20, %s13823_s30 }
0x101d   :  { %7552 = vrot.lane.b32.xlu1 %v14847_v60, %s13824_s5 }
0x101f   :  { %7630 = vrot.lane.b32.xlu0 %v14861_v40, %s13824_s5 }
0x1021   :  { %7550 = vrot.lane.b32.xlu1 %v14847_v60, %s13823_s30 }
0x1070   :  { %v6682_v49 = vpop.xlane.xlu1 %6681 }
0x1071   :  { %v6704_v27 = vsub.f32 %v6671_v31, %v6682_v49 }
0x1072   :  { %v6685_v18 = vpop.xlane.xlu0 %6684 }
0x1073   :  { %v6712_v19 = vmul.f32 1.442695, %v6704_v27  ;;  %v6705_v32 = vsub.f32 %v6672_v4, %v6685_v18 }
0x1075   :  { %13585 = vpow2.f32 %v6712_v19  ;;  %v6714_v29 = vmul.f32 1.442695, %v6705_v32 }
0x1076   :  { %v6688_v6 = vpop.xlane.xlu0 %6687 }
0x1077   :  { %13587 = vpow2.f32 %v6714_v29  ;;  %v6706_v38 = vsub.f32 %v6673_v57, %v6688_v6 }
0x1079   :  { %v6716_v11 = vmul.f32 1.442695, %v6706_v38  ;;  %v6694_v24 = vpop.xlane.xlu1 %6693 }
0x107a   :  { %v6708_v30 = vsub.f32 %v6675_v42, %v6694_v24  ;;  %v6691_v34 = vpop.xlane.xlu0 %6690 }
0x107b   :  { %13589 = vpow2.f32 %v6716_v11  ;;  %v6707_v59 = vsub.f32 %v6674_v53, %v6691_v34 }
0x107c   :  { %v6720_v54 = vmul.f32 1.442695, %v6708_v30 }
0x107d   :  { %v6718_v5 = vmul.f32 1.442695, %v6707_v59  ;;  %v6700_v61 = vpop.xlane.xlu1 %6699 }
0x107e   :  { %13591 = vpow2.f32 %v6720_v54  ;;  %v6710_v8 = vsub.f32 %v6677_v13, %v6700_v61  ;;  %v6697_v33 = vpop.xlane.xlu0 %6696 }
0x107f   :  { %v14971_v26 = vpop.eup %13585  ;;  %13593 = vpow2.f32 %v6718_v5  ;;  %v6709_v36 = vsub.f32 %v6676_v58, %v6697_v33 }
0x1080   :  { %v6724_v23 = vmul.f32 1.442695, %v6710_v8  ;;  %v6728_v52 = vsel %vm6679_vm6, %v14971_v26, 0.0 }
0x1081   :  { %v14975_v44 = vpop.eup %13587  ;;  %v6722_v31 = vmul.f32 1.442695, %v6709_v36  ;;  %v6769_v48 = vpop.permute.xlu1 %6768  ;;  %6729 = vadd.xlane.f32.xlu1 %v6728_v52 }
0x1082   :  { %13595 = vpow2.f32 %v6724_v23  ;;  %13002 = vmatpush3.msk.msra.mxu1 %vm6774_vm7, %v6769_v48  ;;  %v6703_v51 = vpop.xlane.xlu0 %6702  ;;  %v6731_v4 = vsel %vm6679_vm6, %v14975_v44, 0.0 }
0x1083   :  { %13597 = vpow2.f32 %v6722_v31  ;;  %v6711_v9 = vsub.f32 %v6678_v22, %v6703_v51  ;;  %6732 = vadd.xlane.f32.xlu0 %v6731_v4  ;;  %13011 = vmatprep.subr.mxu1 %v13821_v1 }
0x1085   :  { %v14981_v55 = vpop.eup %13589  ;;  %v6726_v14 = vmul.f32 1.442695, %v6711_v9  ;;  %v6925_v45 = vpop.permute.xlu1 %6924 }
0x1086   :  { %v6848_v57 = vpop.permute.xlu0 %6847  ;;  %v6734_v15 = vsel %vm6679_vm6, %v14981_v55, 0.0 }
0x1087   :  { %13599 = vpow2.f32 %v6726_v14  ;;  %6735 = vadd.xlane.f32.xlu1 %v6734_v15  ;;  %13007 = vmatpush3.msk.msra.mxu0 %vm6774_vm7, %v6848_v57 }
0x1088   :  { %v14986_v28 = vpop.eup %13591  ;;  %13016 = vmatprep.subr.mxu0 %v13821_v1 }
0x1089   :  { %v14989_v2 = vpop.eup %13593  ;;  %v6740_v41 = vsel %vm6679_vm6, %v14986_v28, 0.0  ;;  %v7002_v58 = vpop.permute.xlu1 %7001 }
0x108a   :  { %v6737_v53 = vsel %vm6679_vm6, %v14989_v2, 0.0  ;;  %v7156_v13 = vpop.permute.xlu0 %7155 }
0x108b   :  { %6741 = vadd.xlane.f32.xlu1 %v6740_v41  ;;  %6738 = vadd.xlane.f32.xlu0 %v6737_v53 }
0x108c   :  { %v14995_v50 = vpop.eup %13595 }
0x108d   :  { %v14997_v43 = vpop.eup %13597  ;;  %v6746_v42 = vsel %vm6679_vm6, %v14995_v50, 0.0  ;;  %v7079_v3 = vpop.permute.xlu1 %7078 }
0x108e   :  { %v6743_v56 = vsel %vm6679_vm6, %v14997_v43, 0.0  ;;  %v15027_v47 = vpop.permute.xlu0 %7309 }
0x108f   :  { %6747 = vadd.xlane.f32.xlu1 %v6746_v42  ;;  %6744 = vadd.xlane.f32.xlu0 %v6743_v56 }
0x1091   :  { %v15003_v39 = vpop.eup %13599  ;;  %v7233_v7 = vpop.permute.xlu1 %7232 }
0x1092   :  { %v6749_v63 = vsel %vm6679_vm6, %v15003_v39, 0.0  ;;  %v15031_v12 = vpop.permute.xlu0 %7474 }
0x1093   :  { %6750 = vadd.xlane.f32.xlu0 %v6749_v63 }
0x1095   :  { %v15025_v10 = vpop.permute.xlu1 %7396 }
0x1096   :  { %v15035_v25 = vpop.permute.xlu0 %7472 }
0x1099   :  { %v15029_v17 = vpop.permute.xlu1 %7394 }
0x109a   :  { %v15039_v49 = vpop.permute.xlu0 %7630 }
0x109d   :  { %v15033_v22 = vpop.permute.xlu1 %7552 }
0x10a0   :  { %7708 = vrot.lane.b32.xlu1 %v14865_v37, %s13824_s5 }
0x10a1   :  { %v15037_v16 = vpop.permute.xlu1 %7550 }
0x10a4   :  { %7706 = vrot.lane.b32.xlu1 %v14865_v37, %s13823_s30 }
0x10a8   :  { %7864 = vrot.lane.b32.xlu1 %v14867_v46, %s13824_s5 }
0x10a9   :  { %7628 = vrot.lane.b32.xlu0 %v14861_v40, %s13823_s30 }
0x10ac   :  { %7862 = vrot.lane.b32.xlu1 %v14867_v46, %s13823_s30 }
0x10ad   :  { %7786 = vrot.lane.b32.xlu0 %v14873_v21, %s13824_s5 }
0x10b1   :  { %7784 = vrot.lane.b32.xlu0 %v14873_v21, %s13823_s30 }
0x10b5   :  { %7942 = vrot.lane.b32.xlu0 %v14881_v62, %s13824_s5 }
0x10b9   :  { %7940 = vrot.lane.b32.xlu0 %v14881_v62, %s13823_s30 }
0x110e   :  { %v6730_v27 = vpop.xlane.xlu1 %6729 }
0x110f   :  { %13601 = vrcp.f32 %v6730_v27 }
0x1110   :  { %v6733_v18 = vpop.xlane.xlu0 %6732 }
0x1111   :  { %13603 = vrcp.f32 %v6733_v18 }
0x1114   :  { %v6736_v19 = vpop.xlane.xlu1 %6735 }
0x1115   :  { %13605 = vrcp.f32 %v6736_v19 }
0x1118   :  { %v6742_v32 = vpop.xlane.xlu1 %6741  ;;  %v6739_v29 = vpop.xlane.xlu0 %6738 }
0x1119   :  { %v13602_v6 = vpop.eup %13601  ;;  %13607 = vrcp.f32 %v6742_v32 }
0x111a   :  { %13609 = vrcp.f32 %v6739_v29  ;;  %v6760_v38 = vmul.f32 %v13602_v6, %v14971_v26 }
0x111b   :  { %v13604_v11 = vpop.eup %13603 }
0x111c   :  { %13004 = vmatmul.mubr.msk.f32.vlgmr.msra.gmra.mrb[80].mxu1 %vm6770_vm8, %v6760_v38  ;;  %v6748_v24 = vpop.xlane.xlu1 %6747  ;;  %v6745_v30 = vpop.xlane.xlu0 %6744  ;;  %v6761_v34 = vmul.f32 %v13604_v11, %v14975_v44 }
0x111d   :  { %13012 = vmatpush3.msk.msra.mxu1 %vm6774_vm7, %v6925_v45  ;;  %13611 = vrcp.f32 %v6748_v24  ;;  %13013 = vmatprep.mubr.msk.f32.mxu1 %vm13820_vm1, %v13821_v1 }
0x111e   :  { %13613 = vrcp.f32 %v6745_v30  ;;  %13009 = vmatmul.mubr.msk.f32.vlgmr.msra.gmra.mrb[82].mxu0 %vm6770_vm8, %v6761_v34  ;;  %13021 = vmatprep.subr.mxu1 %v13821_v1 }
0x111f   :  { %v13606_v59 = vpop.eup %13605  ;;  %13017 = vmatpush3.msk.msra.mxu0 %vm6774_vm7, %v7002_v58  ;;  %13018 = vmatprep.mubr.msk.f32.mxu0 %vm13820_vm1, %v13821_v1 }
0x1120   :  { %v6751_v54 = vpop.xlane.xlu0 %6750  ;;  %v6762_v5 = vmul.f32 %v13606_v59, %v14981_v55  ;;  %13026 = vmatprep.subr.mxu0 %v13821_v1  ;;  %v7709_v48 = vpop.permute.xlu1 %7708 }
0x1121   :  { %13615 = vrcp.f32 %v6751_v54 }
0x1122   :  { %13014 = vmatmul.mubr.msk.f32.vlgmr.msra.gmra.mrb[82].mxu1 %vm6770_vm8, %v6762_v5 }
0x1123   :  { %v13608_v61 = vpop.eup %13607  ;;  %13022 = vmatpush3.msk.msra.mxu1 %vm6774_vm7, %v7079_v3  ;;  %13023 = vmatprep.mubr.msk.f32.mxu1 %vm13820_vm1, %v13821_v1 }
0x1124   :  { %v13610_v8 = vpop.eup %13609  ;;  %13031 = vmatprep.subr.mxu1 %v13821_v1  ;;  %v6764_v33 = vmul.f32 %v13608_v61, %v14986_v28  ;;  %v7629_v44 = vpop.permute.xlu0 %7628 }
0x1125   :  { %v6763_v26 = vmul.f32 %v13610_v8, %v14989_v2  ;;  %v7707_v55 = vpop.permute.xlu1 %7706 }
0x1126   :  { %13024 = vmatmul.mubr.msk.f32.vlgmr.msra.gmra.mrb[84].mxu1 %vm6770_vm8, %v6764_v33 }
0x1127   :  { %v13612_v36 = vpop.eup %13611  ;;  %13019 = vmatmul.mubr.msk.f32.vlgmr.msra.gmra.mrb[84].mxu0 %vm6770_vm8, %v6763_v26  ;;  %13032 = vmatpush3.msk.msra.mxu1 %vm6774_vm7, %v7233_v7 }
0x1128   :  { %v13614_v23 = vpop.eup %13613  ;;  %13027 = vmatpush3.msk.msra.mxu0 %vm6774_vm7, %v7156_v13  ;;  %13028 = vmatprep.mubr.msk.f32.mxu0 %vm13820_vm1, %v13821_v1  ;;  %v6766_v52 = vmul.f32 %v13612_v36, %v14995_v50  ;;  %v7787_v9 = vpop.permute.xlu0 %7786 }
0x1129   :  { %13033 = vmatprep.mubr.msk.f32.mxu1 %vm13820_vm1, %v13821_v1  ;;  %13036 = vmatprep.subr.mxu0 %v13821_v1  ;;  %v6765_v31 = vmul.f32 %v13614_v23, %v14997_v43  ;;  %v7865_v57 = vpop.permute.xlu1 %7864 }
0x112a   :  { %13034 = vmatmul.mubr.msk.f32.vlgmr.msra.gmra.mrb[86].mxu1 %vm6770_vm8, %v6766_v52  ;;  %13041 = vmatprep.subr.mxu1 %v13821_v1 }
0x112b   :  { %v13616_v51 = vpop.eup %13615  ;;  %13029 = vmatmul.mubr.msk.f32.vlgmr.msra.gmra.mrb[86].mxu0 %vm6770_vm8, %v6765_v31  ;;  %13043 = vmatprep.mubr.msk.f32.mxu1 %vm13820_vm1, %v13821_v1 }
0x112c   :  { %13037 = vmatpush3.msk.msra.mxu0 %vm6774_vm7, %v15027_v47  ;;  %13038 = vmatprep.mubr.msk.f32.mxu0 %vm13820_vm1, %v13821_v1  ;;  %v6767_v4 = vmul.f32 %v13616_v51, %v15003_v39  ;;  %v7785_v14 = vpop.permute.xlu0 %7784 }
0x112d   :  { %13046 = vmatprep.subr.mxu0 %v13821_v1  ;;  %v7863_v28 = vpop.permute.xlu1 %7862 }
0x112e   :  { %13042 = vmatpush3.xpose.msk.msra.mxu1 %vm430_vm2, %v15025_v10 }
0x112f   :  { %13039 = vmatmul.mubr.msk.f32.vlgmr.msra.gmra.mrb[88].mxu0 %vm6770_vm8, %v6767_v4  ;;  %13051 = vmatprep.subr.mxu1 %v13821_v1 }
0x1130   :  { %13048 = vmatprep.mubr.msk.f32.mxu0 %vm13820_vm1, %v13821_v1  ;;  %v7943_v15 = vpop.permute.xlu0 %7942 }
0x1131   :  { %13044 = vmatmul.mubr.msk.f32.vlgmr.msra.gmra.mrb[88].mxu1 %vm430_vm2, %v15029_v17 }
0x1132   :  { %13052 = vmatpush3.xpose.msk.msra.mxu1 %vm430_vm2, %v15033_v22  ;;  %13053 = vmatprep.mubr.msk.f32.mxu1 %vm13820_vm1, %v13821_v1 }
0x1133   :  { %13047 = vmatpush3.xpose.msk.msra.mxu0 %vm430_vm2, %v15031_v12  ;;  %13061 = vmatprep.subr.mxu1 %v13821_v1 }
0x1134   :  { %13056 = vmatprep.subr.mxu0 %v13821_v1  ;;  %v7941_v2 = vpop.permute.xlu0 %7940 }
0x1135   :  { %13054 = vmatmul.mubr.msk.f32.vlgmr.msra.gmra.mrb[90].mxu1 %vm430_vm2, %v15037_v16 }
0x1136   :  { %13049 = vmatmul.mubr.msk.f32.vlgmr.msra.gmra.mrb[90].mxu0 %vm430_vm2, %v15035_v25  ;;  %13062 = vmatpush3.xpose.msk.msra.mxu1 %vm430_vm2, %v7709_v48 }
0x1137   :  { %13057 = vmatpush3.xpose.msk.msra.mxu0 %vm430_vm2, %v15039_v49  ;;  %13058 = vmatprep.mubr.msk.f32.mxu0 %vm13820_vm1, %v13821_v1 }
0x1138   :  { %13063 = vmatprep.mubr.msk.f32.mxu1 %vm13820_vm1, %v13821_v1  ;;  %13066 = vmatprep.subr.mxu0 %v13821_v1 }
0x1139   :  { %13064 = vmatmul.mubr.msk.f32.vlgmr.msra.gmra.mrb[92].mxu1 %vm430_vm2, %v7707_v55  ;;  %13071 = vmatprep.subr.mxu1 %v13821_v1 }
0x113a   :  { %13059 = vmatmul.mubr.msk.f32.vlgmr.msra.gmra.mrb[92].mxu0 %vm430_vm2, %v7629_v44  ;;  %13072 = vmatpush3.xpose.msk.msra.mxu1 %vm430_vm2, %v7865_v57 }
0x113b   :  { %13067 = vmatpush3.xpose.msk.msra.mxu0 %vm430_vm2, %v7787_v9  ;;  %13068 = vmatprep.mubr.msk.f32.mxu0 %vm13820_vm1, %v13821_v1 }
0x113c   :  { %13073 = vmatprep.mubr.msk.f32.mxu1 %vm13820_vm1, %v13821_v1  ;;  %13076 = vmatprep.subr.mxu0 %v13821_v1 }
0x113d   :  { %13074 = vmatmul.mubr.msk.f32.vlgmr.msra.gmra.mrb[94].mxu1 %vm430_vm2, %v7863_v28  ;;  %13081 = vmatprep.subr.mxu1 %v13821_v1 }
0x113e   :  { %13069 = vmatmul.mubr.msk.f32.vlgmr.msra.gmra.mrb[94].mxu0 %vm430_vm2, %v7785_v14  ;;  %13083 = vmatprep.mubr.msk.f32.mxu1 %vm13820_vm1, %v13821_v1 }
0x113f   :  { %13077 = vmatpush3.xpose.msk.msra.mxu0 %vm430_vm2, %v7943_v15  ;;  %13078 = vmatprep.mubr.msk.f32.mxu0 %vm13820_vm1, %v13821_v1 }
0x1140   :  { %13086 = vmatprep.subr.mxu0 %v13821_v1 }
0x1142   :  { %13079 = vmatmul.mubr.msk.f32.vlgmr.msra.gmra.mrb[96].mxu0 %vm430_vm2, %v7941_v2 }
0x1143   :  { %13088 = vmatprep.mubr.msk.f32.mxu0 %vm13820_vm1, %v13821_v1 }
0x11ef   :  { %v15133_v41 = vpop.f32.mrb[80].mxu1 }
0x11f0   :  { %v13005_v53 = vpop.f32.mrb[81].mxu1 }
0x11f1   :  { %v15135_v50 = vpop.f32.mrb[82].mxu0 }
0x11f2   :  { %v13010_v43 = vpop.f32.mrb[83].mxu0 }
0x11f5   :  { %v15137_v42 = vpop.f32.mrb[82].mxu1 }
0x11f6   :  { %v13015_v56 = vpop.f32.mrb[83].mxu1 }
0x11f9   :  { %v15139_v39 = vpop.f32.mrb[84].mxu1 }
0x11fa   :  { %v15141_v63 = vpop.f32.mrb[84].mxu0  ;;  %v13025_v45 = vpop.f32.mrb[85].mxu1 }
0x11fb   :  { %v13020_v58 = vpop.f32.mrb[85].mxu0 }
0x11fd   :  { %v15143_v3 = vpop.f32.mrb[86].mxu1 }
0x11fe   :  { %v15145_v7 = vpop.f32.mrb[86].mxu0  ;;  %v13035_v13 = vpop.f32.mrb[87].mxu1 }
0x11ff   :  { %v13030_v10 = vpop.f32.mrb[87].mxu0 }
0x1202   :  { %v15147_v47 = vpop.f32.mrb[88].mxu0 }
0x1203   :  { %v13040_v17 = vpop.f32.mrb[89].mxu0 }
0x1204   :  { %v7468_v12 = vpop.f32.mrb[88].mxu1 }
0x1205   :  { %v8018_v22 = vmul.f32 0.17677669, %v7468_v12  ;;  %v13045_v25 = vpop.f32.mrb[89].mxu1 }
0x1207   :  { %v8026_v16 = vsel %vm6679_vm6, %v8018_v22, -inf }
0x1208   :  { %8027 = vmax.xlane.f32.xlu1 %v8026_v16  ;;  %v7624_v49 = vpop.f32.mrb[90].mxu1 }
0x1209   :  { %v7546_v27 = vpop.f32.mrb[90].mxu0  ;;  %v13055_v18 = vpop.f32.mrb[91].mxu1  ;;  %v8020_v29 = vmul.f32 0.17677669, %v7624_v49 }
0x120a   :  { %v8019_v19 = vmul.f32 0.17677669, %v7546_v27  ;;  %v13050_v32 = vpop.f32.mrb[91].mxu0 }
0x120b   :  { %v8032_v61 = vsel %vm6679_vm6, %v8020_v29, -inf }
0x120c   :  { %v7780_v6 = vpop.f32.mrb[92].mxu1  ;;  %v8029_v38 = vsel %vm6679_vm6, %v8019_v19, -inf }
0x120d   :  { %v8022_v11 = vmul.f32 0.17677669, %v7780_v6  ;;  %8030 = vmax.xlane.f32.xlu0 %v8029_v38  ;;  %v7702_v24 = vpop.f32.mrb[92].mxu0  ;;  %v13065_v30 = vpop.f32.mrb[93].mxu1 }
0x120e   :  { %v13060_v34 = vpop.f32.mrb[93].mxu0  ;;  %v8021_v54 = vmul.f32 0.17677669, %v7702_v24 }
0x120f   :  { %v8038_v59 = vsel %vm6679_vm6, %v8022_v11, -inf }
0x1210   :  { %8039 = vmax.xlane.f32.xlu1 %v8038_v59  ;;  %v7936_v5 = vpop.f32.mrb[94].mxu1  ;;  %v8035_v44 = vsel %vm6679_vm6, %v8021_v54, -inf }
0x1211   :  { %v8024_v8 = vmul.f32 0.17677669, %v7936_v5  ;;  %8033 = vmax.xlane.f32.xlu0 %v8032_v61  ;;  %v7858_v33 = vpop.f32.mrb[94].mxu0  ;;  %v13075_v26 = vpop.f32.mrb[95].mxu1 }
0x1212   :  { %v13070_v36 = vpop.f32.mrb[95].mxu0  ;;  %v8023_v52 = vmul.f32 0.17677669, %v7858_v33 }
0x1213   :  { %v8044_v23 = vsel %vm6679_vm6, %v8024_v8, -inf }
0x1214   :  { %8045 = vmax.xlane.f32.xlu1 %v8044_v23  ;;  %v8041_v4 = vsel %vm6679_vm6, %v8023_v52, -inf }
0x1215   :  { %8036 = vmax.xlane.f32.xlu0 %v8035_v44  ;;  %v8014_v31 = vpop.f32.mrb[96].mxu0 }
0x1216   :  { %v13080_v48 = vpop.f32.mrb[97].mxu0  ;;  %v8025_v51 = vmul.f32 0.17677669, %v8014_v31 }
0x1218   :  { %v8047_v9 = vsel %vm6679_vm6, %v8025_v51, -inf }
0x1219   :  { %8042 = vmax.xlane.f32.xlu0 %v8041_v4 }
0x121d   :  { %8048 = vmax.xlane.f32.xlu0 %v8047_v9 }
0x1225   :  { %8114 = vrot.lane.b32.xlu1 %v14845_v35, %s13831_s16 }
0x1229   :  { %8268 = vrot.lane.b32.xlu1 %v14847_v60, %s13831_s16 }
0x122d   :  { %8345 = vrot.lane.b32.xlu1 %v14861_v40, %s13831_s16 }
0x1231   :  { %8422 = vrot.lane.b32.xlu1 %v14865_v37, %s13831_s16 }
0x1233   :  { %8191 = vrot.lane.b32.xlu0 %v14853_v20, %s13831_s16 }
0x1235   :  { %8576 = vrot.lane.b32.xlu1 %v14867_v46, %s13831_s16 }
0x1237   :  { %8499 = vrot.lane.b32.xlu0 %v14873_v21, %s13831_s16 }
0x1239   :  { %8772 = vrot.lane.b32.xlu1 %v14845_v35, %s13826_s7 }
0x123b   :  { %8653 = vrot.lane.b32.xlu0 %v14881_v62, %s13831_s16 }
0x123d   :  { %8770 = vrot.lane.b32.xlu1 %v14845_v35, %s13825_s6 }
0x123f   :  { %8850 = vrot.lane.b32.xlu0 %v14853_v20, %s13826_s7 }
0x1241   :  { %8928 = vrot.lane.b32.xlu1 %v14847_v60, %s13826_s7 }
0x1243   :  { %8848 = vrot.lane.b32.xlu0 %v14853_v20, %s13825_s6 }
0x1245   :  { %8926 = vrot.lane.b32.xlu1 %v14847_v60, %s13825_s6 }
0x1247   :  { %9006 = vrot.lane.b32.xlu0 %v14861_v40, %s13826_s7 }
0x1295   :  { %v8028_v55 = vpop.xlane.xlu1 %8027 }
0x1296   :  { %v8050_v14 = vsub.f32 %v8018_v22, %v8028_v55 }
0x1298   :  { %v8058_v57 = vmul.f32 1.442695, %v8050_v14 }
0x129a   :  { %13617 = vpow2.f32 %v8058_v57  ;;  %v8031_v15 = vpop.xlane.xlu0 %8030 }
0x129b   :  { %v8051_v28 = vsub.f32 %v8019_v19, %v8031_v15 }
0x129d   :  { %v8060_v2 = vmul.f32 1.442695, %v8051_v28  ;;  %v8040_v53 = vpop.xlane.xlu1 %8039 }
0x129e   :  { %v8054_v43 = vsub.f32 %v8022_v11, %v8040_v53  ;;  %v8034_v56 = vpop.xlane.xlu0 %8033 }
0x129f   :  { %13619 = vpow2.f32 %v8060_v2  ;;  %v8052_v45 = vsub.f32 %v8020_v29, %v8034_v56 }
0x12a0   :  { %v8066_v58 = vmul.f32 1.442695, %v8054_v43 }
0x12a1   :  { %v8062_v13 = vmul.f32 1.442695, %v8052_v45  ;;  %v8046_v10 = vpop.xlane.xlu1 %8045 }
0x12a2   :  { %v8056_v17 = vsub.f32 %v8024_v8, %v8046_v10  ;;  %v8037_v12 = vpop.xlane.xlu0 %8036 }
0x12a3   :  { %13621 = vpow2.f32 %v8062_v13  ;;  %v8053_v25 = vsub.f32 %v8021_v54, %v8037_v12 }
0x12a4   :  { %v15179_v16 = vpop.eup %13617  ;;  %13623 = vpow2.f32 %v8066_v58  ;;  %v8070_v22 = vmul.f32 1.442695, %v8056_v17 }
0x12a5   :  { %v8064_v49 = vmul.f32 1.442695, %v8053_v25  ;;  %v8115_v27 = vpop.permute.xlu1 %8114  ;;  %v8074_v18 = vsel %vm6679_vm6, %v15179_v16, 0.0 }
0x12a6   :  { %v8043_v19 = vpop.xlane.xlu0 %8042  ;;  %8075 = vadd.xlane.f32.xlu1 %v8074_v18  ;;  %13082 = vmatpush3.msk.msra.mxu1 %vm6774_vm7, %v8115_v27 }
0x12a7   :  { %13625 = vpow2.f32 %v8064_v49  ;;  %v8055_v32 = vsub.f32 %v8023_v52, %v8043_v19  ;;  %13091 = vmatprep.subr.mxu1 %v13821_v1 }
0x12a8   :  { %13627 = vpow2.f32 %v8070_v22 }
0x12a9   :  { %v15185_v29 = vpop.eup %13619  ;;  %v8068_v6 = vmul.f32 1.442695, %v8055_v32  ;;  %v8269_v48 = vpop.permute.xlu1 %8268 }
0x12aa   :  { %v8049_v38 = vpop.xlane.xlu0 %8048  ;;  %v8077_v11 = vsel %vm6679_vm6, %v15185_v29, 0.0 }
0x12ab   :  { %13629 = vpow2.f32 %v8068_v6  ;;  %v8057_v24 = vsub.f32 %v8025_v51, %v8049_v38  ;;  %8078 = vadd.xlane.f32.xlu0 %v8077_v11 }
0x12ad   :  { %v15189_v30 = vpop.eup %13621  ;;  %v8072_v34 = vmul.f32 1.442695, %v8057_v24  ;;  %v8346_v51 = vpop.permute.xlu1 %8345 }
0x12ae   :  { %v8192_v59 = vpop.permute.xlu0 %8191  ;;  %v8080_v54 = vsel %vm6679_vm6, %v15189_v30, 0.0  ;;  %v15193_v5 = vpop.eup %13623 }
0x12af   :  { %13631 = vpow2.f32 %v8072_v34  ;;  %8081 = vadd.xlane.f32.xlu1 %v8080_v54  ;;  %13087 = vmatpush3.msk.msra.mxu0 %vm6774_vm7, %v8192_v59  ;;  %v8086_v8 = vsel %vm6679_vm6, %v15193_v5, 0.0 }
0x12b0   :  { %13096 = vmatprep.subr.mxu0 %v13821_v1 }
0x12b1   :  { %v15197_v61 = vpop.eup %13625  ;;  %v8423_v4 = vpop.permute.xlu1 %8422 }
0x12b2   :  { %v8083_v33 = vsel %vm6679_vm6, %v15197_v61, 0.0  ;;  %v15203_v26 = vpop.eup %13627  ;;  %v8500_v55 = vpop.permute.xlu0 %8499 }
0x12b3   :  { %8087 = vadd.xlane.f32.xlu1 %v8086_v8  ;;  %8084 = vadd.xlane.f32.xlu0 %v8083_v33  ;;  %v8092_v23 = vsel %vm6679_vm6, %v15203_v26, 0.0 }
0x12b5   :  { %v15205_v36 = vpop.eup %13629  ;;  %v8577_v9 = vpop.permute.xlu1 %8576 }
0x12b6   :  { %v8089_v52 = vsel %vm6679_vm6, %v15205_v36, 0.0  ;;  %v15253_v57 = vpop.permute.xlu0 %8653 }
0x12b7   :  { %8093 = vadd.xlane.f32.xlu1 %v8092_v23  ;;  %8090 = vadd.xlane.f32.xlu0 %v8089_v52 }
0x12b9   :  { %v15211_v44 = vpop.eup %13631  ;;  %v15251_v14 = vpop.permute.xlu1 %8772 }
0x12ba   :  { %v8095_v31 = vsel %vm6679_vm6, %v15211_v44, 0.0  ;;  %v15257_v28 = vpop.permute.xlu0 %8850 }
0x12bb   :  { %8096 = vadd.xlane.f32.xlu0 %v8095_v31 }
0x12bd   :  { %v15255_v15 = vpop.permute.xlu1 %8770 }
0x12be   :  { %v15261_v53 = vpop.permute.xlu0 %8848 }
0x12c1   :  { %v15259_v2 = vpop.permute.xlu1 %8928 }
0x12c2   :  { %v15265_v45 = vpop.permute.xlu0 %9006 }
0x12c5   :  { %v15263_v43 = vpop.permute.xlu1 %8926 }
0x12c8   :  { %9084 = vrot.lane.b32.xlu1 %v14865_v37, %s13826_s7 }
0x12cc   :  { %9082 = vrot.lane.b32.xlu1 %v14865_v37, %s13825_s6 }
0x12d0   :  { %9240 = vrot.lane.b32.xlu1 %v14867_v46, %s13826_s7 }
0x12d1   :  { %9004 = vrot.lane.b32.xlu0 %v14861_v40, %s13825_s6 }
0x12d4   :  { %9238 = vrot.lane.b32.xlu1 %v14867_v46, %s13825_s6 }
0x12d5   :  { %9162 = vrot.lane.b32.xlu0 %v14873_v21, %s13826_s7 }
0x12d8   :  { %9490 = vrot.lane.b32.xlu1 %v14845_v35, %s13832_s17 }
0x12d9   :  { %9160 = vrot.lane.b32.xlu0 %v14873_v21, %s13825_s6 }
0x12dc   :  { %9644 = vrot.lane.b32.xlu1 %v14847_v60, %s13832_s17 }
0x12dd   :  { %9318 = vrot.lane.b32.xlu0 %v14881_v62, %s13826_s7 }
0x12e0   :  { %9721 = vrot.lane.b32.xlu1 %v14861_v40, %s13832_s17 }
0x12e1   :  { %9316 = vrot.lane.b32.xlu0 %v14881_v62, %s13825_s6 }
0x12e4   :  { %9798 = vrot.lane.b32.xlu1 %v14865_v37, %s13832_s17 }
0x12e5   :  { %9567 = vrot.lane.b32.xlu0 %v14853_v20, %s13832_s17 }
0x12e8   :  { %9952 = vrot.lane.b32.xlu1 %v14867_v46, %s13832_s17 }
0x12e9   :  { %9875 = vrot.lane.b32.xlu0 %v14873_v21, %s13832_s17 }
0x12ec   :  { %10148 = vrot.lane.b32.xlu1 %v14845_v35, %s13828_s9 }
0x12ed   :  { %10029 = vrot.lane.b32.xlu0 %v14881_v62, %s13832_s17 }
0x12f0   :  { %10146 = vrot.lane.b32.xlu1 %v14845_v35, %s13827_s8 }
0x12f1   :  { %10226 = vrot.lane.b32.xlu0 %v14853_v20, %s13828_s9 }
0x12f4   :  { %10304 = vrot.lane.b32.xlu1 %v14847_v60, %s13828_s9 }
0x12f5   :  { %10224 = vrot.lane.b32.xlu0 %v14853_v20, %s13827_s8 }
0x1333   :  { %v8076_v56 = vpop.xlane.xlu1 %8075 }
0x1334   :  { %13633 = vrcp.f32 %v8076_v56 }
0x1338   :  { %v8079_v58 = vpop.xlane.xlu0 %8078 }
0x1339   :  { %13635 = vrcp.f32 %v8079_v58 }
0x133c   :  { %v8082_v13 = vpop.xlane.xlu1 %8081 }
0x133d   :  { %13637 = vrcp.f32 %v8082_v13 }
0x133e   :  { %v13634_v10 = vpop.eup %13633 }
0x133f   :  { %v8106_v17 = vmul.f32 %v13634_v10, %v15179_v16 }
0x1340   :  { %v8088_v12 = vpop.xlane.xlu1 %8087  ;;  %v8085_v25 = vpop.xlane.xlu0 %8084 }
0x1341   :  { %13639 = vrcp.f32 %v8088_v12  ;;  %13084 = vmatmul.mubr.msk.f32.vlgmr.msra.gmra.mrb[96].mxu1 %vm6770_vm8, %v8106_v17 }
0x1342   :  { %13641 = vrcp.f32 %v8085_v25  ;;  %13092 = vmatpush3.msk.msra.mxu1 %vm6774_vm7, %v8269_v48  ;;  %13093 = vmatprep.mubr.msk.f32.mxu1 %vm13820_vm1, %v13821_v1 }
0x1343   :  { %v13636_v22 = vpop.eup %13635  ;;  %13101 = vmatprep.subr.mxu1 %v13821_v1 }
0x1344   :  { %v8094_v49 = vpop.xlane.xlu1 %8093  ;;  %v8091_v27 = vpop.xlane.xlu0 %8090  ;;  %v8107_v18 = vmul.f32 %v13636_v22, %v15185_v29 }
0x1345   :  { %13643 = vrcp.f32 %v8094_v49 }
0x1346   :  { %13645 = vrcp.f32 %v8091_v27  ;;  %13089 = vmatmul.mubr.msk.f32.vlgmr.msra.gmra.mrb[98].mxu0 %vm6770_vm8, %v8107_v18 }
0x1347   :  { %v13638_v16 = vpop.eup %13637  ;;  %13097 = vmatpush3.msk.msra.mxu0 %vm6774_vm7, %v8346_v51  ;;  %13098 = vmatprep.mubr.msk.f32.mxu0 %vm13820_vm1, %v13821_v1 }
0x1348   :  { %v8097_v19 = vpop.xlane.xlu0 %8096  ;;  %v8108_v32 = vmul.f32 %v13638_v16, %v15189_v30  ;;  %13106 = vmatprep.subr.mxu0 %v13821_v1  ;;  %v9085_v24 = vpop.permute.xlu1 %9084 }
0x1349   :  { %13647 = vrcp.f32 %v8097_v19 }
0x134a   :  { %13094 = vmatmul.mubr.msk.f32.vlgmr.msra.gmra.mrb[98].mxu1 %vm6770_vm8, %v8108_v32 }
0x134b   :  { %v13640_v6 = vpop.eup %13639  ;;  %13102 = vmatpush3.msk.msra.mxu1 %vm6774_vm7, %v8423_v4  ;;  %13103 = vmatprep.mubr.msk.f32.mxu1 %vm13820_vm1, %v13821_v1 }
0x134c   :  { %v13642_v29 = vpop.eup %13641  ;;  %v9005_v38 = vpop.permute.xlu0 %9004  ;;  %13111 = vmatprep.subr.mxu1 %v13821_v1  ;;  %v8110_v11 = vmul.f32 %v13640_v6, %v15193_v5 }
0x134d   :  { %v8109_v30 = vmul.f32 %v13642_v29, %v15197_v61  ;;  %v9083_v33 = vpop.permute.xlu1 %9082 }
0x134e   :  { %13104 = vmatmul.mubr.msk.f32.vlgmr.msra.gmra.mrb[100].mxu1 %vm6770_vm8, %v8110_v11 }
0x134f   :  { %v13644_v34 = vpop.eup %13643  ;;  %13099 = vmatmul.mubr.msk.f32.vlgmr.msra.gmra.mrb[100].mxu0 %vm6770_vm8, %v8109_v30  ;;  %13112 = vmatpush3.msk.msra.mxu1 %vm6774_vm7, %v8577_v9 }
0x1350   :  { %v13646_v59 = vpop.eup %13645  ;;  %13107 = vmatpush3.msk.msra.mxu0 %vm6774_vm7, %v8500_v55  ;;  %13108 = vmatprep.mubr.msk.f32.mxu0 %vm13820_vm1, %v13821_v1  ;;  %v8112_v54 = vmul.f32 %v13644_v34, %v15203_v26  ;;  %v9163_v61 = vpop.permute.xlu0 %9162 }
0x1351   :  { %13113 = vmatprep.mubr.msk.f32.mxu1 %vm13820_vm1, %v13821_v1  ;;  %13116 = vmatprep.subr.mxu0 %v13821_v1  ;;  %v8111_v5 = vmul.f32 %v13646_v59, %v15205_v36  ;;  %v9241_v23 = vpop.permute.xlu1 %9240 }
0x1352   :  { %13114 = vmatmul.mubr.msk.f32.vlgmr.msra.gmra.mrb[102].mxu1 %vm6770_vm8, %v8112_v54  ;;  %13121 = vmatprep.subr.mxu1 %v13821_v1 }
0x1353   :  { %v13648_v8 = vpop.eup %13647  ;;  %13109 = vmatmul.mubr.msk.f32.vlgmr.msra.gmra.mrb[102].mxu0 %vm6770_vm8, %v8111_v5  ;;  %13123 = vmatprep.mubr.msk.f32.mxu1 %vm13820_vm1, %v13821_v1 }
0x1354   :  { %13117 = vmatpush3.msk.msra.mxu0 %vm6774_vm7, %v15253_v57  ;;  %13118 = vmatprep.mubr.msk.f32.mxu0 %vm13820_vm1, %v13821_v1  ;;  %v8113_v26 = vmul.f32 %v13648_v8, %v15211_v44  ;;  %v9161_v36 = vpop.permute.xlu0 %9160 }
0x1355   :  { %13126 = vmatprep.subr.mxu0 %v13821_v1  ;;  %v9239_v44 = vpop.permute.xlu1 %9238 }
0x1356   :  { %13122 = vmatpush3.xpose.msk.msra.mxu1 %vm430_vm2, %v15251_v14 }
0x1357   :  { %13119 = vmatmul.mubr.msk.f32.vlgmr.msra.gmra.mrb[104].mxu0 %vm6770_vm8, %v8113_v26  ;;  %13131 = vmatprep.subr.mxu1 %v13821_v1 }
0x1358   :  { %13128 = vmatprep.mubr.msk.f32.mxu0 %vm13820_vm1, %v13821_v1  ;;  %v9319_v52 = vpop.permute.xlu0 %9318 }
0x1359   :  { %13124 = vmatmul.mubr.msk.f32.vlgmr.msra.gmra.mrb[104].mxu1 %vm430_vm2, %v15255_v15  ;;  %v9491_v48 = vpop.permute.xlu1 %9490 }
0x135a   :  { %13132 = vmatpush3.xpose.msk.msra.mxu1 %vm430_vm2, %v15259_v2  ;;  %13133 = vmatprep.mubr.msk.f32.mxu1 %vm13820_vm1, %v13821_v1 }
0x135b   :  { %13127 = vmatpush3.xpose.msk.msra.mxu0 %vm430_vm2, %v15257_v28  ;;  %13141 = vmatprep.subr.mxu1 %v13821_v1 }
0x135c   :  { %13136 = vmatprep.subr.mxu0 %v13821_v1  ;;  %v9317_v31 = vpop.permute.xlu0 %9316 }
0x135d   :  { %13134 = vmatmul.mubr.msk.f32.vlgmr.msra.gmra.mrb[106].mxu1 %vm430_vm2, %v15263_v43 }
0x135e   :  { %13129 = vmatmul.mubr.msk.f32.vlgmr.msra.gmra.mrb[106].mxu0 %vm430_vm2, %v15261_v53  ;;  %13142 = vmatpush3.xpose.msk.msra.mxu1 %vm430_vm2, %v9085_v24 }
0x135f   :  { %13137 = vmatpush3.xpose.msk.msra.mxu0 %vm430_vm2, %v15265_v45  ;;  %13138 = vmatprep.mubr.msk.f32.mxu0 %vm13820_vm1, %v13821_v1 }
0x1360   :  { %13143 = vmatprep.mubr.msk.f32.mxu1 %vm13820_vm1, %v13821_v1  ;;  %13151 = vmatprep.subr.mxu1 %v13821_v1  ;;  %v9568_v51 = vpop.permute.xlu0 %9567 }
0x1361   :  { %13144 = vmatmul.mubr.msk.f32.vlgmr.msra.gmra.mrb[108].mxu1 %vm430_vm2, %v9083_v33  ;;  %13146 = vmatprep.subr.mxu0 %v13821_v1 }
0x1362   :  { %13139 = vmatmul.mubr.msk.f32.vlgmr.msra.gmra.mrb[108].mxu0 %vm430_vm2, %v9005_v38  ;;  %13152 = vmatpush3.xpose.msk.msra.mxu1 %vm430_vm2, %v9241_v23 }
0x1363   :  { %13147 = vmatpush3.xpose.msk.msra.mxu0 %vm430_vm2, %v9163_v61  ;;  %13148 = vmatprep.mubr.msk.f32.mxu0 %vm13820_vm1, %v13821_v1 }
0x1364   :  { %13153 = vmatprep.mubr.msk.f32.mxu1 %vm13820_vm1, %v13821_v1  ;;  %13161 = vmatprep.subr.mxu1 %v13821_v1 }
0x1365   :  { %13154 = vmatmul.mubr.msk.f32.vlgmr.msra.gmra.mrb[110].mxu1 %vm430_vm2, %v9239_v44  ;;  %13156 = vmatprep.subr.mxu0 %v13821_v1 }
0x1366   :  { %13149 = vmatmul.mubr.msk.f32.vlgmr.msra.gmra.mrb[110].mxu0 %vm430_vm2, %v9161_v36  ;;  %13162 = vmatpush3.msk.msra.mxu1 %vm6774_vm7, %v9491_v48 }
0x1367   :  { %13157 = vmatpush3.xpose.msk.msra.mxu0 %vm430_vm2, %v9319_v52  ;;  %13158 = vmatprep.mubr.msk.f32.mxu0 %vm13820_vm1, %v13821_v1 }
0x1368   :  { %13166 = vmatprep.subr.mxu0 %v13821_v1  ;;  %13163 = vmatprep.mubr.msk.f32.mxu1 %vm13820_vm1, %v13821_v1 }
0x1369   :  { %13171 = vmatprep.subr.mxu1 %v13821_v1 }
0x136a   :  { %13159 = vmatmul.mubr.msk.f32.vlgmr.msra.gmra.mrb[112].mxu0 %vm430_vm2, %v9317_v31 }
0x136b   :  { %13167 = vmatpush3.msk.msra.mxu0 %vm6774_vm7, %v9568_v51  ;;  %13168 = vmatprep.mubr.msk.f32.mxu0 %vm13820_vm1, %v13821_v1 }
0x136c   :  { %13176 = vmatprep.subr.mxu0 %v13821_v1 }
0x1414   :  { %v15363_v4 = vpop.f32.mrb[96].mxu1 }
0x1415   :  { %v13085_v9 = vpop.f32.mrb[97].mxu1 }
0x1419   :  { %v15365_v55 = vpop.f32.mrb[98].mxu0 }
0x141a   :  { %v13090_v14 = vpop.f32.mrb[99].mxu0 }
0x141d   :  { %v15367_v57 = vpop.f32.mrb[98].mxu1 }
0x141e   :  { %v13095_v15 = vpop.f32.mrb[99].mxu1 }
0x141f   :  { %v15397_v15 = vpop.permute.xlu1 %9644 }
0x1421   :  { %v15369_v28 = vpop.f32.mrb[100].mxu1 }
0x1422   :  { %v15371_v2 = vpop.f32.mrb[100].mxu0  ;;  %v13105_v53 = vpop.f32.mrb[101].mxu1 }
0x1423   :  { %v13100_v43 = vpop.f32.mrb[101].mxu0  ;;  %v15399_v53 = vpop.permute.xlu1 %9721 }
0x1425   :  { %v15373_v56 = vpop.f32.mrb[102].mxu1 }
0x1426   :  { %v15375_v45 = vpop.f32.mrb[102].mxu0  ;;  %v13115_v58 = vpop.f32.mrb[103].mxu1 }
0x1427   :  { %v13110_v13 = vpop.f32.mrb[103].mxu0  ;;  %v15401_v43 = vpop.permute.xlu1 %9798 }
0x1428   :  { %v15405_v13 = vpop.permute.xlu0 %9875 }
0x142a   :  { %v15377_v10 = vpop.f32.mrb[104].mxu0 }
0x142b   :  { %v13120_v17 = vpop.f32.mrb[105].mxu0  ;;  %v15403_v58 = vpop.permute.xlu1 %9952 }
0x142c   :  { %v8844_v12 = vpop.f32.mrb[104].mxu1 }
0x142d   :  { %v9394_v25 = vmul.f32 0.17677669, %v8844_v12  ;;  %v13125_v22 = vpop.f32.mrb[105].mxu1  ;;  %v15409_v12 = vpop.permute.xlu0 %10029 }
0x142f   :  { %v9402_v49 = vsel %vm6679_vm6, %v9394_v25, -inf  ;;  %v15407_v17 = vpop.permute.xlu1 %10148 }
0x1430   :  { %9403 = vmax.xlane.f32.xlu1 %v9402_v49  ;;  %v9000_v27 = vpop.f32.mrb[106].mxu1 }
0x1431   :  { %v8922_v18 = vpop.f32.mrb[106].mxu0  ;;  %v13135_v16 = vpop.f32.mrb[107].mxu1  ;;  %v9396_v6 = vmul.f32 0.17677669, %v9000_v27 }
0x1432   :  { %v9395_v19 = vmul.f32 0.17677669, %v8922_v18  ;;  %v13130_v32 = vpop.f32.mrb[107].mxu0  ;;  %v15413_v49 = vpop.permute.xlu0 %10226 }
0x1433   :  { %v9408_v61 = vsel %vm6679_vm6, %v9396_v6, -inf  ;;  %v15411_v22 = vpop.permute.xlu1 %10146 }
0x1434   :  { %v9156_v29 = vpop.f32.mrb[108].mxu1  ;;  %v9405_v38 = vsel %vm6679_vm6, %v9395_v19, -inf }
0x1435   :  { %v9398_v11 = vmul.f32 0.17677669, %v9156_v29  ;;  %9406 = vmax.xlane.f32.xlu0 %v9405_v38  ;;  %v9078_v24 = vpop.f32.mrb[108].mxu0  ;;  %v13145_v30 = vpop.f32.mrb[109].mxu1 }
0x1436   :  { %v13140_v34 = vpop.f32.mrb[109].mxu0  ;;  %v9397_v54 = vmul.f32 0.17677669, %v9078_v24  ;;  %v15417_v16 = vpop.permute.xlu0 %10224 }
0x1437   :  { %v9414_v59 = vsel %vm6679_vm6, %v9398_v11, -inf  ;;  %v15415_v27 = vpop.permute.xlu1 %10304 }
0x1438   :  { %9415 = vmax.xlane.f32.xlu1 %v9414_v59  ;;  %v9312_v5 = vpop.f32.mrb[110].mxu1  ;;  %v9411_v44 = vsel %vm6679_vm6, %v9397_v54, -inf }
0x1439   :  { %v15383_v8 = vmul.f32 0.17677669, %v9312_v5  ;;  %9409 = vmax.xlane.f32.xlu0 %v9408_v61  ;;  %v9234_v33 = vpop.f32.mrb[110].mxu0  ;;  %v13155_v26 = vpop.f32.mrb[111].mxu1 }
0x143a   :  { %v13150_v36 = vpop.f32.mrb[111].mxu0  ;;  %v9399_v52 = vmul.f32 0.17677669, %v9234_v33 }
0x143b   :  { %v9420_v23 = vsel %vm6679_vm6, %v15383_v8, -inf }
0x143c   :  { %9421 = vmax.xlane.f32.xlu1 %v9420_v23  ;;  %v9417_v9 = vsel %vm6679_vm6, %v9399_v52, -inf }
0x143d   :  { %9412 = vmax.xlane.f32.xlu0 %v9411_v44  ;;  %v9390_v31 = vpop.f32.mrb[112].mxu0 }
0x143e   :  { %v13160_v48 = vpop.f32.mrb[113].mxu0  ;;  %v15388_v51 = vmul.f32 0.17677669, %v9390_v31 }
0x1440   :  { %v9423_v14 = vsel %vm6679_vm6, %v15388_v51, -inf }
0x1441   :  { %9418 = vmax.xlane.f32.xlu0 %v9417_v9 }
0x1445   :  { %9424 = vmax.xlane.f32.xlu0 %v9423_v14 }
0x144d   :  { %10302 = vrot.lane.b32.xlu1 %v14847_v60, %s13827_s8 }
0x145b   :  { %10382 = vrot.lane.b32.xlu0 %v14861_v40, %s13828_s9 }
0x14bd   :  { %v9404_v18 = vpop.xlane.xlu1 %9403 }
0x14be   :  { %v9426_v32 = vsub.f32 %v9394_v25, %v9404_v18 }
0x14c0   :  { %v9434_v29 = vmul.f32 1.442695, %v9426_v32 }
0x14c2   :  { %13649 = vpow2.f32 %v9434_v29  ;;  %v9407_v38 = vpop.xlane.xlu0 %9406 }
0x14c3   :  { %v9427_v24 = vsub.f32 %v9395_v19, %v9407_v38 }
0x14c5   :  { %v9436_v30 = vmul.f32 1.442695, %v9427_v24  ;;  %v9416_v34 = vpop.xlane.xlu1 %9415 }
0x14c6   :  { %v9430_v59 = vsub.f32 %v9398_v11, %v9416_v34  ;;  %v9410_v5 = vpop.xlane.xlu0 %9409 }
0x14c7   :  { %13651 = vpow2.f32 %v9436_v30  ;;  %v9428_v61 = vsub.f32 %v9396_v6, %v9410_v5 }
0x14c8   :  { %v9442_v33 = vmul.f32 1.442695, %v9430_v59 }
0x14c9   :  { %v9438_v26 = vmul.f32 1.442695, %v9428_v61  ;;  %v9422_v30 = vpop.xlane.xlu1 %9421 }
0x14ca   :  { %v9413_v36 = vpop.xlane.xlu0 %9412  ;;  %v9432_v34 = vsub.f32 %v15383_v8, %v9422_v30 }
0x14cb   :  { %13653 = vpow2.f32 %v9438_v26  ;;  %v9429_v23 = vsub.f32 %v9397_v54, %v9413_v36 }
0x14cc   :  { %v13650_v44 = vpop.eup %13649  ;;  %13655 = vpow2.f32 %v9442_v33  ;;  %v9446_v5 = vmul.f32 1.442695, %v9432_v34 }
0x14cd   :  { %v9440_v31 = vmul.f32 1.442695, %v9429_v23  ;;  %v9450_v25 = vsel %vm6679_vm6, %v13650_v44, 0.0  ;;  %v15462_v8 = vpop.permute.xlu1 %10302 }
0x14ce   :  { %v9419_v48 = vpop.xlane.xlu0 %9418  ;;  %9451 = vadd.xlane.f32.xlu1 %v9450_v25 }
0x14cf   :  { %13657 = vpow2.f32 %v9440_v31  ;;  %v9431_v19 = vsub.f32 %v9399_v52, %v9419_v48 }
0x14d1   :  { %v13652_v9 = vpop.eup %13651  ;;  %v9444_v14 = vmul.f32 1.442695, %v9431_v19 }
0x14d2   :  { %v9453_v11 = vsel %vm6679_vm6, %v13652_v9, 0.0  ;;  %v9425_v59 = vpop.xlane.xlu0 %9424 }
0x14d3   :  { %13659 = vpow2.f32 %v9444_v14  ;;  %9454 = vadd.xlane.f32.xlu0 %v9453_v11  ;;  %v9433_v61 = vsub.f32 %v15388_v51, %v9425_v59 }
0x14d4   :  { %13661 = vpow2.f32 %v9446_v5 }
0x14d5   :  { %v13654_v6 = vpop.eup %13653  ;;  %v9448_v33 = vmul.f32 1.442695, %v9433_v61 }
0x14d6   :  { %v9456_v18 = vsel %vm6679_vm6, %v13654_v6, 0.0  ;;  %v15422_v32 = vpop.eup %13655  ;;  %v15464_v25 = vpop.permute.xlu0 %10382 }
0x14d7   :  { %9457 = vadd.xlane.f32.xlu1 %v9456_v18  ;;  %v9462_v29 = vsel %vm6679_vm6, %v15422_v32, 0.0  ;;  %13663 = vpow2.f32 %v9448_v33 }
0x14d9   :  { %v15424_v54 = vpop.eup %13657 }
0x14da   :  { %v9459_v52 = vsel %vm6679_vm6, %v15424_v54, 0.0 }
0x14db   :  { %9463 = vadd.xlane.f32.xlu1 %v9462_v29  ;;  %9460 = vadd.xlane.f32.xlu0 %v9459_v52 }
0x14dd   :  { %v15430_v38 = vpop.eup %13659 }
0x14de   :  { %v9465_v24 = vsel %vm6679_vm6, %v15430_v38, 0.0  ;;  %v15440_v26 = vpop.eup %13661 }
0x14df   :  { %9466 = vadd.xlane.f32.xlu0 %v9465_v24  ;;  %v9468_v36 = vsel %vm6679_vm6, %v15440_v26, 0.0 }
0x14e1   :  { %v15444_v23 = vpop.eup %13663 }
0x14e2   :  { %v9471_v31 = vsel %vm6679_vm6, %v15444_v23, 0.0 }
0x14ec   :  { %10460 = vrot.lane.b32.xlu1 %v14865_v37, %s13828_s9 }
0x14f5   :  { %10380 = vrot.lane.b32.xlu0 %v14861_v40, %s13827_s8 }
0x1510   :  { %9469 = vadd.xlane.f32.xlu1 %v9468_v36 }
0x1514   :  { %9472 = vadd.xlane.f32.xlu0 %v9471_v31 }
0x1521   :  { %10458 = vrot.lane.b32.xlu1 %v14865_v37, %s13827_s8 }
0x1525   :  { %10616 = vrot.lane.b32.xlu1 %v14867_v46, %s13828_s9 }
0x1529   :  { %10614 = vrot.lane.b32.xlu1 %v14867_v46, %s13827_s8 }
0x152a   :  { %10538 = vrot.lane.b32.xlu0 %v14873_v21, %s13828_s9 }
0x152e   :  { %10536 = vrot.lane.b32.xlu0 %v14873_v21, %s13827_s8 }
0x1532   :  { %10694 = vrot.lane.b32.xlu0 %v14881_v62, %s13828_s9 }
0x1536   :  { %10692 = vrot.lane.b32.xlu0 %v14881_v62, %s13827_s8 }
0x155b   :  { %v9452_v51 = vpop.xlane.xlu1 %9451 }
0x155c   :  { %13665 = vrcp.f32 %v9452_v51 }
0x1560   :  { %v9455_v48 = vpop.xlane.xlu0 %9454 }
0x1561   :  { %13667 = vrcp.f32 %v9455_v48 }
0x1564   :  { %v9458_v19 = vpop.xlane.xlu1 %9457 }
0x1565   :  { %13669 = vrcp.f32 %v9458_v19 }
0x1566   :  { %v13666_v14 = vpop.eup %13665 }
0x1567   :  { %v9482_v11 = vmul.f32 %v13666_v14, %v13650_v44 }
0x1568   :  { %v9464_v18 = vpop.xlane.xlu1 %9463  ;;  %v9461_v29 = vpop.xlane.xlu0 %9460 }
0x1569   :  { %13671 = vrcp.f32 %v9464_v18  ;;  %13164 = vmatmul.mubr.msk.f32.vlgmr.msra.gmra.mrb[112].mxu1 %vm6770_vm8, %v9482_v11 }
0x156a   :  { %13673 = vrcp.f32 %v9461_v29  ;;  %13172 = vmatpush3.msk.msra.mxu1 %vm6774_vm7, %v15397_v15  ;;  %13173 = vmatprep.mubr.msk.f32.mxu1 %vm13820_vm1, %v13821_v1 }
0x156b   :  { %v13668_v52 = vpop.eup %13667  ;;  %13181 = vmatprep.subr.mxu1 %v13821_v1 }
0x156c   :  { %v9483_v24 = vmul.f32 %v13668_v52, %v13652_v9  ;;  %v9467_v30 = vpop.xlane.xlu0 %9466 }
0x156d   :  { %13675 = vrcp.f32 %v9467_v30 }
0x156e   :  { %13169 = vmatmul.mubr.msk.f32.vlgmr.msra.gmra.mrb[114].mxu0 %vm6770_vm8, %v9483_v24 }
0x156f   :  { %v13670_v44 = vpop.eup %13669  ;;  %13177 = vmatpush3.msk.msra.mxu0 %vm6774_vm7, %v15399_v53  ;;  %13178 = vmatprep.mubr.msk.f32.mxu0 %vm13820_vm1, %v13821_v1 }
0x1570   :  { %v9484_v34 = vmul.f32 %v13670_v44, %v13654_v6  ;;  %13186 = vmatprep.subr.mxu0 %v13821_v1 }
0x1572   :  { %13174 = vmatmul.mubr.msk.f32.vlgmr.msra.gmra.mrb[114].mxu1 %vm6770_vm8, %v9484_v34 }
0x1573   :  { %v13672_v15 = vpop.eup %13671  ;;  %13182 = vmatpush3.msk.msra.mxu1 %vm6774_vm7, %v15401_v43  ;;  %13183 = vmatprep.mubr.msk.f32.mxu1 %vm13820_vm1, %v13821_v1 }
0x1574   :  { %v13674_v9 = vpop.eup %13673  ;;  %v9486_v59 = vmul.f32 %v13672_v15, %v15422_v32  ;;  %13191 = vmatprep.subr.mxu1 %v13821_v1 }
0x1575   :  { %v9485_v53 = vmul.f32 %v13674_v9, %v15424_v54 }
0x1576   :  { %13184 = vmatmul.mubr.msk.f32.vlgmr.msra.gmra.mrb[116].mxu1 %vm6770_vm8, %v9486_v59 }
0x1577   :  { %v13676_v6 = vpop.eup %13675  ;;  %13179 = vmatmul.mubr.msk.f32.vlgmr.msra.gmra.mrb[116].mxu0 %vm6770_vm8, %v9485_v53  ;;  %13192 = vmatpush3.msk.msra.mxu1 %vm6774_vm7, %v15403_v58  ;;  %v10461_v58 = vpop.permute.xlu1 %10460 }
0x1578   :  { %v9487_v43 = vmul.f32 %v13676_v6, %v15430_v38  ;;  %13187 = vmatpush3.msk.msra.mxu0 %vm6774_vm7, %v15405_v13  ;;  %13188 = vmatprep.mubr.msk.f32.mxu0 %vm13820_vm1, %v13821_v1  ;;  %v10381_v13 = vpop.permute.xlu0 %10380 }
0x1579   :  { %13196 = vmatprep.subr.mxu0 %v13821_v1  ;;  %13193 = vmatprep.mubr.msk.f32.mxu1 %vm13820_vm1, %v13821_v1 }
0x157a   :  { %13201 = vmatprep.subr.mxu1 %v13821_v1 }
0x157b   :  { %13189 = vmatmul.mubr.msk.f32.vlgmr.msra.gmra.mrb[118].mxu0 %vm6770_vm8, %v9487_v43 }
0x157c   :  { %13197 = vmatpush3.msk.msra.mxu0 %vm6774_vm7, %v15409_v12  ;;  %13198 = vmatprep.mubr.msk.f32.mxu0 %vm13820_vm1, %v13821_v1 }
0x157d   :  { %13206 = vmatprep.subr.mxu0 %v13821_v1 }
0x159d   :  { %v9470_v32 = vpop.xlane.xlu1 %9469 }
0x159e   :  { %13677 = vrcp.f32 %v9470_v32 }
0x15a1   :  { %v9473_v54 = vpop.xlane.xlu0 %9472  ;;  %v10459_v36 = vpop.permute.xlu1 %10458 }
0x15a2   :  { %13679 = vrcp.f32 %v9473_v54 }
0x15a5   :  { %v10539_v33 = vpop.permute.xlu0 %10538 }
0x15a8   :  { %v13678_v38 = vpop.eup %13677 }
0x15a9   :  { %v9488_v5 = vmul.f32 %v13678_v38, %v15440_v26 }
0x15ab   :  { %13194 = vmatmul.mubr.msk.f32.vlgmr.msra.gmra.mrb[118].mxu1 %vm6770_vm8, %v9488_v5 }
0x15ac   :  { %v13680_v61 = vpop.eup %13679  ;;  %13202 = vmatpush3.xpose.msk.msra.mxu1 %vm430_vm2, %v15407_v17  ;;  %13203 = vmatprep.mubr.msk.f32.mxu1 %vm13820_vm1, %v13821_v1  ;;  %v10537_v17 = vpop.permute.xlu0 %10536 }
0x15ad   :  { %v9489_v12 = vmul.f32 %v13680_v61, %v15444_v23  ;;  %13211 = vmatprep.subr.mxu1 %v13821_v1 }
0x15af   :  { %13199 = vmatmul.mubr.msk.f32.vlgmr.msra.gmra.mrb[120].mxu0 %vm6770_vm8, %v9489_v12  ;;  %13204 = vmatmul.mubr.msk.f32.vlgmr.msra.gmra.mrb[120].mxu1 %vm430_vm2, %v15411_v22  ;;  %v10617_v22 = vpop.permute.xlu1 %10616 }
0x15b0   :  { %13207 = vmatpush3.xpose.msk.msra.mxu0 %vm430_vm2, %v15413_v49  ;;  %13212 = vmatpush3.xpose.msk.msra.mxu1 %vm430_vm2, %v15415_v27  ;;  %v10695_v49 = vpop.permute.xlu0 %10694 }
0x15b1   :  { %13208 = vmatprep.mubr.msk.f32.mxu0 %vm13820_vm1, %v13821_v1  ;;  %13213 = vmatprep.mubr.msk.f32.mxu1 %vm13820_vm1, %v13821_v1 }
0x15b2   :  { %13216 = vmatprep.subr.mxu0 %v13821_v1  ;;  %13221 = vmatprep.subr.mxu1 %v13821_v1 }
0x15b3   :  { %13209 = vmatmul.mubr.msk.f32.vlgmr.msra.gmra.mrb[122].mxu0 %vm430_vm2, %v15417_v16  ;;  %13214 = vmatmul.mubr.msk.f32.vlgmr.msra.gmra.mrb[122].mxu1 %vm430_vm2, %v15462_v8  ;;  %v10615_v27 = vpop.permute.xlu1 %10614 }
0x15b4   :  { %13217 = vmatpush3.xpose.msk.msra.mxu0 %vm430_vm2, %v15464_v25  ;;  %13222 = vmatpush3.xpose.msk.msra.mxu1 %vm430_vm2, %v10461_v58  ;;  %v10693_v16 = vpop.permute.xlu0 %10692 }
0x15b5   :  { %13218 = vmatprep.mubr.msk.f32.mxu0 %vm13820_vm1, %v13821_v1  ;;  %13223 = vmatprep.mubr.msk.f32.mxu1 %vm13820_vm1, %v13821_v1 }
0x15b6   :  { %13226 = vmatprep.subr.mxu0 %v13821_v1  ;;  %13231 = vmatprep.subr.mxu1 %v13821_v1 }
0x15b7   :  { %13219 = vmatmul.mubr.msk.f32.vlgmr.msra.gmra.mrb[124].mxu0 %vm430_vm2, %v10381_v13  ;;  %13224 = vmatmul.mubr.msk.f32.vlgmr.msra.gmra.mrb[124].mxu1 %vm430_vm2, %v10459_v36 }
0x15b8   :  { %13227 = vmatpush3.xpose.msk.msra.mxu0 %vm430_vm2, %v10539_v33  ;;  %13232 = vmatpush3.xpose.msk.msra.mxu1 %vm430_vm2, %v10617_v22 }
0x15b9   :  { %13228 = vmatprep.mubr.msk.f32.mxu0 %vm13820_vm1, %v13821_v1  ;;  %13233 = vmatprep.mubr.msk.f32.mxu1 %vm13820_vm1, %v13821_v1 }
0x15ba   :  { %13236 = vmatprep.subr.mxu0 %v13821_v1  ;;  %13241 = vmatprep.subr.mxu1 %v13821_v1 }
0x15bb   :  { %13229 = vmatmul.mubr.msk.f32.vlgmr.msra.gmra.mrb[126].mxu0 %vm430_vm2, %v10537_v17  ;;  %13234 = vmatmul.mubr.msk.f32.vlgmr.msra.gmra.mrb[126].mxu1 %vm430_vm2, %v10615_v27 }
0x15bc   :  { %13237 = vmatpush3.xpose.msk.msra.mxu0 %vm430_vm2, %v10695_v49  ;;  %13238 = vmatprep.mubr.msk.f32.mxu0 %vm13820_vm1, %v13821_v1 }
0x15bd   :  { %13246 = vmatprep.subr.mxu0 %v13821_v1  ;;  %13243 = vmatprep.mubr.msk.f32.mxu1 %vm13820_vm1, %v13821_v1 }
0x15bf   :  { %13239 = vmatmul.mubr.msk.f32.vlgmr.msra.gmra.mrb[128].mxu0 %vm430_vm2, %v10693_v16 }
0x15c0   :  { %13248 = vmatprep.mubr.msk.f32.mxu0 %vm13820_vm1, %v13821_v1 }
0x163c   :  { %v15560_v26 = vpop.f32.mrb[112].mxu1 }
0x163d   :  { %v13165_v23 = vpop.f32.mrb[113].mxu1 }
0x1641   :  { %v15562_v31 = vpop.f32.mrb[114].mxu0 }
0x1642   :  { %v13170_v8 = vpop.f32.mrb[115].mxu0 }
0x1645   :  { %v15564_v51 = vpop.f32.mrb[114].mxu1 }
0x1646   :  { %v13175_v25 = vpop.f32.mrb[115].mxu1 }
0x1649   :  { %v15566_v48 = vpop.f32.mrb[116].mxu1 }
0x164a   :  { %v15568_v19 = vpop.f32.mrb[116].mxu0  ;;  %v13185_v14 = vpop.f32.mrb[117].mxu1 }
0x164b   :  { %v13180_v11 = vpop.f32.mrb[117].mxu0 }
0x164e   :  { %v15570_v18 = vpop.f32.mrb[118].mxu0 }
0x164f   :  { %v13190_v29 = vpop.f32.mrb[119].mxu0 }
0x167e   :  { %v15572_v52 = vpop.f32.mrb[118].mxu1 }
0x167f   :  { %v13195_v24 = vpop.f32.mrb[119].mxu1 }
0x1682   :  { %v15574_v30 = vpop.f32.mrb[120].mxu0  ;;  %v10220_v44 = vpop.f32.mrb[120].mxu1 }
0x1683   :  { %v10770_v34 = vmul.f32 0.17677669, %v10220_v44  ;;  %v13200_v15 = vpop.f32.mrb[121].mxu0  ;;  %v13205_v9 = vpop.f32.mrb[121].mxu1 }
0x1685   :  { %v10778_v59 = vsel %vm6679_vm6, %v10770_v34, -inf }
0x1686   :  { %10779 = vmax.xlane.f32.xlu1 %v10778_v59  ;;  %v10298_v53 = vpop.f32.mrb[122].mxu0  ;;  %v10376_v6 = vpop.f32.mrb[122].mxu1 }
0x1687   :  { %v10771_v43 = vmul.f32 0.17677669, %v10298_v53  ;;  %v13210_v58 = vpop.f32.mrb[123].mxu0  ;;  %v13215_v13 = vpop.f32.mrb[123].mxu1  ;;  %v10772_v32 = vmul.f32 0.17677669, %v10376_v6 }
0x1689   :  { %v10781_v54 = vsel %vm6679_vm6, %v10771_v43, -inf  ;;  %v10784_v22 = vsel %vm6679_vm6, %v10772_v32, -inf }
0x168a   :  { %v10532_v38 = vpop.f32.mrb[124].mxu1  ;;  %10782 = vmax.xlane.f32.xlu0 %v10781_v54  ;;  %v10454_v5 = vpop.f32.mrb[124].mxu0 }
0x168b   :  { %v10774_v61 = vmul.f32 0.17677669, %v10532_v38  ;;  %v13220_v33 = vpop.f32.mrb[125].mxu0  ;;  %v13225_v12 = vpop.f32.mrb[125].mxu1  ;;  %v10773_v36 = vmul.f32 0.17677669, %v10454_v5 }
0x168d   :  { %v10790_v17 = vsel %vm6679_vm6, %v10774_v61, -inf  ;;  %v10787_v11 = vsel %vm6679_vm6, %v10773_v36, -inf }
0x168e   :  { %10791 = vmax.xlane.f32.xlu1 %v10790_v17  ;;  %v10688_v49 = vpop.f32.mrb[126].mxu1  ;;  %10785 = vmax.xlane.f32.xlu0 %v10784_v22  ;;  %v10610_v27 = vpop.f32.mrb[126].mxu0 }
0x168f   :  { %v10776_v16 = vmul.f32 0.17677669, %v10688_v49  ;;  %v13230_v23 = vpop.f32.mrb[127].mxu0  ;;  %v13235_v8 = vpop.f32.mrb[127].mxu1  ;;  %v10775_v25 = vmul.f32 0.17677669, %v10610_v27 }
0x1691   :  { %v10796_v14 = vsel %vm6679_vm6, %v10776_v16, -inf  ;;  %v10793_v15 = vsel %vm6679_vm6, %v10775_v25, -inf }
0x1692   :  { %10797 = vmax.xlane.f32.xlu1 %v10796_v14  ;;  %10788 = vmax.xlane.f32.xlu0 %v10787_v11  ;;  %v10766_v29 = vpop.f32.mrb[128].mxu0 }
0x1693   :  { %v13240_v24 = vpop.f32.mrb[129].mxu0  ;;  %v10777_v44 = vmul.f32 0.17677669, %v10766_v29 }
0x1695   :  { %v10799_v9 = vsel %vm6679_vm6, %v10777_v44, -inf }
0x1696   :  { %10794 = vmax.xlane.f32.xlu0 %v10793_v15 }
0x169a   :  { %10800 = vmax.xlane.f32.xlu0 %v10799_v9 }
0x16a3   :  { %10866 = vrot.lane.b32.xlu1 %v14845_v35, %s13833_s19 }
0x16a7   :  { %11020 = vrot.lane.b32.xlu1 %v14847_v60, %s13833_s19 }
0x16ab   :  { %11097 = vrot.lane.b32.xlu1 %v14861_v40, %s13833_s19 }
0x16af   :  { %11174 = vrot.lane.b32.xlu1 %v14865_v37, %s13833_s19 }
0x16b0   :  { %10943 = vrot.lane.b32.xlu0 %v14853_v20, %s13833_s19 }
0x16b4   :  { %11251 = vrot.lane.b32.xlu0 %v14873_v21, %s13833_s19 }
0x1713   :  { %v10780_v59 = vpop.xlane.xlu1 %10779 }
0x1714   :  { %v10802_v53 = vsub.f32 %v10770_v34, %v10780_v59 }
0x1716   :  { %v10810_v6 = vmul.f32 1.442695, %v10802_v53 }
0x1717   :  { %v10783_v58 = vpop.xlane.xlu0 %10782 }
0x1718   :  { %13681 = vpow2.f32 %v10810_v6  ;;  %v10803_v13 = vsub.f32 %v10771_v43, %v10783_v58 }
0x171a   :  { %v10812_v54 = vmul.f32 1.442695, %v10803_v13 }
0x171b   :  { %v10792_v38 = vpop.xlane.xlu1 %10791  ;;  %v10786_v5 = vpop.xlane.xlu0 %10785 }
0x171c   :  { %13683 = vpow2.f32 %v10812_v54  ;;  %v10806_v33 = vsub.f32 %v10774_v61, %v10792_v38  ;;  %v10804_v12 = vsub.f32 %v10772_v32, %v10786_v5 }
0x171e   :  { %v10814_v17 = vmul.f32 1.442695, %v10804_v12  ;;  %v10818_v22 = vmul.f32 1.442695, %v10806_v33 }
0x171f   :  { %v10798_v49 = vpop.xlane.xlu1 %10797  ;;  %v10789_v27 = vpop.xlane.xlu0 %10788 }
0x1720   :  { %v10808_v23 = vsub.f32 %v10776_v16, %v10798_v49  ;;  %v10805_v8 = vsub.f32 %v10773_v36, %v10789_v27  ;;  %13685 = vpow2.f32 %v10814_v17  ;;  %v11546_v49 = vld [vmem:[#allocation7 + $0x8] sm:$0xff] }
0x1721   :  { %13687 = vpow2.f32 %v10818_v22  ;;  %v11547_v27 = vld [vmem:[#allocation7 + $0x28] sm:$0xff] }
0x1722   :  { %v15596_v14 = vpop.eup %13681  ;;  %v10816_v34 = vmul.f32 1.442695, %v10805_v8  ;;  %v10822_v11 = vmul.f32 1.442695, %v10808_v23  ;;  %v13411_v23 = vpack.i.bf16 %v11547_v27, %v11546_v49  ;;  %v11549_v8 = vld [vmem:[#allocation7 + $0x68] sm:$0xff] }
0x1723   :  { %v10867_v29 = vpop.permute.xlu1 %10866  ;;  %v10795_v43 = vpop.xlane.xlu0 %10794  ;;  %v10826_v24 = vsel %vm6679_vm6, %v15596_v14, 0.0 }
0x1724   :  { %v10807_v15 = vsub.f32 %v10775_v25, %v10795_v43  ;;  %10827 = vadd.xlane.f32.xlu1 %v10826_v24  ;;  %13242 = vmatpush3.msk.msra.mxu1 %vm6774_vm7, %v10867_v29  ;;  %13689 = vpow2.f32 %v10816_v34 }
0x1725   :  { %13251 = vmatprep.subr.mxu1 %v13821_v1  ;;  %13691 = vpow2.f32 %v10822_v11 }
0x1726   :  { %v15602_v32 = vpop.eup %13683  ;;  %v10820_v61 = vmul.f32 1.442695, %v10807_v15 }
0x1727   :  { %v10801_v36 = vpop.xlane.xlu0 %10800  ;;  %v10829_v16 = vsel %vm6679_vm6, %v15602_v32, 0.0 }
0x1728   :  { %13693 = vpow2.f32 %v10820_v61  ;;  %v10809_v9 = vsub.f32 %v10777_v44, %v10801_v36  ;;  %10830 = vadd.xlane.f32.xlu0 %v10829_v16 }
0x172a   :  { %v10824_v59 = vmul.f32 1.442695, %v10809_v9  ;;  %v15606_v53 = vpop.eup %13685 }
0x172b   :  { %v10944_v25 = vpop.permute.xlu0 %10943  ;;  %v10832_v6 = vsel %vm6679_vm6, %v15606_v53, 0.0  ;;  %v15611_v58 = vpop.eup %13687 }
0x172c   :  { %13695 = vpow2.f32 %v10824_v59  ;;  %13247 = vmatpush3.msk.msra.mxu0 %vm6774_vm7, %v10944_v25  ;;  %10833 = vadd.xlane.f32.xlu1 %v10832_v6  ;;  %v10838_v44 = vsel %vm6679_vm6, %v15611_v58, 0.0 }
0x172d   :  { %13256 = vmatprep.subr.mxu0 %v13821_v1 }
0x172e   :  { %v15614_v13 = vpop.eup %13689 }
0x172f   :  { %v10835_v54 = vsel %vm6679_vm6, %v15614_v13, 0.0  ;;  %v15620_v38 = vpop.eup %13691 }
0x1730   :  { %10839 = vadd.xlane.f32.xlu1 %v10838_v44  ;;  %10836 = vadd.xlane.f32.xlu0 %v10835_v54  ;;  %v10844_v12 = vsel %vm6679_vm6, %v15620_v38, 0.0 }
0x1732   :  { %v15622_v5 = vpop.eup %13693 }
0x1733   :  { %v10841_v33 = vsel %vm6679_vm6, %v15622_v5, 0.0 }
0x1734   :  { %10845 = vadd.xlane.f32.xlu1 %v10844_v12  ;;  %10842 = vadd.xlane.f32.xlu0 %v10841_v33 }
0x1736   :  { %v15628_v17 = vpop.eup %13695 }
0x1737   :  { %v10847_v22 = vsel %vm6679_vm6, %v15628_v17, 0.0 }
0x1738   :  { %10848 = vadd.xlane.f32.xlu0 %v10847_v22  ;;  %v7388_v22 = vadd.f32 %v15137_v42, %v14847_v60 }
0x1745   :  { %11328 = vrot.lane.b32.xlu1 %v14867_v46, %s13833_s19 }
0x1749   :  { %13412 = vrot.lane.b32.xlu1 %v13411_v23, %s13817_s18 }
0x174d   :  { %8740 = vrot.lane.b32.xlu1 %v15365_v55, %s13814_s11  ;;  %v11548_v55 = vld [vmem:[#allocation7 + $0x48] sm:$0xff] }
0x174e   :  { %11405 = vrot.lane.b32.xlu0 %v14881_v62, %s13833_s19 }
0x1751   :  { %8744 = vrot.lane.b32.xlu1 %v15371_v2, %s13814_s11 }
0x1752   :  { %8738 = vrot.lane.b32.xlu0 %v15363_v4, %s13814_s11  ;;  %v13416_v4 = vpack.i.bf16 %v11549_v8, %v11548_v55 }
0x1755   :  { %10116 = vrot.lane.b32.xlu1 %v15562_v31, %s13829_s10 }
0x1756   :  { %8742 = vrot.lane.b32.xlu0 %v15367_v57, %s13814_s11  ;;  %v11021_v57 = vpop.permute.xlu1 %11020 }
0x1759   :  { %10120 = vrot.lane.b32.xlu1 %v15568_v19, %s13829_s10 }
0x175a   :  { %10114 = vrot.lane.b32.xlu0 %v15560_v26, %s13829_s10 }
0x175d   :  { %8746 = vrot.lane.b32.xlu1 %v15369_v28, %s13814_s11  ;;  %v11098_v28 = vpop.permute.xlu1 %11097 }
0x175e   :  { %10118 = vrot.lane.b32.xlu0 %v15564_v51, %s13829_s10 }
0x1761   :  { %8750 = vrot.lane.b32.xlu1 %v15373_v56, %s13814_s11  ;;  %v11175_v2 = vpop.permute.xlu1 %11174  ;;  %v11252_v56 = vpop.permute.xlu0 %11251 }
0x1762   :  { %13417 = vrot.lane.b32.xlu0 %v13416_v4, %s13817_s18 }
0x1765   :  { %10122 = vrot.lane.b32.xlu1 %v15566_v48, %s13829_s10 }
0x1766   :  { %8748 = vrot.lane.b32.xlu0 %v15375_v45, %s13814_s11 }
0x1769   :  { %10126 = vrot.lane.b32.xlu1 %v15572_v52, %s13829_s10 }
0x176a   :  { %8752 = vrot.lane.b32.xlu0 %v15377_v10, %s13814_s11 }
0x176e   :  { %10124 = vrot.lane.b32.xlu0 %v15570_v18, %s13829_s10 }
0x1772   :  { %10128 = vrot.lane.b32.xlu0 %v15574_v30, %s13829_s10 }
0x17b1   :  { %v10828_v26 = vpop.xlane.xlu1 %10827 }
0x17b2   :  { %13697 = vrcp.f32 %v10828_v26 }
0x17b5   :  { %v10831_v31 = vpop.xlane.xlu0 %10830 }
0x17b6   :  { %13699 = vrcp.f32 %v10831_v31 }
0x17b9   :  { %v10834_v45 = vpop.xlane.xlu1 %10833 }
0x17ba   :  { %13701 = vrcp.f32 %v10834_v45 }
0x17bc   :  { %v13698_v51 = vpop.eup %13697 }
0x17bd   :  { %v10858_v48 = vmul.f32 %v13698_v51, %v15596_v14  ;;  %v10840_v10 = vpop.xlane.xlu1 %10839  ;;  %v10837_v19 = vpop.xlane.xlu0 %10836 }
0x17be   :  { %13703 = vrcp.f32 %v10840_v10 }
0x17bf   :  { %13244 = vmatmul.mubr.msk.f32.vlgmr.msra.gmra.mrb[128].mxu1 %vm6770_vm8, %v10858_v48  ;;  %13705 = vrcp.f32 %v10837_v19 }
0x17c0   :  { %v13700_v18 = vpop.eup %13699  ;;  %13252 = vmatpush3.msk.msra.mxu1 %vm6774_vm7, %v11021_v57  ;;  %13253 = vmatprep.mubr.msk.f32.mxu1 %vm13820_vm1, %v13821_v1 }
0x17c1   :  { %v10859_v52 = vmul.f32 %v13700_v18, %v15602_v32  ;;  %13261 = vmatprep.subr.mxu1 %v13821_v1  ;;  %v10846_v30 = vpop.xlane.xlu1 %10845  ;;  %v10843_v34 = vpop.xlane.xlu0 %10842 }
0x17c2   :  { %13707 = vrcp.f32 %v10846_v30 }
0x17c3   :  { %13249 = vmatmul.mubr.msk.f32.vlgmr.msra.gmra.mrb[130].mxu0 %vm6770_vm8, %v10859_v52  ;;  %13709 = vrcp.f32 %v10843_v34 }
0x17c4   :  { %13257 = vmatpush3.msk.msra.mxu0 %vm6774_vm7, %v11098_v28  ;;  %13258 = vmatprep.mubr.msk.f32.mxu0 %vm13820_vm1, %v13821_v1  ;;  %v13702_v14 = vpop.eup %13701 }
0x17c5   :  { %13266 = vmatprep.subr.mxu0 %v13821_v1  ;;  %v10860_v11 = vmul.f32 %v13702_v14, %v15606_v53  ;;  %v11329_v29 = vpop.permute.xlu1 %11328  ;;  %v10849_v43 = vpop.xlane.xlu0 %10848 }
0x17c6   :  { %13711 = vrcp.f32 %v10849_v43  ;;  %v12266_v43 = vld [vmem:[%s15869_s3 + $0x1] ss:$0 sm:$0xff] }
0x17c7   :  { %13254 = vmatmul.mubr.msk.f32.vlgmr.msra.gmra.mrb[130].mxu1 %vm6770_vm8, %v10860_v11 }
0x17c8   :  { %v13704_v24 = vpop.eup %13703  ;;  %13262 = vmatpush3.msk.msra.mxu1 %vm6774_vm7, %v11175_v2  ;;  %13263 = vmatprep.mubr.msk.f32.mxu1 %vm13820_vm1, %v13821_v1 }
0x17c9   :  { %v13706_v15 = vpop.eup %13705  ;;  %v10862_v32 = vmul.f32 %v13704_v24, %v15611_v58  ;;  %v13413_v61 = vpop.permute.xlu1 %13412  ;;  %13271 = vmatprep.subr.mxu1 %v13821_v1 }
0x17ca   :  { %v11406_v36 = vpop.permute.xlu0 %11405  ;;  %v10861_v16 = vmul.f32 %v13706_v15, %v15614_v13  ;;  %v13415_v9 = vunpack.i.h.bf16 %v13413_v61  ;;  %v13414_v59 = vunpack.i.l.bf16 %v13413_v61  ;;  %v7386_v13 = vadd.f32 %v15133_v41, %v14845_v35 }
0x17cb   :  { %13264 = vmatmul.mubr.msk.f32.vlgmr.msra.gmra.mrb[132].mxu1 %vm6770_vm8, %v10862_v32 }
0x17cc   :  { %v13708_v53 = vpop.eup %13707  ;;  %v13347_v25 = vpack.c.bf16 %v13415_v9, %v13414_v59  ;;  %13259 = vmatmul.mubr.msk.f32.vlgmr.msra.gmra.mrb[132].mxu0 %vm6770_vm8, %v10861_v16  ;;  %13272 = vmatpush3.msk.msra.mxu1 %vm6774_vm7, %v11329_v29 }
0x17cd   :  { %v13710_v6 = vpop.eup %13709  ;;  %v10864_v44 = vmul.f32 %v13708_v53, %v15620_v38  ;;  %13267 = vmatpush3.msk.msra.mxu0 %vm6774_vm7, %v11252_v56  ;;  %13268 = vmatprep.mubr.msk.f32.mxu0 %vm13820_vm1, %v13821_v1  ;;  %v8741_v32 = vpop.permute.xlu1 %8740 }
0x17ce   :  { %v8739_v58 = vpop.permute.xlu0 %8738  ;;  %v10863_v54 = vmul.f32 %v13710_v6, %v15622_v5  ;;  %13273 = vmatprep.mubr.msk.f32.mxu1 %vm13820_vm1, %v13821_v1  ;;  %13276 = vmatprep.subr.mxu0 %v13821_v1 }
0x17cf   :  { %v8762_v33 = vadd.f32 %v8739_v58, %v14845_v35  ;;  %13274 = vmatmul.mubr.msk.f32.vlgmr.msra.gmra.mrb[134].mxu1 %vm6770_vm8, %v10864_v44  ;;  %13348 = vmatprep.subr.bf16.mxu1 %v13347_v25 }
0x17d0   :  { %v13712_v38 = vpop.eup %13711  ;;  %13269 = vmatmul.mubr.msk.f32.vlgmr.msra.gmra.mrb[134].mxu0 %vm6770_vm8, %v10863_v54  ;;  %13350 = vmatpush3.bf16.msra.mxu1 %v13347_v25 }
0x17d1   :  { %v11522_v12 = vsel %vm430_vm2, %v7386_v13, %v8762_v33  ;;  %v10865_v41 = vmul.f32 %v13712_v38, %v15628_v17  ;;  %13277 = vmatpush3.msk.msra.mxu0 %vm6774_vm7, %v11406_v36  ;;  %13278 = vmatprep.mubr.msk.f32.mxu0 %vm13820_vm1, %v13821_v1  ;;  %v8745_v61 = vpop.permute.xlu1 %8744  ;;  %v8763_v33 = vadd.f32 %v8741_v32, %v14853_v20 }
0x17d2   :  { %v8743_v5 = vpop.permute.xlu0 %8742  ;;  %13355 = vmatprep.subr.bf16.mxu0 %v13819_v0 }
0x17d3   :  { %v8764_v49 = vadd.f32 %v8743_v5, %v14847_v60 }
0x17d4   :  { %13279 = vmatmul.mubr.msk.f32.vlgmr.msra.gmra.mrb[136].mxu0 %vm6770_vm8, %v10865_v41 }
0x17d5   :  { %v11524_v27 = vsel %vm430_vm2, %v7388_v22, %v8764_v49  ;;  %13303 = vmatprep.mubr.msk.f32.mxu0 %vm13820_vm1, %v13821_v1  ;;  %v10117_v36 = vpop.permute.xlu1 %10116 }
0x17d6   :  { %v10115_v23 = vpop.permute.xlu0 %10114  ;;  %v10139_v38 = vadd.f32 %v10117_v36, %v14853_v20 }
0x17d7   :  { %v10138_v17 = vadd.f32 %v10115_v23, %v14845_v35 }
0x17d9   :  { %v11530_v55 = vsel %vm5759_vm4, %v11522_v12, %v10138_v17  ;;  %v10121_v16 = vpop.permute.xlu1 %10120  ;;  %v7387_v12 = vadd.f32 %v15135_v50, %v14853_v20 }
0x17da   :  { %v10119_v8 = vpop.permute.xlu0 %10118  ;;  %v10141_v50 = vadd.f32 %v10121_v16, %v14861_v40 }
0x17db   :  { %v10140_v4 = vadd.f32 %v10119_v8, %v14847_v60  ;;  %v11523_v22 = vsel %vm430_vm2, %v7387_v12, %v8763_v33  ;;  %v11874_v12 = vld [vmem:[#allocation7 + $0x18] sm:$0xff] }
0x17dd   :  { %v15723_v42 = vsel %vm5759_vm4, %v11524_v27, %v10140_v4  ;;  %v8747_v59 = vpop.permute.xlu1 %8746  ;;  %v11531_v27 = vsel %vm5759_vm4, %v11523_v22, %v10139_v38  ;;  %v11876_v38 = vld [vmem:[#allocation7 + $0x38] sm:$0xff] }
0x17de   :  { %v13418_v57 = vpop.permute.xlu0 %13417 }
0x17df   :  { %v13420_v28 = vunpack.i.h.bf16 %v13418_v57  ;;  %v13419_v2 = vunpack.i.l.bf16 %v13418_v57 }
0x17e1   :  { %v13351_v56 = vpack.c.bf16 %v13420_v28, %v13419_v2  ;;  %v8751_v25 = vpop.permute.xlu1 %8750  ;;  %v8766_v28 = vadd.f32 %v8747_v59, %v14865_v37 }
0x17e2   :  { %v8749_v9 = vpop.permute.xlu0 %8748 }
0x17e3   :  { %13352 = vmatprep.subr.bf16.mxu1 %v13351_v56 }
0x17e4   :  { %13354 = vmatpush3.bf16.msra.mxu1 %v13351_v56 }
0x17e5   :  { %13361 = vmatprep.subr.bf16.mxu1 %v13819_v0  ;;  %v10123_v44 = vpop.permute.xlu1 %10122 }
0x17e6   :  { %v8753_v53 = vpop.permute.xlu0 %8752 }
0x17e9   :  { %v10127_v13 = vpop.permute.xlu1 %10126 }
0x17ea   :  { %v10125_v6 = vpop.permute.xlu0 %10124 }
0x17ee   :  { %v10129_v58 = vpop.permute.xlu0 %10128 }
0x1892   :  { %v10939_v26 = vpop.f32.mrb[128].mxu1 }
0x1893   :  { %v13245_v31 = vpop.f32.mrb[129].mxu1  ;;  %11490 = vrot.lane.b32.xlu0 %v10939_v26, %s13830_s1  ;;  %v8767_v26 = vadd.f32 %v8749_v9, %v14873_v21 }
0x1896   :  { %v11016_v45 = vpop.f32.mrb[130].mxu0 }
0x1897   :  { %11492 = vrot.lane.b32.xlu1 %v11016_v45, %s13830_s1  ;;  %v13250_v51 = vpop.f32.mrb[131].mxu0  ;;  %v7390_v45 = vadd.f32 %v15139_v39, %v14865_v37  ;;  %v7392_v39 = vadd.f32 %v15143_v3, %v14867_v46 }
0x189a   :  { %v11093_v48 = vpop.f32.mrb[130].mxu1 }
0x189b   :  { %v13255_v10 = vpop.f32.mrb[131].mxu1  ;;  %11494 = vrot.lane.b32.xlu1 %v11093_v48, %s13830_s1  ;;  %v10142_v48 = vadd.f32 %v10123_v44, %v14865_v37  ;;  %v11761_v44 = vld [vmem:[#allocation7 + $0x10] sm:$0xff] }
0x189c   :  { %v13421_v22 = vpack.i.bf16 %v11874_v12, %v11761_v44 }
0x189e   :  { %v11247_v19 = vpop.f32.mrb[132].mxu1 }
0x189f   :  { %v11170_v18 = vpop.f32.mrb[132].mxu0  ;;  %v13265_v52 = vpop.f32.mrb[133].mxu1  ;;  %11498 = vrot.lane.b32.xlu1 %v11247_v19, %s13830_s1 }
0x18a0   :  { %11496 = vrot.lane.b32.xlu0 %v11170_v18, %s13830_s1  ;;  %v13260_v30 = vpop.f32.mrb[133].mxu0  ;;  %v11526_v18 = vsel %vm430_vm2, %v7390_v45, %v8766_v28 }
0x18a2   :  { %v11401_v34 = vpop.f32.mrb[134].mxu1 }
0x18a3   :  { %v11324_v14 = vpop.f32.mrb[134].mxu0  ;;  %v13275_v11 = vpop.f32.mrb[135].mxu1  ;;  %11502 = vrot.lane.b32.xlu1 %v11401_v34, %s13830_s1 }
0x18a4   :  { %11500 = vrot.lane.b32.xlu0 %v11324_v14, %s13830_s1  ;;  %v13270_v29 = vpop.f32.mrb[135].mxu0  ;;  %v8769_v14 = vadd.f32 %v8753_v53, %v14881_v62  ;;  %v11534_v11 = vsel %vm5759_vm4, %v11526_v18, %v10142_v48 }
0x18a5   :  { %v10144_v29 = vadd.f32 %v10127_v13, %v14867_v46  ;;  %v11763_v13 = vld [vmem:[#allocation7 + $0x50] sm:$0xff] }
0x18a7   :  { %v11478_v24 = vpop.f32.mrb[136].mxu0  ;;  %11584 = vrot.lane.b32.xlu1 %v12266_v43, %s13817_s18  ;;  %v10145_v43 = vadd.f32 %v10129_v58, %v14881_v62  ;;  %s12010_s18 = sshll.u32 %s13834_s0, 4  ;;  %s12011_s18 = int_to_ptr.vmem [resolvable:$true] %s12010_s18 }
0x18a8   :  { %11504 = vrot.lane.b32.xlu0 %v11478_v24, %s13830_s1  ;;  %v13280_v15 = vpop.f32.mrb[137].mxu0  ;;  %v7393_v24 = vadd.f32 %v15147_v47, %v14881_v62  ;;  %p13788_p11 = scmp.lt.s32.totalorder %s12011_s18, %s12011_s18 }
0x18aa   :  { %v11529_v9 = vsel %vm430_vm2, %v7393_v24, %v8769_v14 }
0x18ab   :  { %v11537_v53 = vsel %vm5759_vm4, %v11529_v9, %v10145_v43 }
0x18ac   :  { %13422 = vrot.lane.b32.xlu0 %v13421_v22, %s13822_s29 }
0x1905   :  { %v11491_v54 = vpop.permute.xlu0 %11490 }
0x1906   :  { %v11514_v41 = vadd.f32 %v11491_v54, %v14845_v35  ;;  %v8765_v35 = vadd.f32 %v8745_v61, %v14861_v40  ;;  %v11764_v54 = vld [vmem:[#allocation7 + $0x70] sm:$0xff] }
0x1907   :  { %v13359_v33 = vpack.c.bf16 %v11764_v54, %v11763_v13 }
0x1908   :  { %v15747_v23 = vsel %vm5768_vm5, %v11530_v55, %v11514_v41  ;;  %v11880_v41 = vld [vmem:[#allocation7 + $0x78] sm:$0xff] }
0x1909   :  { %v11493_v5 = vpop.permute.xlu1 %11492 }
0x190a   :  { %v11515_v49 = vadd.f32 %v11493_v5, %v14853_v20  ;;  %v7389_v20 = vadd.f32 %v15141_v63, %v14861_v40  ;;  %v10143_v63 = vadd.f32 %v10125_v6, %v14873_v21 }
0x190c   :  { %v15750_v17 = vsel %vm5768_vm5, %v11531_v27, %v11515_v49  ;;  %v11525_v56 = vsel %vm430_vm2, %v7389_v20, %v8765_v35  ;;  %v11878_v49 = vld [vmem:[#allocation7 + $0x58] sm:$0xff] }
0x190d   :  { %v11564_v8 = vcombine.low %v15747_v23, %v15750_v17  ;;  %v11495_v4 = vpop.permute.xlu1 %11494  ;;  %v11533_v51 = vsel %vm5759_vm4, %v11525_v56, %v10141_v50  ;;  %v13431_v27 = vpack.i.bf16 %v11878_v49, %v11763_v13 }
0x190e   :  { %v11516_v57 = vadd.f32 %v11495_v4, %v14847_v60  ;;  %v7391_v60 = vadd.f32 %v15145_v7, %v14873_v21  ;;  %v8768_v7 = vadd.f32 %v8751_v25, %v14867_v46 }
0x190f   :  { %13289 = vmatprep.mubr.msk.f32.mxu1 %vm68_vm0, %v11564_v8  ;;  %13432 = vrot.lane.b32.xlu0 %v13431_v27, %s13822_s29 }
0x1910   :  { %v15773_v10 = vsel %vm5768_vm5, %v15723_v42, %v11516_v57  ;;  %v11527_v42 = vsel %vm430_vm2, %v7391_v60, %v8767_v26  ;;  %v11528_v16 = vsel %vm430_vm2, %v7392_v39, %v8768_v7  ;;  %vm11915_vm2 = vcmask 785408  }
0x1911   :  { %v11499_v55 = vpop.permute.xlu1 %11498  ;;  %v11535_v3 = vsel %vm5759_vm4, %v11527_v42, %v10143_v63  ;;  %v11536_v47 = vsel %vm5759_vm4, %v11528_v16, %v10144_v29 }
0x1912   :  { %v11497_v2 = vpop.permute.xlu0 %11496  ;;  %v11518_v19 = vadd.f32 %v11499_v55, %v14865_v37 }
0x1913   :  { %v11517_v31 = vadd.f32 %v11497_v2, %v14861_v40 }
0x1914   :  { %v15796_v15 = vsel %vm5768_vm5, %v11534_v11, %v11518_v19 }
0x1915   :  { %v15777_v40 = vsel %vm5768_vm5, %v11533_v51, %v11517_v31  ;;  %v11503_v30 = vpop.permute.xlu1 %11502 }
0x1916   :  { %v11565_v52 = vcombine.low %v15773_v10, %v15777_v40  ;;  %v11501_v34 = vpop.permute.xlu0 %11500  ;;  %v11520_v32 = vadd.f32 %v11503_v30, %v14867_v46 }
0x1917   :  { %v11519_v37 = vadd.f32 %v11501_v34, %v14873_v21 }
0x1918   :  { %13290 = vmatmul.mubr.msk.f32.vlgmr.msra.gmra.mrb[136].mxu1 %vm68_vm0, %v11565_v52  ;;  %v11544_v46 = vsel %vm5768_vm5, %v11536_v47, %v11520_v32 }
0x1919   :  { %v15800_v21 = vsel %vm5768_vm5, %v11535_v3, %v11519_v37  ;;  %v11585_v8 = vpop.permute.xlu1 %11584 }
0x191a   :  { %v11566_v61 = vcombine.low %v15796_v15, %v15800_v21  ;;  %v11505_v36 = vpop.permute.xlu0 %11504 }
0x191b   :  { %v11521_v59 = vadd.f32 %v11505_v36, %v14881_v62  ;;  %v11762_v62 = vld [vmem:[#allocation7 + $0x30] sm:$0xff] }
0x191c   :  { %13292 = vmatprep.mubr.msk.f32.mxu1 %vm68_vm0, %v11566_v61  ;;  %v13356_v58 = vpack.c.bf16 %v11762_v62, %v11761_v44  ;;  %v13426_v5 = vpack.i.bf16 %v11876_v38, %v11762_v62 }
0x191d   :  { %v15812_v25 = vsel %vm5768_vm5, %v11537_v53, %v11521_v59 }
0x191e   :  { %v11567_v6 = vcombine.low %v11544_v46, %v15812_v25  ;;  %13357 = vmatpush3.bf16.msra.mxu0 %v13356_v58  ;;  %13427 = vrot.lane.b32.xlu1 %v13426_v5, %s13822_s29 }
0x191f   :  { %13358 = vmatprep.subr.bf16.mxu0 %v13819_v0 }
0x1920   :  { %13293 = vmatmul.mubr.msk.f32.gmra.mrb[138].mxu1 %vm68_vm0, %v11567_v6 }
0x1921   :  { %13314 = vmatprep.mubr.msk.f32.mxu1 %vm13820_vm1, %v13821_v1  ;;  %v13436_v1 = vpack.i.bf16 %v11880_v41, %v11764_v54  ;;  %vm11792_vm1 = vcmask 1047559  }
0x1922   :  { %13360 = vmatpush3.bf16.msra.mxu0 %v13359_v33 }
0x1923   :  { %13437 = vrot.lane.b32.xlu1 %v13436_v1, %s13822_s29 }
0x19eb   :  { %v13291_v4 = vpop.f32.mrb[136].mxu1 }
0x19ec   :  { %v11667_v35 = vadd.f32 %v13291_v4, %v11585_v8  ;;  %v11661_v50 = vpop.f32.mrb[137].mxu1 }
0x19ed   :  { %v11662_v20 = vadd.f32 %v11661_v50, %v11585_v8 }
0x19ee   :  { %v11681_v57 = vmax.f32 %v11667_v35, 0.0 }
0x19ef   :  { %v11680_v55 = vmax.f32 %v11662_v20, 0.0 }
0x19f0   :  { %v11689_v28 = vcombine.high %v11681_v57, %v11681_v57  ;;  %v11698_v2 = vadd.f32 %v11681_v57, %v15773_v10 }
0x19f1   :  { %v11688_v56 = vcombine.high %v11680_v55, %v11680_v55  ;;  %v11696_v26 = vadd.f32 %v11680_v55, %v15747_v23 }
0x19f2   :  { %v11699_v31 = vadd.f32 %v11689_v28, %v15777_v40  ;;  %v11719_v45 = vsel %vm11704_vm9, %v11698_v2, -inf }
0x19f3   :  { %v11720_v51 = vrot.slane %v11719_v45, 4  ;;  %v11697_v48 = vadd.f32 %v11688_v56, %v15750_v17  ;;  %v11705_v63 = vsel %vm11704_vm9, %v11696_v26, -inf  ;;  %v13294_v60 = vpop.f32.mrb[138].mxu1 }
0x19f4   :  { %v11726_v19 = vsel %vm11704_vm9, %v11699_v31, -inf  ;;  %v11706_v39 = vrot.slane %v11705_v63, 4  ;;  %v11677_v18 = vadd.f32 %v13294_v60, %v11585_v8  ;;  %v11671_v52 = vpop.f32.mrb[139].mxu1 }
0x19f5   :  { %v11721_v30 = vmax.f32 %v11719_v45, %v11720_v51  ;;  %v11727_v10 = vrot.slane %v11726_v19, 4  ;;  %v11712_v34 = vsel %vm11704_vm9, %v11697_v48, -inf  ;;  %v11672_v23 = vadd.f32 %v11671_v52, %v11585_v8 }
0x19f6   :  { %v11707_v7 = vmax.f32 %v11705_v63, %v11706_v39  ;;  %v11713_v40 = vrot.slane %v11712_v34, 4  ;;  %v11683_v42 = vmax.f32 %v11677_v18, 0.0 }
0x19f7   :  { %v11722_v14 = vrot.slane %v11721_v30, 2  ;;  %v11728_v37 = vmax.f32 %v11726_v19, %v11727_v10  ;;  %v11682_v11 = vmax.f32 %v11672_v23, 0.0 }
0x19f8   :  { %v11708_v17 = vrot.slane %v11707_v7, 2  ;;  %v11714_v29 = vmax.f32 %v11712_v34, %v11713_v40  ;;  %v11691_v3 = vcombine.high %v11683_v42, %v11683_v42  ;;  %v11702_v43 = vadd.f32 %v11683_v42, %v11544_v46  ;;  %v13423_v40 = vpop.permute.xlu0 %13422 }
0x19f9   :  { %v11723_v24 = vmax.f32 %v11721_v30, %v11722_v14  ;;  %v11729_v32 = vrot.slane %v11728_v37, 2  ;;  %v11690_v61 = vcombine.high %v11682_v11, %v11682_v11  ;;  %v11700_v36 = vadd.f32 %v11682_v11, %v15796_v15 }
0x19fa   :  { %v11709_v16 = vmax.f32 %v11707_v7, %v11708_v17  ;;  %v11715_v9 = vrot.slane %v11714_v29, 2  ;;  %v11703_v59 = vadd.f32 %v11691_v3, %v15812_v25  ;;  %v11747_v47 = vsel %vm11704_vm9, %v11702_v43, -inf  ;;  %v13428_v7 = vpop.permute.xlu1 %13427 }
0x19fb   :  { %v11730_v53 = vmax.f32 %v11728_v37, %v11729_v32  ;;  %v11748_v6 = vrot.slane %v11747_v47, 4  ;;  %v11701_v44 = vadd.f32 %v11690_v61, %v15800_v21  ;;  %v11733_v46 = vsel %vm11704_vm9, %v11700_v36, -inf }
0x19fc   :  { %v11710_v62 = vrot.slane %v11709_v16, 1  ;;  %v11716_v58 = vmax.f32 %v11714_v29, %v11715_v9  ;;  %v11754_v13 = vsel %vm11704_vm9, %v11703_v59, -inf  ;;  %v11724_v54 = vrot.slane %v11723_v24, 1 }
0x19fd   :  { %v11749_v33 = vmax.f32 %v11747_v47, %v11748_v6  ;;  %v11755_v38 = vrot.slane %v11754_v13, 4  ;;  %v11731_v15 = vrot.slane %v11730_v53, 1  ;;  %v11734_v41 = vrot.slane %v11733_v46, 4 }
0x19fe   :  { %v11717_v12 = vrot.slane %v11716_v58, 1  ;;  %v11740_v25 = vsel %vm11704_vm9, %v11701_v44, -inf  ;;  %v11711_v1 = vmax.f32 %v11709_v16, %v11710_v62  ;;  %v11725_v8 = vmax.f32 %v11723_v24, %v11724_v54  ;;  %v13438_v43 = vpop.permute.xlu1 %13437  ;;  %v13433_v24 = vpop.permute.xlu0 %13432  ;;  %v11881_v44 = vld [vmem:[%s15869_s3 + $0x2] sm:$0x3] }
0x19ff   :  { %v11750_v5 = vrot.slane %v11749_v33, 2  ;;  %v11756_v22 = vmax.f32 %v11754_v13, %v11755_v38  ;;  %v11741_v49 = vrot.slane %v11740_v25, 4  ;;  %v11735_v27 = vmax.f32 %v11733_v46, %v11734_v41 }
0x1a00   :  { %v11718_v21 = vmax.f32 %v11716_v58, %v11717_v12  ;;  %v11732_v50 = vmax.f32 %v11730_v53, %v11731_v15  ;;  %v13430_v42 = vunpack.i.h.bf16 %v13428_v7  ;;  %v13429_v14 = vunpack.i.l.bf16 %v13428_v7 }
0x1a01   :  { %v11757_v4 = vrot.slane %v11756_v22, 2  ;;  %v11742_v35 = vmax.f32 %v11740_v25, %v11741_v49  ;;  %v11751_v57 = vmax.f32 %v11749_v33, %v11750_v5  ;;  %v11736_v55 = vrot.slane %v11735_v27, 2 }
0x1a02   :  { %v11781_v20 = vsel %vm11780_vm10, %v11718_v21, %v11711_v1  ;;  %v13425_v37 = vunpack.i.h.bf16 %v13423_v40  ;;  %v13424_v11 = vunpack.i.l.bf16 %v13423_v40  ;;  %v11917_v17 = vsel %vm11915_vm2, %v13429_v14, %v13430_v42 }
0x1a03   :  { %v11783_v28 = vsel %vm11782_vm11, %v11725_v8, %v11781_v20  ;;  %v11758_v2 = vmax.f32 %v11756_v22, %v11757_v4  ;;  %v11743_v56 = vrot.slane %v11742_v35, 2  ;;  %v11737_v26 = vmax.f32 %v11735_v27, %v11736_v55 }
0x1a04   :  { %v11785_v31 = vsel %vm11784_vm12, %v11732_v50, %v11783_v28  ;;  %v11752_v51 = vrot.slane %v11751_v57, 1  ;;  %v11916_v29 = vsel %vm11915_vm2, %v13424_v11, %v13425_v37  ;;  %v13440_v32 = vunpack.i.h.bf16 %v13438_v43 }
0x1a05   :  { %v11744_v45 = vmax.f32 %v11742_v35, %v11743_v56  ;;  %v11738_v48 = vrot.slane %v11737_v26, 1  ;;  %v11759_v63 = vrot.slane %v11758_v2, 1  ;;  %v13362_v3 = vpack.c.bf16 %v11917_v17, %v11916_v29 }
0x1a06   :  { %v11753_v18 = vmax.f32 %v11751_v57, %v11752_v51  ;;  %v13439_v61 = vunpack.i.l.bf16 %v13438_v43  ;;  %v13435_v36 = vunpack.i.h.bf16 %v13433_v24  ;;  %v13434_v16 = vunpack.i.l.bf16 %v13433_v24 }
0x1a07   :  { %v11745_v60 = vrot.slane %v11744_v45, 1  ;;  %v11739_v19 = vmax.f32 %v11737_v26, %v11738_v48  ;;  %v11760_v30 = vmax.f32 %v11758_v2, %v11759_v63  ;;  %13363 = vmatpush3.bf16.msra.mxu1 %v13362_v3  ;;  %v11883_v53 = vlaneseq }
0x1a08   :  { %v11919_v9 = vsel %vm11915_vm2, %v13439_v61, %v13440_v32  ;;  %v11918_v59 = vsel %vm11915_vm2, %v13434_v16, %v13435_v36  ;;  %13364 = vmatprep.subr.bf16.mxu1 %v13819_v0  ;;  %v12271_v0 = vld [vmem:[%s15869_s3 + $0x2] ss:$0 sm:$0xff]  ;;  %s13783_s3 = scalar_lea.vmem %s12011_s18, 128 }
0x1a09   :  { %v11746_v39 = vmax.f32 %v11744_v45, %v11745_v60  ;;  %v11787_v52 = vsel %vm11786_vm13, %v11739_v19, %v11785_v31  ;;  %v13365_v47 = vpack.c.bf16 %v11919_v9, %v11918_v59  ;;  %v11884_v6 = vshrl.u32 %v11883_v53, 7  ;;  %p13784_p10 = scmp.ne.s32.totalorder %s12011_s18, %s13783_s3  ;;  %p13789_p12 = scmp.lt.s32.totalorder %s13783_s3, %s13783_s3 }
0x1a0b   :  { %v11789_v10 = vsel %vm11788_vm14, %v11746_v39, %v11787_v52  ;;  %13366 = vmatpush3.bf16.msra.mxu1 %v13365_v47  ;;  %v11889_v62 = vsub.s32 1, %v11884_v6  ;;  %v11885_v58 = vsub.s32 0, %v11884_v6  ;;  %p13790_p13 = por %p13789_p12, %p13788_p11 }
0x1a0c   :  { %v11791_v34 = vsel %vm11790_vm15, %v11753_v18, %v11789_v10 }
0x1a0d   :  { %v11793_v23 = vsel %vm11792_vm1, %v11760_v30, %v11791_v34  ;;  %v11890_v13 = vrot.slane %v11881_v44, %v11889_v62  ;;  %v11886_v46 = vrot.slane %v11881_v44, %v11885_v58  ;;  %p13791_p0 = pnand %p13790_p13, %p13784_p10 }
0x1a0e   :  { %13304 = vmatmul.mubr.msk.f32.vlgmr.msra.gmra.mrb[138].mxu0 %vm68_vm0, %v11793_v23 }
0x1a0f   :  { %11926 = vrot.lane.b32.xlu1 %v11890_v13, %s13822_s29  ;;  %11924 = vrot.lane.b32.xlu0 %v11886_v46, %s13822_s29 }
0x1a81   :  { %v11927_v22 = vpop.permute.xlu1 %11926  ;;  %v11925_v49 = vpop.permute.xlu0 %11924 }
0x1a82   :  { %v11928_v1 = vsel %vm11915_vm2, %v11925_v49, %v11927_v22 }
0x1ae1   :  { %v11862_v54 = vpop.f32.mrb[138].mxu0 }
0x1ae2   :  { %v11863_v33 = vadd.f32 %v12271_v0, %v11862_v54  ;;  %v13305_v38 = vpop.f32.mrb[139].mxu0 }
0x1ae4   :  { %v12273_v15 = vmul.f32 -1.442695, %v11863_v33 }
0x1ae6   :  { %13713 = vpow2.f32 %v12273_v15 }
0x1af0   :  { %v13714_v12 = vpop.eup %13713 }
0x1af1   :  { %v11869_v41 = vadd.f32 1.0, %v13714_v12 }
0x1af3   :  { %13715 = vrcp.f32 %v11869_v41 }
0x1afd   :  { %v13716_v25 = vpop.eup %13715 }
0x1afe   :  { %v11872_v5 = vmul.f32 %v13716_v25, %v11863_v33 }
0x1b00   :  { %13315 = vmatmul.mubr.msk.f32.vlgmr.msra.gmra.mrb[140].mxu1 %vm68_vm0, %v11872_v5 }
0x1bd3   :  { %v11999_v21 = vpop.f32.mrb[140].mxu1 }
0x1bd4   :  { %v12000_v27 = vadd.f32 %v11999_v21, %v11928_v1  ;;  %v13316_v8 = vpop.f32.mrb[141].mxu1 }
0x1bd6   :  { %12003 = vst [vmem:[#allocation8] sm:$0xff] %v12000_v27 }
0x1bd7   :  { %13794 = shalt.err (!%p13791_p0)
}
0x1bd8   :  { %s13795_s2 = scalar_lea.hbm %s15870_s4, 128 }
0x1bd9   :  { %p13796_p1 = scmp.ne.s32.totalorder %s15870_s4, %s13795_s2  ;;  %p13799_p2 = scmp.lt.u32.totalorder %s13795_s2, %s15870_s4 }
0x1bdb   :  { %p13801_p3 = pnand %p13799_p2, %p13796_p1 }
0x1bdd   :  { %13804 = shalt.err (!%p13801_p3)
}
0x1bde   :  { %12013 = dma.vmem_to_hbm [thread:$0]  %s12011_s18, 128, %s15870_s4, [#allocation4]  }
0x1bdf   :  { %13809 = dma.done.wait [#allocation4], 128  }
0x1be0   :  { %13810 = vsyncadd [#allocation4], 4294967168 }
0x1be1   :  { %12017 = vsyncpa [#allocation3], 1 }
0x1be2   :  { %12018 = vsyncpa [#allocation6], 1 }
0x1be3   :  { %12019 = vsyncpa [#allocation4], 1 }

</bundles_post_ra>
